<compile_context>
chip_gen: v7x
topology: tpu7x:2x2x1
jax: 0.10.0
libtpu: 0.0.40
codegen_flags: <defaults>
</compile_context>

<pallas_src>
from functools import partial

import jax
import jax.numpy as jnp
from jax.experimental import pallas as pl
from jax.experimental.pallas import tpu as pltpu

_NEG_INF = -1e30


# --------------------------------------------------------------------------------------
# Pass 1: per-destination-node softmax statistics (running max + denominator),
# accumulated online across edge blocks directly in the (resident) output refs.
# --------------------------------------------------------------------------------------
def _stats_kernel(edge_ref, w_ref, dst_n2e_ref, dst_e2n_ref,
                  nmax_ref, nden_ref, *, negative_slope):
    eb = pl.program_id(0)

    @pl.when(eb == 0)
    def _():
        nmax_ref[...] = jnp.full(nmax_ref.shape, _NEG_INF, dtype=nmax_ref.dtype)
        nden_ref[...] = jnp.zeros(nden_ref.shape, dtype=nden_ref.dtype)

    edge_emb = edge_ref[...]                            # (TE, HDp) f32
    w_bd = w_ref[...]                                   # (HDp, H)  f32
    dst_n2e = dst_n2e_ref[...].astype(jnp.float32)      # (N, TE)   one-hot (scatter dir)
    dst_e2n = dst_e2n_ref[...].astype(jnp.float32)      # (TE, N)   one-hot (gather dir)

    # per-head attention logits + LeakyReLU
    alpha = jnp.dot(edge_emb, w_bd, preferred_element_type=jnp.float32)   # (TE, H)
    alpha = jnp.where(alpha > 0, alpha, negative_slope * alpha)

    # block-local per-node max over incident edges; (N, TE, H) intermediate, N << E
    masked = jnp.where(dst_n2e[:, :, None] > 0.0, alpha[None, :, :], _NEG_INF)
    blk_max = jnp.max(masked, axis=1)                                     # (N, H)

    old_max = nmax_ref[...]
    new_max = jnp.maximum(old_max, blk_max)
    # exact gather of new_max to edges via one-hot rows (MXU)
    max_pe = jnp.dot(dst_e2n, new_max, preferred_element_type=jnp.float32)  # (TE, H)
    exp_blk = jnp.exp(alpha - max_pe)                                       # (TE, H)
    # segment-sum (scatter-add) of exp terms to nodes via one-hot (MXU)
    den_blk = jnp.dot(dst_n2e, exp_blk, preferred_element_type=jnp.float32)  # (N, H)

    # online rescale of the running denominator (flash-style)
    nden_ref[...] = nden_ref[...] * jnp.exp(old_max - new_max) + den_blk
    nmax_ref[...] = new_max


# --------------------------------------------------------------------------------------
# Pass 2: apply the softmax, build edata['a'], do src_mul_edge + segment-sum message
# passing, and apply the Residual adds on node and edge 'emb'.
# --------------------------------------------------------------------------------------
def _apply_kernel(nmax_ref, nden_ref, edge_ref, node_ref, w_ref, rexp_ref,
                  src_e2n_ref, dst_n2e_ref, dst_e2n_ref,
                  node_out_ref, edge_a_ref, edge_out_ref, nacc_ref,
                  *, negative_slope):
    eb = pl.program_id(0)
    nb = pl.num_programs(0)

    @pl.when(eb == 0)
    def _():
        nacc_ref[...] = jnp.zeros(nacc_ref.shape, dtype=nacc_ref.dtype)

    edge_emb = edge_ref[...]                             # (TE, HDp)
    node_emb = node_ref[...]                             # (N, HDp)
    w_bd = w_ref[...]                                    # (HDp, H)
    rexp = rexp_ref[...]                                 # (H, HDp)
    src_e2n = src_e2n_ref[...].astype(jnp.float32)       # (TE, N)
    dst_n2e = dst_n2e_ref[...].astype(jnp.float32)       # (N, TE)
    dst_e2n = dst_e2n_ref[...].astype(jnp.float32)       # (TE, N)

    alpha = jnp.dot(edge_emb, w_bd, preferred_element_type=jnp.float32)   # (TE, H)
    alpha = jnp.where(alpha > 0, alpha, negative_slope * alpha)

    # gather the node-level softmax statistics back to edges (exact one-hot gather, MXU)
    max_pe = jnp.dot(dst_e2n, nmax_ref[...], preferred_element_type=jnp.float32)  # (TE, H)
    den_pe = jnp.dot(dst_e2n, nden_ref[...], preferred_element_type=jnp.float32)  # (TE, H)

    exp_a = jnp.exp(alpha - max_pe)
    inv_den = pl.reciprocal(den_pe, approx=True)            # EUP slot, keeps VALU free
    a_soft = jnp.where(den_pe > 0.0, exp_a * inv_den, 0.0)  # padded edges -> 0

    # edata['a'] = softmax * edge features (per-head scalar expanded to its feature slab)
    a_rep = jnp.dot(a_soft, rexp, preferred_element_type=jnp.float32)     # (TE, HDp)
    edge_a = a_rep * edge_emb
    edge_a_ref[...] = edge_a

    # Residual on edata['emb'] (inner module leaves it unchanged -> += original doubles it)
    edge_out_ref[...] = edge_emb + edge_emb

    # message passing: gather src node features, multiply by 'a', segment-sum to dst nodes
    src_feat = jnp.dot(src_e2n, node_emb, preferred_element_type=jnp.float32)   # (TE, HDp)
    m = src_feat * edge_a
    nacc_ref[...] += jnp.dot(dst_n2e, m, preferred_element_type=jnp.float32)    # (N, HDp)

    @pl.when(eb == nb - 1)
    def _():
        # Residual on ndata['emb']
        node_out_ref[...] = nacc_ref[...] + node_emb


# --------------------------------------------------------------------------------------
# Wrapper: layout plumbing (lane-dense padding, one-hot construction) + two pallas_calls.
# --------------------------------------------------------------------------------------
def residual_magic_attn(edge_emb, node_emb, attn_w, src, dst, *, n_heads,
                        negative_slope=0.2, edge_block=128):
    E, HD = edge_emb.shape
    N = node_emb.shape[0]
    H = n_heads
    D = HD // H
    assert H * D == HD and node_emb.shape[1] == HD

    f32 = jnp.float32
    bf16 = jnp.bfloat16

    # lane-dense feature padding (multiple of 128) and edge padding (multiple of edge_block)
    HDp = ((HD + 127) // 128) * 128
    EB = pl.cdiv(E, edge_block)
    Ep = EB * edge_block
    TE = edge_block

    edge_p = jnp.zeros((Ep, HDp), f32).at[:E, :HD].set(edge_emb.astype(f32))
    node_p = jnp.zeros((N, HDp), f32).at[:, :HD].set(node_emb.astype(f32))

    # MultiLinear weights as a block-diagonal (HDp, H) matrix; per-head scalar expander.
    w = attn_w[..., 0].astype(f32)                                   # (H, D)
    eye_h = jnp.eye(H, dtype=f32)
    w_bd = (w[:, :, None] * eye_h[:, None, :]).reshape(HD, H)
    w_bd = jnp.zeros((HDp, H), f32).at[:HD, :].set(w_bd)
    rexp = (eye_h[:, :, None] * jnp.ones((1, 1, D), f32)).reshape(H, HD)
    rexp = jnp.zeros((H, HDp), f32).at[:, :HD].set(rexp)

    # One-hot indicator matrices (0/1 exact in bf16 -> half the DMA bytes). Padded edges
    # get all-zero rows, i.e. no source, no destination.
    src_e2n = jnp.zeros((Ep, N), bf16).at[:E].set(jax.nn.one_hot(src, N, dtype=bf16))
    dst_e2n = jnp.zeros((Ep, N), bf16).at[:E].set(jax.nn.one_hot(dst, N, dtype=bf16))
    dst_n2e = dst_e2n.T                                              # (N, Ep)

    cparams = pltpu.CompilerParams(
        dimension_semantics=("arbitrary",),        # edge axis is a reduction
        vmem_limit_bytes=32 * 1024 * 1024,         # safe on v5e / v6e / v7x
    )

    stats_cost = pl.CostEstimate(
        flops=int(2 * Ep * HDp * H + 4 * Ep * N * H + 8 * N * Ep * H),
        transcendentals=int(Ep * H + 2 * N * H * EB),
        bytes_accessed=int(4 * (Ep * HDp + HDp * H + 2 * N * H) + 2 * (2 * Ep * N)),
    )
    apply_cost = pl.CostEstimate(
        flops=int(2 * Ep * HDp * H + 4 * Ep * N * H + 2 * Ep * H * HDp
                  + 4 * Ep * N * HDp + 6 * Ep * HDp),
        transcendentals=int(2 * Ep * H),
        bytes_accessed=int(4 * (3 * Ep * HDp + 2 * N * HDp + HDp * H + H * HDp + 2 * N * H)
                           + 2 * (3 * Ep * N)),
    )

    # ---- pass 1: per-destination-node softmax statistics ------------------------------
    nmax, nden = pl.pallas_call(
        partial(_stats_kernel, negative_slope=negative_slope),
        grid=(EB,),
        in_specs=[
            pl.BlockSpec((TE, HDp), lambda e: (e, 0)),   # edge_emb block
            pl.BlockSpec((HDp, H), lambda e: (0, 0)),    # block-diag weights (resident)
            pl.BlockSpec((N, TE), lambda e: (0, e)),     # dst one-hot, node-major
            pl.BlockSpec((TE, N), lambda e: (e, 0)),     # dst one-hot, edge-major
        ],
        out_specs=(
            pl.BlockSpec((N, H), lambda e: (0, 0)),      # node max   (resident accumulator)
            pl.BlockSpec((N, H), lambda e: (0, 0)),      # node denom (resident accumulator)
        ),
        out_shape=(jax.ShapeDtypeStruct((N, H), f32),
                   jax.ShapeDtypeStruct((N, H), f32)),
        compiler_params=cparams,
        cost_estimate=stats_cost,
    )(edge_p, w_bd, dst_n2e, dst_e2n)

    # ---- pass 2: apply softmax, message passing, residual adds ------------------------
    node_out_p, edge_a_p, edge_out_p = pl.pallas_call(
        partial(_apply_kernel, negative_slope=negative_slope),
        grid=(EB,),
        in_specs=[
            pl.BlockSpec((N, H), lambda e: (0, 0)),      # node max
            pl.BlockSpec((N, H), lambda e: (0, 0)),      # node denom
            pl.BlockSpec((TE, HDp), lambda e: (e, 0)),   # edge_emb block
            pl.BlockSpec((N, HDp), lambda e: (0, 0)),    # node_emb (resident)
            pl.BlockSpec((HDp, H), lambda e: (0, 0)),    # block-diag weights
            pl.BlockSpec((H, HDp), lambda e: (0, 0)),    # per-head expander
            pl.BlockSpec((TE, N), lambda e: (e, 0)),     # src one-hot
            pl.BlockSpec((N, TE), lambda e: (0, e)),     # dst one-hot, node-major
            pl.BlockSpec((TE, N), lambda e: (e, 0)),     # dst one-hot, edge-major
        ],
        out_specs=(
            pl.BlockSpec((N, HDp), lambda e: (0, 0)),    # node 'emb' (resident, finalize)
            pl.BlockSpec((TE, HDp), lambda e: (e, 0)),   # edge 'a'
            pl.BlockSpec((TE, HDp), lambda e: (e, 0)),   # edge 'emb' (with residual)
        ),
        out_shape=(jax.ShapeDtypeStruct((N, HDp), f32),
                   jax.ShapeDtypeStruct((Ep, HDp), f32),
                   jax.ShapeDtypeStruct((Ep, HDp), f32)),
        scratch_shapes=[pltpu.VMEM((N, HDp), f32)],      # node accumulator
        compiler_params=cparams,
        cost_estimate=apply_cost,
    )(nmax, nden, edge_p, node_p, w_bd, rexp, src_e2n, dst_n2e, dst_e2n)

    node_out = node_out_p[:, :HD]
    edge_out = edge_out_p[:E, :HD]
    edge_a = edge_a_p[:E, :HD].reshape(E, H, D)
    return node_out, edge_out, edge_a


# --------------------------------------------------------------------------------------
# Pure-JAX reference mirroring the PyTorch/DGL semantics of Residual(graph attention).
# --------------------------------------------------------------------------------------
def residual_magic_attn_reference(edge_emb, node_emb, attn_w, src, dst, *, n_heads,
                                  negative_slope=0.2):
    E, HD = edge_emb.shape
    N = node_emb.shape[0]
    H = n_heads
    D = HD // H
    ev = edge_emb.reshape(E, H, D)
    alpha = jnp.einsum('ehd,hd->eh', ev, attn_w[..., 0])
    alpha = jnp.where(alpha > 0, alpha, negative_slope * alpha)
    node_max = jnp.full((N, H), -jnp.inf, jnp.float32).at[dst].max(alpha)
    exp_a = jnp.exp(alpha - node_max[dst])
    denom = jnp.zeros((N, H), jnp.float32).at[dst].add(exp_a)
    a_soft = exp_a / denom[dst]
    a = a_soft[:, :, None] * ev
    msg = node_emb.reshape(N, H, D)[src] * a
    attn_out = jnp.zeros((N, H, D), jnp.float32).at[dst].add(msg).reshape(N, HD)
    node_out = attn_out + node_emb          # Residual: ndata['emb'] += nemb
    edge_out = edge_emb + edge_emb          # Residual: edata['emb'] += eemb (inner no-op)
    return node_out, edge_out, a


if __name__ == "__main__":
    # Small graph, but > 1 edge block so the tiled two-pass softmax path is exercised:
    # n_heads H = 4, per-head edge dim D = 8 -> feature width 32; N = 16 nodes, E = 256 edges.
    N, E, H, D = 16, 256, 4, 8
    HD = H * D

    key = jax.random.PRNGKey(0)
    k_e, k_n, k_w, k_s, k_d = jax.random.split(key, 5)

    edge_emb = jax.random.normal(k_e, (E, HD), jnp.float32)
    node_emb = jax.random.normal(k_n, (N, HD), jnp.float32)

    # xavier_normal_ with gain = calculate_gain('leaky_relu', 0.2) on a (H, D, 1) tensor.
    gain = (2.0 / (1.0 + 0.2 ** 2)) ** 0.5
    std = gain * (2.0 / (D + H)) ** 0.5
    attn_w = std * jax.random.normal(k_w, (H, D, 1), jnp.float32)

    src = jax.random.randint(k_s, (E,), 0, N)
    dst = jax.random.randint(k_d, (E,), 0, N)

    node_out, edge_out, edge_a = residual_magic_attn(
        edge_emb, node_emb, attn_w, src, dst, n_heads=H, negative_slope=0.2)
    jax.block_until_ready((node_out, edge_out, edge_a))

    ref_node, ref_edge, ref_a = residual_magic_attn_reference(
        edge_emb, node_emb, attn_w, src, dst, n_heads=H, negative_slope=0.2)

    # Tolerance loosened slightly to account for the EUP approximate reciprocal in the
    # softmax normalization (values are O(1), so 2e-2 still catches structural errors).
    assert jnp.allclose(node_out, ref_node, atol=2e-2, rtol=2e-2)
    assert jnp.allclose(edge_a, ref_a, atol=2e-2, rtol=2e-2)
    assert jnp.allclose(edge_out, ref_edge, atol=1e-5, rtol=1e-5)

    print("KERNEL_OK")
</pallas_src>

<mosaic_0001>
module attributes {stable_mosaic.version = 11 : i64} {
  func.func @_stats_kernel(%arg0: i32, %arg1: memref<128x128xf32, #tpu.memory_space<vmem>>, %arg2: memref<128x4xf32, #tpu.memory_space<vmem>>, %arg3: memref<16x128xbf16, #tpu.memory_space<vmem>>, %arg4: memref<128x16xbf16, #tpu.memory_space<vmem>>, %arg5: memref<16x4xf32, #tpu.memory_space<vmem>>, %arg6: memref<16x4xf32, #tpu.memory_space<vmem>>) attributes {dimension_semantics = [#tpu.dimension_semantics<arbitrary>], iteration_bounds = array<i64: 2>, scalar_prefetch = 0 : i64, scratch_operands = 0 : i64, tpu.core_type = #tpu.core_type<tc>, window_params = [{transform_indices = @transform_0, window_bounds = array<i64: 128, 128>}, {pipeline_mode = #tpu.pipeline_mode<synchronous>, transform_indices = @transform_1, window_bounds = array<i64: 128, 4>}, {transform_indices = @transform_2, window_bounds = array<i64: 16, 128>}, {transform_indices = @transform_3, window_bounds = array<i64: 128, 16>}, {pipeline_mode = #tpu.pipeline_mode<synchronous>, transform_indices = @transform_4, window_bounds = array<i64: 16, 4>}, {pipeline_mode = #tpu.pipeline_mode<synchronous>, transform_indices = @transform_5, window_bounds = array<i64: 16, 4>}]} {
    %c0_i32 = arith.constant 0 : i32
    %0 = arith.cmpi eq, %arg0, %c0_i32 : i32
    %1 = arith.extui %0 : i1 to i32
    %c0_i32_0 = arith.constant 0 : i32
    %2 = arith.cmpi ne, %1, %c0_i32_0 : i32
    scf.if %2 {
      %cst_23 = arith.constant -1.000000e+30 : f32
      %39 = vector.broadcast %cst_23 : f32 to vector<16x4xf32>
      %c0_24 = arith.constant 0 : index
      %c0_25 = arith.constant 0 : index
      %40 = vector.load %arg5[%c0_24, %c0_25] : memref<16x4xf32, #tpu.memory_space<vmem>>, vector<16x4xf32>
      tpu.vector_store %arg5[%c0_24, %c0_25], %39 {strides = array<i32>} : memref<16x4xf32, #tpu.memory_space<vmem>>, vector<16x4xf32>,
      %cst_26 = arith.constant 0.000000e+00 : f32
      %41 = vector.broadcast %cst_26 : f32 to vector<16x4xf32>
      %c0_27 = arith.constant 0 : index
      %c0_28 = arith.constant 0 : index
      %42 = vector.load %arg6[%c0_27, %c0_28] : memref<16x4xf32, #tpu.memory_space<vmem>>, vector<16x4xf32>
      tpu.vector_store %arg6[%c0_27, %c0_28], %41 {strides = array<i32>} : memref<16x4xf32, #tpu.memory_space<vmem>>, vector<16x4xf32>,
    } else {
    }
    %c0 = arith.constant 0 : index
    %c0_1 = arith.constant 0 : index
    %3 = vector.load %arg1[%c0, %c0_1] : memref<128x128xf32, #tpu.memory_space<vmem>>, vector<128x128xf32>
    %c0_2 = arith.constant 0 : index
    %c0_3 = arith.constant 0 : index
    %4 = vector.load %arg2[%c0_2, %c0_3] : memref<128x4xf32, #tpu.memory_space<vmem>>, vector<128x4xf32>
    %c0_4 = arith.constant 0 : index
    %c0_5 = arith.constant 0 : index
    %5 = vector.load %arg3[%c0_4, %c0_5] : memref<16x128xbf16, #tpu.memory_space<vmem>>, vector<16x128xbf16>
    %6 = arith.extf %5 : vector<16x128xbf16> to vector<16x128xf32>
    %c0_6 = arith.constant 0 : index
    %c0_7 = arith.constant 0 : index
    %7 = vector.load %arg4[%c0_6, %c0_7] : memref<128x16xbf16, #tpu.memory_space<vmem>>, vector<128x16xbf16>
    %8 = arith.extf %7 : vector<128x16xbf16> to vector<128x16xf32>
    %cst = arith.constant dense<0.000000e+00> : vector<128x4xf32>
    %9 = tpu.matmul %3, %4, %cst {dimension_numbers = #tpu.dot_dimension_numbers<[1], [0], [0], [1], [0, 0, 1, 1], [], []>} : vector<128x128xf32>, vector<128x4xf32>, vector<128x4xf32> -> vector<128x4xf32>
    %cst_8 = arith.constant 0.000000e+00 : f32
    %10 = vector.broadcast %cst_8 : f32 to vector<128x4xf32>
    %11 = arith.cmpf ogt, %9, %10 : vector<128x4xf32>
    %cst_9 = arith.constant 2.000000e-01 : f32
    %12 = vector.broadcast %cst_9 : f32 to vector<128x4xf32>
    %13 = arith.mulf %12, %9 : vector<128x4xf32>
    %14 = arith.select %11, %9, %13 : vector<128x4xi1>, vector<128x4xf32>
    %15 = vector.shape_cast %6 : vector<16x128xf32> to vector<16x128x1xf32>
    %cst_10 = arith.constant 0.000000e+00 : f32
    %16 = vector.broadcast %cst_10 : f32 to vector<16x128x1xf32>
    %17 = arith.cmpf ogt, %15, %16 : vector<16x128x1xf32>
    %18 = vector.shape_cast %14 : vector<128x4xf32> to vector<1x128x4xf32>
    %cst_11 = arith.constant -1.000000e+30 : f32
    %19 = vector.shape_cast %17 : vector<16x128x1xi1> to vector<16x128x1xi1>
    %20 = vector.broadcast %19 : vector<16x128x1xi1> to vector<16x128x4xi1>
    %21 = vector.shape_cast %18 : vector<1x128x4xf32> to vector<1x128x4xf32>
    %22 = vector.broadcast %21 : vector<1x128x4xf32> to vector<16x128x4xf32>
    %23 = vector.broadcast %cst_11 : f32 to vector<16x128x4xf32>
    %24 = arith.select %20, %22, %23 : vector<16x128x4xi1>, vector<16x128x4xf32>
    %cst_12 = arith.constant dense<0xFF800000> : vector<16x4xf32>
    %25 = vector.multi_reduction <maximumf>, %24, %cst_12 [1] : vector<16x128x4xf32> to vector<16x4xf32>
    %c0_13 = arith.constant 0 : index
    %c0_14 = arith.constant 0 : index
    %26 = vector.load %arg5[%c0_13, %c0_14] : memref<16x4xf32, #tpu.memory_space<vmem>>, vector<16x4xf32>
    %27 = arith.maximumf %26, %25 : vector<16x4xf32>
    %cst_15 = arith.constant dense<0.000000e+00> : vector<128x4xf32>
    %28 = tpu.matmul %8, %27, %cst_15 {dimension_numbers = #tpu.dot_dimension_numbers<[1], [0], [0], [1], [0, 0, 1, 1], [], []>} : vector<128x16xf32>, vector<16x4xf32>, vector<128x4xf32> -> vector<128x4xf32>
    %29 = arith.subf %14, %28 : vector<128x4xf32>
    %30 = math.exp %29 : vector<128x4xf32>
    %cst_16 = arith.constant dense<0.000000e+00> : vector<16x4xf32>
    %31 = tpu.matmul %6, %30, %cst_16 {dimension_numbers = #tpu.dot_dimension_numbers<[1], [0], [0], [1], [0, 0, 1, 1], [], []>} : vector<16x128xf32>, vector<128x4xf32>, vector<16x4xf32> -> vector<16x4xf32>
    %c0_17 = arith.constant 0 : index
    %c0_18 = arith.constant 0 : index
    %32 = vector.load %arg6[%c0_17, %c0_18] : memref<16x4xf32, #tpu.memory_space<vmem>>, vector<16x4xf32>
    %33 = arith.subf %26, %27 : vector<16x4xf32>
    %34 = math.exp %33 : vector<16x4xf32>
    %35 = arith.mulf %32, %34 : vector<16x4xf32>
    %36 = arith.addf %35, %31 : vector<16x4xf32>
    %c0_19 = arith.constant 0 : index
    %c0_20 = arith.constant 0 : index
    %37 = vector.load %arg6[%c0_19, %c0_20] : memref<16x4xf32, #tpu.memory_space<vmem>>, vector<16x4xf32>
    tpu.vector_store %arg6[%c0_19, %c0_20], %36 {strides = array<i32>} : memref<16x4xf32, #tpu.memory_space<vmem>>, vector<16x4xf32>,
    %c0_21 = arith.constant 0 : index
    %c0_22 = arith.constant 0 : index
    %38 = vector.load %arg5[%c0_21, %c0_22] : memref<16x4xf32, #tpu.memory_space<vmem>>, vector<16x4xf32>
    tpu.vector_store %arg5[%c0_21, %c0_22], %27 {strides = array<i32>} : memref<16x4xf32, #tpu.memory_space<vmem>>, vector<16x4xf32>,
    return
  }
  func.func @transform_0(%arg0: i32) -> (i32, i32) {
    %c0_i32 = arith.constant 0 : i32
    %c0_i32_0 = arith.constant 0 : i32
    return %arg0, %c0_i32 : i32, i32
  }
  func.func @transform_1(%arg0: i32) -> (i32, i32) {
    %c0_i32 = arith.constant 0 : i32
    %c0_i32_0 = arith.constant 0 : i32
    %c0_i32_1 = arith.constant 0 : i32
    return %c0_i32, %c0_i32_0 : i32, i32
  }
  func.func @transform_2(%arg0: i32) -> (i32, i32) {
    %c0_i32 = arith.constant 0 : i32
    %c0_i32_0 = arith.constant 0 : i32
    return %c0_i32, %arg0 : i32, i32
  }
  func.func @transform_3(%arg0: i32) -> (i32, i32) {
    %c0_i32 = arith.constant 0 : i32
    %c0_i32_0 = arith.constant 0 : i32
    return %arg0, %c0_i32 : i32, i32
  }
  func.func @transform_4(%arg0: i32) -> (i32, i32) {
    %c0_i32 = arith.constant 0 : i32
    %c0_i32_0 = arith.constant 0 : i32
    %c0_i32_1 = arith.constant 0 : i32
    return %c0_i32, %c0_i32_0 : i32, i32
  }
  func.func @transform_5(%arg0: i32) -> (i32, i32) {
    %c0_i32 = arith.constant 0 : i32
    %c0_i32_0 = arith.constant 0 : i32
    %c0_i32_1 = arith.constant 0 : i32
    return %c0_i32, %c0_i32_0 : i32, i32
  }
}

</mosaic_0001>

<bundles_post_ra>
// kernel: tpu_custom_call.1
= control target key start
LH: loop header
LB: loop body
LE: loop exit
PB: predicated region body
PF: predicated region fallthrough
CT: control target
= control target key end

     0   :  { %11 = vsyncpa [#allocation3], 0  ;;  %s6831_s0 = inlined_call_operand.vmem [shape: f32[256,128], index: 0, kind: input, shape index: {}]   ;;  %s6832_s1 = inlined_call_operand.vmem [shape: f32[128,4], index: 1, kind: input, shape index: {}]   ;;  %s6833_s2 = inlined_call_operand.hbm [shape: bf16[16,256], index: 2, kind: input, shape index: {}]   ;;  %s6834_s3 = inlined_call_operand.vmem [shape: bf16[256,16], index: 3, kind: input, shape index: {}]   ;;  %s6835_s4 = inlined_call_operand.vmem [shape: f32[16,4], index: 4, kind: output, shape index: {0}]   ;;  %s6836_s5 = inlined_call_operand.vmem [shape: f32[16,4], index: 5, kind: output, shape index: {1}]  }
   0x1   :  { %13 = vsyncpa [#allocation3 + $0x1], 0  ;;  %s4185_s18 = smov 0   ;;  %s4187_s19 = smov 0  }
   0x2   :  { %s4189_s20 = smov 0   ;;  %s4191_s21 = smov 0  }
   0x3 LB: > { %s4204_s22 = sadd.s32 4294967295, %s4147_s21   ;;  %s4207_s23 = sadd.s32 1, %s4147_s21   ;;  %s4147_s21 = sphi %s4191_s21, %s7309_s21   ;;  %s4143_s20 = sphi %s4189_s20, %s7308_s20   ;;  %s4139_s19 = sphi %s4187_s19, %s7307_s19   ;;  %s4135_s18 = sphi %s4185_s18, %s7306_s18  }
   0x4   : > { %s70_s24 = ssub.s32 %s4147_s21, %s4207_s23  ;;  %s73_s25 = sadd.s32 1, %s4143_s20 }
   0x5   : > { %p71_p0 = scmp.eq.s32.totalorder %s70_s24, 0  ;;  %p80_p1 = scmp.ne.s32.totalorder %s4143_s20, %s4139_s19 }
   0x6   : > { %p81_p2 = scmp.eq.s32.totalorder %s4147_s21, 0  ;;  %p86_p3 = scmp.ne.s32.totalorder %s4139_s19, %s4135_s18 }
   0x7   : > { %s4217_s26 = scalar_select %p71_p0, %s4143_s20, %s73_s25  }
   0x8   : > { %p82_p4 = por %p81_p2, %p80_p1  ;;  %p87_p5 = scmp.eq.s32.totalorder %s4204_s22, 0 }
   0x9   : > { %p4009_p6 = scmp.lt.s32.totalorder %s4147_s21, 2  ;;  %s190_s28 = sand.u32 1, %s4143_s20  }
   0xa   : > { %p4221_p7 = por %p87_p5, %p86_p3  ;;  %s3678_s29 = sshll.u32 %s190_s28, 3 }
   0xb   : > { %s3679_s30 = sshll.u32 %s4147_s21, 6  ;;  %s194_s9 = scalar_lea.vmem [#allocation2], %s3678_s29 }
   0xc   : > { %s4230_s8 = scalar_lea.hbm %s6833_s2, %s3679_s30  ;;  %s200_s10 = sshll.u32 %s194_s9, 4  ;;  %s4232_s10 = int_to_ptr.vmem [resolvable:$true] %s200_s10 }
   0xd   : > { %p4234_p8 = pnand %p4009_p6, %p82_p4  ;;  %s4238_s12 = scalar_lea.sflag [#allocation3], %s190_s28 }
   0xe   : > { %s4083_s13 = scalar_lea.hbm %s4230_s8, 128  ;;  %s4088_s16 = scalar_lea.hbm %s6833_s2, 256 }
   0xf   : > { %p4084_p9 = scmp.ne.s32.totalorder %s4230_s8, %s4083_s13  ;;  %p4085_p10 = pneg %p4234_p8 }
  0x10   : > { %p4089_p13 = scmp.lt.u32.totalorder %s4230_s8, %s6833_s2  ;;  %p4090_p0 = scmp.lt.u32.totalorder %s4088_s16, %s4083_s13 }
  0x11   : > { %p4086_p11 = pnand %p4085_p10, %p4084_p9  ;;  %p4092_p2 = scmp.lt.u32.totalorder %s4083_s13, %s4230_s8 }
  0x12   : > { %p4091_p1 = por %p4090_p0, %p4089_p13 }
  0x13   : > { %p4087_p12 = pneg %p4086_p11 }
  0x14   : > { %p4093_p3 = por %p4092_p2, %p4091_p1 }
  0x16   : > { %p4094_p4 = pnand %p4093_p3, %p4087_p12 }
  0x18   : > { %4097 = shalt.err (!%p4094_p4)
}
  0x19   : > { %s4098_s24 = scalar_lea.vmem %s4232_s10, 128  ;;  %s4149_s25 = smov [#allocation2]  }
  0x1a   : > { %p4099_p5 = scmp.ne.s32.totalorder %s4232_s10, %s4098_s24  ;;  %s4103_s28 = sshll.u32 %s4149_s25, 4  ;;  %s4104_s28 = int_to_ptr.vmem [resolvable:$false] %s4103_s28 }
  0x1b   : > { %s4105_s29 = scalar_lea.vmem %s4104_s28, 256  ;;  %p4106_p11 = scmp.lt.s32.totalorder %s4232_s10, %s4104_s28 }
  0x1c   : > { %p4101_p6 = pnand %p4099_p5, %p4085_p10  ;;  %p4107_p13 = scmp.lt.s32.totalorder %s4105_s29, %s4098_s24 }
  0x1e   : > { %p4102_p9 = pneg %p4101_p6  ;;  %p4108_p0 = por %p4107_p13, %p4106_p11 }
  0x20   : > { %p4109_p1 = pnand %p4108_p0, %p4102_p9 }
  0x22   : > { %4112 = shalt.err (!%p4109_p1)
}
  0x23   : > { %s4150_s30 = smov 128   ;;  %s4151_s6 = smov 64  }
  0x24   : > { %s4152_s7 = smov 4   ;;  %p3680_p10 = scmp.ge.s32.totalorder %s4147_s21, 1 }
  0x25   : > { %4008 = dma.hbm_to_vmem [thread:$0]  (!%p4234_p8), %s4230_s8, 128, %s4232_s10, %s4238_s12, %s4150_s30, %s4151_s6, %s4152_s7  }
  0x26   : > { %p217_p12 = scmp.lt.s32.totalorder %s4147_s21, 3 }
  0x28   : > { %p218_p2 = pnand %p3680_p10, %p217_p12 }
  0x2a   : > { %221 = sbr.rel (%p218_p2) target bundleno = 1214 (0x4be), region = 36 }
  0x31   : > { %s223_s9 = sand.u32 1, %s4139_s19  }
  0x32   : > { %s3681_s13 = sshll.u32 %s223_s9, 3  ;;  %s224_s14 = scalar_lea.sflag [#allocation3], %s223_s9 }
  0x33   : > { %s227_s15 = scalar_lea.vmem [#allocation2], %s3681_s13 }
  0x34   : > { %4130 = dma.done.wait (%p4221_p7), %s224_s14, 128  }
  0x35   : > { %4132 = vsyncadd (%p4221_p7), %s224_s14, 4294967168  ;;  %s3682_s16 = sshll.u32 %s4204_s22, 4  ;;  %p3686_p8 = scmp.ne.s32.totalorder %s4204_s22, 0 }
  0x36   : > { %p260_p3 = scmp.lt.s32.totalorder %s3682_s16, 31  ;;  %vm275_vm0 = vcmask (!%p3686_p8), 31744   ;;  %v4153_v0 = vmov (!%p3686_p8), -1e+30   ;;  %v4154_v1 = vmov (!%p3686_p8), 0.0  }
  0x37   : > { %274 = sbr.rel (%p3686_p8) target bundleno = 62 (0x3e), region = 44  ;;  %276 = vst.msk [vmem:[%s6835_s4] sm:$0xff] (!%p3686_p8), %vm275_vm0, %v4153_v0  ;;  %277 = vst.msk [vmem:[%s6835_s4 + $0x8] sm:$0xff] (!%p3686_p8), %vm275_vm0, %v4153_v0 }
  0x38   : > { %s7311_s16 = smov (!%p260_p3, %s3682_s16), 31  ;;  %278 = vst.msk [vmem:[%s6836_s5] sm:$0xff] (!%p3686_p8), %vm275_vm0, %v4154_v1  ;;  %279 = vst.msk [vmem:[%s6836_s5 + $0x8] sm:$0xff] (!%p3686_p8), %vm275_vm0, %v4154_v1 }
  0x39   : > { %s3683_s8 = sshll.u32 %s7311_s16, 3  ;;  %s3685_s10 = sshll.u32 %s7311_s16, 2 }
  0x3a   : > { %s4277_s12 = scalar_lea.vmem %s6831_s0, %s3683_s8  ;;  %s4282_s24 = scalar_lea.vmem %s6834_s3, %s3685_s10 }
  0x3e PF: > { %v296_v2 = vld [vmem:[%s6832_s1] sm:$0xff]  ;;  %v297_v3 = vld [vmem:[%s6832_s1 + $0x8] sm:$0xff]  ;;  %v298_v4 = vld [vmem:[%s6832_s1 + $0x10] sm:$0xff]  ;;  %v541_v5 = vlaneseq  ;;  %vm2637_vm5 = vcmask 31744  }
  0x3f   : > { %v3935_v6 = vpack.c.bf16 %v297_v3, %v296_v2  ;;  %v299_v7 = vld [vmem:[%s6832_s1 + $0x18] sm:$0xff]  ;;  %v3706_v8 = vld [vmem:[%s227_s15] sm:$0xff]   ;;  %v302_v20 = vld [vmem:[%s6832_s1 + $0x30] sm:$0xff] }
  0x40   : > { %v3939_v9 = vpack.c.bf16 %v299_v7, %v298_v4  ;;  %v4309_v10 = vunpack.c.l.bf16 %v3706_v8  ;;  %v4311_v11 = vshrl.u32 %v541_v5, 7  ;;  %v300_v12 = vld [vmem:[%s6832_s1 + $0x20] sm:$0xff]  ;;  %v301_v13 = vld [vmem:[%s6832_s1 + $0x28] sm:$0xff]  ;;  %v303_v21 = vld [vmem:[%s6832_s1 + $0x38] sm:$0xff]  ;;  %v4336_v22 = vunpack.c.h.bf16 %v3706_v8 }
  0x41   : > { %3936 = vmatprep.subr.bf16.mxu0 %v3935_v6  ;;  %v280_v16 = vld [vmem:[%s4277_s12] sm:$0xff]  ;;  %v3943_v19 = vpack.c.bf16 %v301_v13, %v300_v12  ;;  %v3947_v23 = vpack.c.bf16 %v303_v21, %v302_v20  ;;  %v305_v25 = vld [vmem:[%s6832_s1 + $0x48] sm:$0xff]  ;;  %v306_v28 = vld [vmem:[%s6832_s1 + $0x50] sm:$0xff] }
  0x42   : > { %6937 = vst [vmem:[#allocation5_spill] sm:$0xff] %v4309_v10  ;;  %3938 = vmatpush3.bf16.msra.mxu0 %v3935_v6  ;;  %v610_v14 = vsub.s32 1, %v4311_v11  ;;  %v543_v15 = vsub.s32 0, %v4311_v11  ;;  %3848 = vmatprep.mubr.f32.mxu0 %v280_v16  ;;  %6939 = vst [vmem:[#allocation7_spill] sm:$0xff] %v4336_v22  ;;  %v304_v24 = vld [vmem:[%s6832_s1 + $0x40] sm:$0xff]  ;;  %v307_v29 = vld [vmem:[%s6832_s1 + $0x58] sm:$0xff] }
  0x43   : > { %3940 = vmatprep.subr.bf16.mxu0 %v3939_v9  ;;  %v3951_v27 = vpack.c.bf16 %v305_v25, %v304_v24  ;;  %v677_v31 = vsub.s32 2, %v4311_v11  ;;  %v3955_v32 = vpack.c.bf16 %v307_v29, %v306_v28  ;;  %v308_v33 = vld [vmem:[%s6832_s1 + $0x60] sm:$0xff]  ;;  %v309_v34 = vld [vmem:[%s6832_s1 + $0x68] sm:$0xff]  ;;  %v310_v37 = vld [vmem:[%s6832_s1 + $0x70] sm:$0xff]  ;;  %v744_v41 = vsub.s32 3, %v4311_v11 }
  0x44   : > { %v4323_v17 = vrot.slane %v4309_v10, %v610_v14  ;;  %v4326_v18 = vrot.slane %v4309_v10, %v543_v15  ;;  %v4347_v26 = vrot.slane %v4336_v22, %v543_v15  ;;  %v4358_v30 = vrot.slane %v4336_v22, %v610_v14  ;;  %v311_v38 = vld [vmem:[%s6832_s1 + $0x78] sm:$0xff]  ;;  %v281_v43 = vld [vmem:[%s4277_s12 + $0x8] sm:$0xff]  ;;  %v282_v44 = vld [vmem:[%s4277_s12 + $0x10] sm:$0xff] }
  0x45   : > { %v4370_v35 = vrot.slane %v4309_v10, %v677_v31  ;;  %v3959_v36 = vpack.c.bf16 %v309_v34, %v308_v33  ;;  %v4381_v39 = vrot.slane %v4336_v22, %v677_v31  ;;  %v3963_v40 = vpack.c.bf16 %v311_v38, %v310_v37  ;;  %v283_v45 = vld [vmem:[%s4277_s12 + $0x18] sm:$0xff]  ;;  %v284_v46 = vld [vmem:[%s4277_s12 + $0x20] sm:$0xff]  ;;  %v285_v49 = vld [vmem:[%s4277_s12 + $0x28] sm:$0xff] }
  0x46   : > { %6938 = vst [vmem:[#allocation6_spill] sm:$0xff] %v4326_v18  ;;  %613 = vbcast.lane.b32.xlu1 %v4323_v17, 256  ;;  %546 = vbcast.lane.b32.xlu0 %v4326_v18, 256  ;;  %v4389_v42 = vrot.slane %v4309_v10, %v744_v41  ;;  %v4399_v47 = vrot.slane %v4336_v22, %v744_v41  ;;  %v811_v48 = vsub.s32 4, %v4311_v11  ;;  %v286_v50 = vld [vmem:[%s4277_s12 + $0x30] sm:$0xff]  ;;  %v287_v52 = vld [vmem:[%s4277_s12 + $0x38] sm:$0xff] }
  0x47   : > { %3942 = vmatpush3.bf16.msra.mxu0 %v3939_v9  ;;  %6940 = vst [vmem:[#allocation8_spill] sm:$0xff] %v4370_v35  ;;  %6941 = vst [vmem:[#allocation9_spill] sm:$0xff] %v4381_v39  ;;  %v288_v53 = vld [vmem:[%s4277_s12 + $0x40] sm:$0xff]  ;;  %v289_v54 = vld [vmem:[%s4277_s12 + $0x48] sm:$0xff]  ;;  %v878_v56 = vsub.s32 5, %v4311_v11  ;;  %v945_v61 = vsub.s32 6, %v4311_v11 }
  0x48   : > { %3944 = vmatprep.subr.bf16.mxu0 %v3943_v19  ;;  %6942 = vst [vmem:[#allocation10_spill] sm:$0xff] %v4399_v47  ;;  %v4407_v51 = vrot.slane %v4309_v10, %v811_v48  ;;  %v4417_v55 = vrot.slane %v4336_v22, %v811_v48  ;;  %v290_v58 = vld [vmem:[%s4277_s12 + $0x50] sm:$0xff]  ;;  %v291_v59 = vld [vmem:[%s4277_s12 + $0x58] sm:$0xff]  ;;  %v1012_v0 = vsub.s32 7, %v4311_v11  ;;  %v292_v7 = vld [vmem:[%s4277_s12 + $0x60] sm:$0xff] }
  0x49   : > { %v4425_v57 = vrot.slane %v4309_v10, %v878_v56  ;;  %v4436_v60 = vrot.slane %v4336_v22, %v878_v56  ;;  %v4444_v62 = vrot.slane %v4309_v10, %v945_v61  ;;  %v4451_v63 = vrot.slane %v4336_v22, %v945_v61  ;;  %v293_v11 = vld [vmem:[%s4277_s12 + $0x68] sm:$0xff] }
  0x4a   : > { %617 = vbcast.lane.b32.xlu1 %v4323_v17, 264  ;;  %550 = vbcast.lane.b32.xlu0 %v4326_v18, 264  ;;  %6943 = vst [vmem:[#allocation11_spill] sm:$0xff] %v4417_v55  ;;  %v4461_v1 = vrot.slane %v4309_v10, %v1012_v0  ;;  %v4470_v2 = vrot.slane %v4336_v22, %v1012_v0  ;;  %v295_v22 = vld [vmem:[%s4277_s12 + $0x78] sm:$0xff] }
  0x4b   : > { %3946 = vmatpush3.bf16.msra.mxu0 %v3943_v19  ;;  %6944 = vst [vmem:[#allocation12_spill] sm:$0xff] %v4425_v57  ;;  %6945 = vst [vmem:[#allocation13_spill] sm:$0xff] %v4444_v62 }
  0x4c   : > { %3948 = vmatprep.subr.bf16.mxu0 %v3947_v23  ;;  %6946 = vst [vmem:[#allocation14_spill] sm:$0xff] %v4451_v63 }
  0x4e   : > { %1086 = vbcast.lane.b32.xlu1 %v4347_v26, 264  ;;  %1082 = vbcast.lane.b32.xlu0 %v4347_v26, 256 }
  0x4f   : > { %3950 = vmatpush3.bf16.msra.mxu0 %v3947_v23 }
  0x50   : > { %3952 = vmatprep.subr.bf16.mxu0 %v3951_v27 }
  0x52   : > { %1153 = vbcast.lane.b32.xlu1 %v4358_v30, 264  ;;  %1149 = vbcast.lane.b32.xlu0 %v4358_v30, 256 }
  0x53   : > { %3954 = vmatpush3.bf16.msra.mxu0 %v3951_v27 }
  0x54   : > { %3956 = vmatprep.subr.bf16.mxu0 %v3955_v32 }
  0x56   : > { %684 = vbcast.lane.b32.xlu1 %v4370_v35, 264  ;;  %680 = vbcast.lane.b32.xlu0 %v4370_v35, 256 }
  0x57   : > { %3958 = vmatpush3.bf16.msra.mxu0 %v3955_v32 }
  0x58   : > { %3960 = vmatprep.subr.bf16.mxu0 %v3959_v36 }
  0x5a   : > { %1220 = vbcast.lane.b32.xlu1 %v4381_v39, 264  ;;  %1216 = vbcast.lane.b32.xlu0 %v4381_v39, 256 }
  0x5b   : > { %3962 = vmatpush3.bf16.msra.mxu0 %v3959_v36 }
  0x5c   : > { %3964 = vmatprep.subr.bf16.mxu0 %v3963_v40 }
  0x5e   : > { %621 = vbcast.lane.b32.xlu1 %v4323_v17, 272  ;;  %554 = vbcast.lane.b32.xlu0 %v4326_v18, 272 }
  0x5f   : > { %3966 = vmatpush3.bf16.msra.mxu0 %v3963_v40 }
  0x62   : > { %3849 = vmatmul.mubr.f32.vlgmr.msra.gmra.mrb[0].mxu0 %v281_v43  ;;  %751 = vbcast.lane.b32.xlu1 %v4389_v42, 264 }
  0x63   : > { %747 = vbcast.lane.b32.xlu0 %v4389_v42, 256  ;;  %3851 = vmatprep.mubr.f32.mxu0 %v282_v44 }
  0x66   : > { %3852 = vmatmul.mubr.f32.gmra.mrb[2].mxu0 %v283_v45  ;;  %1157 = vbcast.lane.b32.xlu1 %v4358_v30, 272 }
  0x67   : > { %1090 = vbcast.lane.b32.xlu0 %v4347_v26, 272  ;;  %3854 = vmatprep.mubr.f32.mxu0 %v284_v46 }
  0x6a   : > { %3855 = vmatmul.mubr.f32.gmra.mrb[4].mxu0 %v285_v49  ;;  %1287 = vbcast.lane.b32.xlu1 %v4399_v47, 264 }
  0x6b   : > { %1283 = vbcast.lane.b32.xlu0 %v4399_v47, 256  ;;  %3857 = vmatprep.mubr.f32.mxu0 %v286_v50 }
  0x6e   : > { %814 = vbcast.lane.b32.xlu1 %v4407_v51, 256  ;;  %3858 = vmatmul.mubr.f32.gmra.mrb[6].mxu0 %v287_v52 }
  0x6f   : > { %688 = vbcast.lane.b32.xlu0 %v4370_v35, 272  ;;  %3860 = vmatprep.mubr.f32.mxu0 %v288_v53 }
  0x72   : > { %1224 = vbcast.lane.b32.xlu1 %v4381_v39, 272  ;;  %3861 = vmatmul.mubr.f32.gmra.mrb[8].mxu0 %v289_v54 }
  0x73   : > { %818 = vbcast.lane.b32.xlu0 %v4407_v51, 264  ;;  %3863 = vmatprep.mubr.f32.mxu0 %v290_v58 }
  0x76   : > { %1354 = vbcast.lane.b32.xlu1 %v4417_v55, 264  ;;  %3864 = vmatmul.mubr.f32.gmra.mrb[10].mxu0 %v291_v59 }
  0x77   : > { %1350 = vbcast.lane.b32.xlu0 %v4417_v55, 256  ;;  %3866 = vmatprep.mubr.f32.mxu0 %v292_v7 }
  0x7a   : > { %625 = vbcast.lane.b32.xlu1 %v4323_v17, 280  ;;  %3867 = vmatmul.mubr.f32.gmra.mrb[12].mxu0 %v293_v11  ;;  %v294_v11 = vld [vmem:[%s4277_s12 + $0x70] sm:$0xff] }
  0x7b   : > { %558 = vbcast.lane.b32.xlu0 %v4326_v18, 280  ;;  %3869 = vmatprep.mubr.f32.mxu0 %v294_v11 }
  0x7e   : > { %881 = vbcast.lane.b32.xlu1 %v4425_v57, 256  ;;  %3870 = vmatmul.mubr.f32.gmra.mrb[14].mxu0 %v295_v22 }
  0x7f   : > { %755 = vbcast.lane.b32.xlu0 %v4389_v42, 272 }
  0x82   : > { %1094 = vbcast.lane.b32.xlu1 %v4347_v26, 280 }
  0x83   : > { %885 = vbcast.lane.b32.xlu0 %v4425_v57, 264 }
  0x86   : > { %1291 = vbcast.lane.b32.xlu1 %v4399_v47, 272 }
  0x87   : > { %1161 = vbcast.lane.b32.xlu0 %v4358_v30, 280 }
  0x8a   : > { %1421 = vbcast.lane.b32.xlu1 %v4436_v60, 264 }
  0x8b   : > { %1417 = vbcast.lane.b32.xlu0 %v4436_v60, 256 }
  0x8e   : > { %822 = vbcast.lane.b32.xlu1 %v4407_v51, 272 }
  0x8f   : > { %692 = vbcast.lane.b32.xlu0 %v4370_v35, 280 }
  0x92   : > { %952 = vbcast.lane.b32.xlu1 %v4444_v62, 264 }
  0x93   : > { %948 = vbcast.lane.b32.xlu0 %v4444_v62, 256 }
  0x96   : > { %1358 = vbcast.lane.b32.xlu1 %v4417_v55, 272 }
  0x97   : > { %1228 = vbcast.lane.b32.xlu0 %v4381_v39, 280 }
  0x9a   : > { %1488 = vbcast.lane.b32.xlu1 %v4451_v63, 264 }
  0x9b   : > { %1484 = vbcast.lane.b32.xlu0 %v4451_v63, 256 }
  0x9e   : > { %629 = vbcast.lane.b32.xlu1 %v4323_v17, 288 }
  0x9f   : > { %562 = vbcast.lane.b32.xlu0 %v4326_v18, 288 }
  0xa2   : > { %889 = vbcast.lane.b32.xlu1 %v4425_v57, 272 }
  0xa3   : > { %759 = vbcast.lane.b32.xlu0 %v4389_v42, 280 }
  0xa6   : > { %1019 = vbcast.lane.b32.xlu1 %v4461_v1, 264 }
  0xa7   : > { %1015 = vbcast.lane.b32.xlu0 %v4461_v1, 256 }
  0xaa   : > { %1165 = vbcast.lane.b32.xlu1 %v4358_v30, 288 }
  0xab   : > { %1098 = vbcast.lane.b32.xlu0 %v4347_v26, 288 }
  0xae   : > { %1425 = vbcast.lane.b32.xlu1 %v4436_v60, 272 }
  0xaf   : > { %1295 = vbcast.lane.b32.xlu0 %v4399_v47, 280 }
  0xb2   : > { %1555 = vbcast.lane.b32.xlu1 %v4470_v2, 264 }
  0xb3   : > { %1551 = vbcast.lane.b32.xlu0 %v4470_v2, 256 }
  0xb6   : > { %826 = vbcast.lane.b32.xlu1 %v4407_v51, 280 }
  0xb7   : > { %696 = vbcast.lane.b32.xlu0 %v4370_v35, 288 }
  0xb8   : > { %v4477_v3 = vpop.permute.xlu1 %613  ;;  %v4479_v4 = vpop.permute.xlu0 %546 }
  0xb9   : > { %6947 = vst [vmem:[#allocation15_spill] sm:$0xff] %v4477_v3  ;;  %6948 = vst [vmem:[#allocation16_spill] sm:$0xff] %v4479_v4 }
  0xba   : > { %1232 = vbcast.lane.b32.xlu1 %v4381_v39, 288 }
  0xbb   : > { %956 = vbcast.lane.b32.xlu0 %v4444_v62, 272 }
  0xbc   : > { %v4483_v5 = vpop.permute.xlu1 %617  ;;  %v4485_v6 = vpop.permute.xlu0 %550 }
  0xbd   : > { %6949 = vst [vmem:[#allocation17_spill] sm:$0xff] %v4483_v5  ;;  %6950 = vst [vmem:[#allocation18_spill] sm:$0xff] %v4485_v6 }
  0xbe   : > { %1492 = vbcast.lane.b32.xlu1 %v4451_v63, 272 }
  0xbf   : > { %1362 = vbcast.lane.b32.xlu0 %v4417_v55, 280 }
  0xc0   : > { %v4490_v8 = vpop.permute.xlu1 %1086  ;;  %v4492_v9 = vpop.permute.xlu0 %1082 }
  0xc1   : > { %6951 = vst [vmem:[#allocation19_spill] sm:$0xff] %v4490_v8  ;;  %6952 = vst [vmem:[#allocation20_spill] sm:$0xff] %v4492_v9 }
  0xc2   : > { %633 = vbcast.lane.b32.xlu1 %v4323_v17, 296 }
  0xc3   : > { %566 = vbcast.lane.b32.xlu0 %v4326_v18, 296 }
  0xc4   : > { %v4497_v12 = vpop.permute.xlu1 %1153  ;;  %v4499_v13 = vpop.permute.xlu0 %1149 }
  0xc5   : > { %vm1758_vm4 = vcmp.gt.f32.partialorder %v4497_v12, 0.0  ;;  %vm1757_vm6 = vcmp.gt.f32.partialorder %v4499_v13, 0.0 }
  0xc6   : > { %893 = vbcast.lane.b32.xlu1 %v4425_v57, 280 }
  0xc7   : > { %763 = vbcast.lane.b32.xlu0 %v4389_v42, 288 }
  0xc8   : > { %v4503_v14 = vpop.permute.xlu1 %684  ;;  %v4505_v15 = vpop.permute.xlu0 %680 }
  0xca   : > { %1102 = vbcast.lane.b32.xlu1 %v4347_v26, 296 }
  0xcb   : > { %1023 = vbcast.lane.b32.xlu0 %v4461_v1, 272 }
  0xcc   : > { %v4509_v16 = vpop.permute.xlu1 %1220  ;;  %v4511_v19 = vpop.permute.xlu0 %1216 }
  0xce   : > { %1299 = vbcast.lane.b32.xlu1 %v4399_v47, 288 }
  0xcf   : > { %1169 = vbcast.lane.b32.xlu0 %v4358_v30, 296 }
  0xd0   : > { %v4515_v20 = vpop.permute.xlu1 %621  ;;  %v4517_v21 = vpop.permute.xlu0 %554 }
  0xd1   : > { %6953 = vst [vmem:[#allocation21_spill] sm:$0xff] %v4515_v20  ;;  %6954 = vst [vmem:[#allocation22_spill] sm:$0xff] %v4517_v21 }
  0xd2   : > { %1559 = vbcast.lane.b32.xlu1 %v4470_v2, 272 }
  0xd3   : > { %1429 = vbcast.lane.b32.xlu0 %v4436_v60, 280 }
  0xd4   : > { %v4521_v23 = vpop.permute.xlu1 %751 }
  0xd5   : > { %6955 = vst [vmem:[#allocation23_spill] sm:$0xff] %v4521_v23  ;;  %v4523_v24 = vpop.permute.xlu0 %747 }
  0xd6   : > { %6956 = vst [vmem:[#allocation24_spill] sm:$0xff] %v4523_v24  ;;  %830 = vbcast.lane.b32.xlu1 %v4407_v51, 288 }
  0xd7   : > { %700 = vbcast.lane.b32.xlu0 %v4370_v35, 296 }
  0xd8   : > { %v4527_v25 = vpop.permute.xlu1 %1157 }
  0xd9   : > { %v4529_v27 = vpop.permute.xlu0 %1090  ;;  %vm1759_vm7 = vcmp.gt.f32.partialorder %v4527_v25, 0.0 }
  0xda   : > { %6957 = vst [vmem:[#allocation25_spill] sm:$0xff] %v4529_v27  ;;  %1236 = vbcast.lane.b32.xlu1 %v4381_v39, 296 }
  0xdb   : > { %960 = vbcast.lane.b32.xlu0 %v4444_v62, 280 }
  0xdc   : > { %v4533_v28 = vpop.permute.xlu1 %1287 }
  0xdd   : > { %v4535_v29 = vpop.permute.xlu0 %1283  ;;  %vm1790_vm8 = vcmp.gt.f32.partialorder %v4533_v28, 0.0 }
  0xde   : > { %1496 = vbcast.lane.b32.xlu1 %v4451_v63, 280  ;;  %vm1789_vm9 = vcmp.gt.f32.partialorder %v4535_v29, 0.0 }
  0xdf   : > { %1366 = vbcast.lane.b32.xlu0 %v4417_v55, 288 }
  0xe0   : > { %v4539_v31 = vpop.permute.xlu1 %814 }
  0xe1   : > { %v4541_v32 = vpop.permute.xlu0 %688 }
  0xe2   : > { %637 = vbcast.lane.b32.xlu1 %v4323_v17, 304 }
  0xe3   : > { %570 = vbcast.lane.b32.xlu0 %v4326_v18, 304 }
  0xe4   : > { %v4545_v33 = vpop.permute.xlu1 %1224 }
  0xe5   : > { %v4547_v34 = vpop.permute.xlu0 %818 }
  0xe6   : > { %897 = vbcast.lane.b32.xlu1 %v4425_v57, 288 }
  0xe7   : > { %767 = vbcast.lane.b32.xlu0 %v4389_v42, 296 }
  0xe8   : > { %v4551_v36 = vpop.permute.xlu1 %1354 }
  0xe9   : > { %6958 = vst [vmem:[#allocation26_spill] sm:$0xff] %v4551_v36  ;;  %v4553_v37 = vpop.permute.xlu0 %1350 }
  0xea   : > { %6959 = vst [vmem:[#allocation27_spill] sm:$0xff] %v4553_v37  ;;  %1106 = vbcast.lane.b32.xlu1 %v4347_v26, 304 }
  0xeb   : > { %1027 = vbcast.lane.b32.xlu0 %v4461_v1, 280 }
  0xec   : > { %v4557_v38 = vpop.permute.xlu1 %625 }
  0xed   : > { %6960 = vst [vmem:[#allocation28_spill] sm:$0xff] %v4557_v38  ;;  %v4559_v40 = vpop.permute.xlu0 %558 }
  0xee   : > { %6961 = vst [vmem:[#allocation29_spill] sm:$0xff] %v4559_v40  ;;  %1303 = vbcast.lane.b32.xlu1 %v4399_v47, 296 }
  0xef   : > { %1173 = vbcast.lane.b32.xlu0 %v4358_v30, 304 }
  0xf0   : > { %v4563_v41 = vpop.permute.xlu1 %881 }
  0xf1   : > { %6962 = vst [vmem:[#allocation30_spill] sm:$0xff] %v4563_v41  ;;  %v4565_v43 = vpop.permute.xlu0 %755 }
  0xf2   : > { %6963 = vst [vmem:[#allocation31_spill] sm:$0xff] %v4565_v43  ;;  %1563 = vbcast.lane.b32.xlu1 %v4470_v2, 280 }
  0xf3   : > { %1433 = vbcast.lane.b32.xlu0 %v4436_v60, 288 }
  0xf4   : > { %v4569_v44 = vpop.permute.xlu1 %1094 }
  0xf5   : > { %6964 = vst [vmem:[#allocation32_spill] sm:$0xff] %v4569_v44  ;;  %v4571_v45 = vpop.permute.xlu0 %885 }
  0xf6   : > { %6965 = vst [vmem:[#allocation33_spill] sm:$0xff] %v4571_v45  ;;  %834 = vbcast.lane.b32.xlu1 %v4407_v51, 296 }
  0xf7   : > { %704 = vbcast.lane.b32.xlu0 %v4370_v35, 304 }
  0xf8   : > { %v4575_v46 = vpop.permute.xlu1 %1291 }
  0xf9   : > { %v4577_v48 = vpop.permute.xlu0 %1161  ;;  %vm1791_vm10 = vcmp.gt.f32.partialorder %v4575_v46, 0.0 }
  0xfa   : > { %1240 = vbcast.lane.b32.xlu1 %v4381_v39, 304  ;;  %vm1760_vm13 = vcmp.gt.f32.partialorder %v4577_v48, 0.0 }
  0xfb   : > { %964 = vbcast.lane.b32.xlu0 %v4444_v62, 288 }
  0xfc   : > { %v4581_v49 = vpop.permute.xlu1 %1421 }
  0xfd   : > { %v4583_v50 = vpop.permute.xlu0 %1417 }
  0xfe   : > { %1500 = vbcast.lane.b32.xlu1 %v4451_v63, 288 }
  0xff   : > { %1370 = vbcast.lane.b32.xlu0 %v4417_v55, 296 }
 0x100   : > { %v4587_v52 = vpop.permute.xlu1 %822 }
 0x101   : > { %v4589_v53 = vpop.permute.xlu0 %692 }
 0x102   : > { %641 = vbcast.lane.b32.xlu1 %v4323_v17, 312 }
 0x103   : > { %574 = vbcast.lane.b32.xlu0 %v4326_v18, 312 }
 0x104   : > { %v4593_v54 = vpop.permute.xlu1 %952 }
 0x105   : > { %6966 = vst [vmem:[#allocation34_spill] sm:$0xff] %v4593_v54  ;;  %v4595_v56 = vpop.permute.xlu0 %948 }
 0x106   : > { %6967 = vst [vmem:[#allocation35_spill] sm:$0xff] %v4595_v56  ;;  %901 = vbcast.lane.b32.xlu1 %v4425_v57, 296 }
 0x107   : > { %771 = vbcast.lane.b32.xlu0 %v4389_v42, 304 }
 0x108   : > { %v4599_v58 = vpop.permute.xlu1 %1358 }
 0x109   : > { %6968 = vst [vmem:[#allocation36_spill] sm:$0xff] %v4599_v58  ;;  %v4601_v59 = vpop.permute.xlu0 %1228 }
 0x10a   : > { %1110 = vbcast.lane.b32.xlu1 %v4347_v26, 312 }
 0x10b   : > { %1031 = vbcast.lane.b32.xlu0 %v4461_v1, 288 }
 0x10c   : > { %v4605_v61 = vpop.permute.xlu1 %1488 }
 0x10d   : > { %6969 = vst [vmem:[#allocation37_spill] sm:$0xff] %v4605_v61  ;;  %v4607_v0 = vpop.permute.xlu0 %1484 }
 0x10e   : > { %6970 = vst [vmem:[#allocation38_spill] sm:$0xff] %v4607_v0  ;;  %1307 = vbcast.lane.b32.xlu1 %v4399_v47, 304 }
 0x10f   : > { %1177 = vbcast.lane.b32.xlu0 %v4358_v30, 312 }
 0x110   : > { %v4611_v7 = vpop.permute.xlu1 %629 }
 0x111   : > { %6971 = vst [vmem:[#allocation39_spill] sm:$0xff] %v4611_v7  ;;  %v4615_v10 = vpop.permute.xlu0 %562 }
 0x112   : > { %6972 = vst [vmem:[#allocation40_spill] sm:$0xff] %v4615_v10  ;;  %1567 = vbcast.lane.b32.xlu1 %v4470_v2, 288 }
 0x113   : > { %1437 = vbcast.lane.b32.xlu0 %v4436_v60, 296 }
 0x114   : > { %v4619_v44 = vpop.permute.xlu1 %889 }
 0x115   : > { %6973 = vst [vmem:[#allocation41_spill] sm:$0xff] %v4619_v44  ;;  %v4621_v27 = vpop.permute.xlu0 %759 }
 0x116   : > { %6974 = vst [vmem:[#allocation42_spill] sm:$0xff] %v4621_v27  ;;  %838 = vbcast.lane.b32.xlu1 %v4407_v51, 304 }
 0x117   : > { %708 = vbcast.lane.b32.xlu0 %v4370_v35, 312 }
 0x118   : > { %v4625_v43 = vpop.permute.xlu1 %1019 }
 0x119   : > { %v4627_v9 = vpop.permute.xlu0 %1015  ;;  %vm1726_vm11 = vcmp.gt.f32.partialorder %v4625_v43, 0.0 }
 0x11a   : > { %1244 = vbcast.lane.b32.xlu1 %v4381_v39, 312  ;;  %vm1725_vm12 = vcmp.gt.f32.partialorder %v4627_v9, 0.0 }
 0x11b   : > { %968 = vbcast.lane.b32.xlu0 %v4444_v62, 296 }
 0x11c   : > { %v4631_v11 = vpop.permute.xlu1 %1165 }
 0x11d   : > { %v4633_v22 = vpop.permute.xlu0 %1098  ;;  %vm1761_vm14 = vcmp.gt.f32.partialorder %v4631_v11, 0.0 }
 0x11e   : > { %6975 = vst [vmem:[#allocation43_spill] sm:$0xff] %v4633_v22  ;;  %1504 = vbcast.lane.b32.xlu1 %v4451_v63, 296 }
 0x11f   : > { %1374 = vbcast.lane.b32.xlu0 %v4417_v55, 304 }
 0x120   : > { %v4637_v27 = vpop.permute.xlu1 %1425 }
 0x121   : > { %v4639_v8 = vpop.permute.xlu0 %1295 }
 0x122   : > { %645 = vbcast.lane.b32.xlu1 %v4323_v17, 320  ;;  %vm1792_vm15 = vcmp.gt.f32.partialorder %v4639_v8, 0.0 }
 0x123   : > { %578 = vbcast.lane.b32.xlu0 %v4326_v18, 320 }
 0x124   : > { %v4643_v44 = vpop.permute.xlu1 %1555 }
 0x125   : > { %v4645_v24 = vpop.permute.xlu0 %1551 }
 0x126   : > { %905 = vbcast.lane.b32.xlu1 %v4425_v57, 304 }
 0x127   : > { %775 = vbcast.lane.b32.xlu0 %v4389_v42, 312 }
 0x128   : > { %v4649_v22 = vpop.permute.xlu1 %826 }
 0x129   : > { %v4651_v23 = vpop.permute.xlu0 %696 }
 0x12a   : > { %1114 = vbcast.lane.b32.xlu1 %v4347_v26, 320 }
 0x12b   : > { %1035 = vbcast.lane.b32.xlu0 %v4461_v1, 296 }
 0x12c   : > { %v4655_v45 = vpop.permute.xlu1 %1232 }
 0x12d   : > { %6976 = vst [vmem:[#allocation44_spill] sm:$0xff] %v4655_v45  ;;  %v4657_v10 = vpop.permute.xlu0 %956 }
 0x12e   : > { %6977 = vst [vmem:[#allocation45_spill] sm:$0xff] %v4657_v10  ;;  %1311 = vbcast.lane.b32.xlu1 %v4399_v47, 312 }
 0x12f   : > { %1181 = vbcast.lane.b32.xlu0 %v4358_v30, 320 }
 0x130   : > { %v4661_v41 = vpop.permute.xlu1 %1492 }
 0x131   : > { %6978 = vst [vmem:[#allocation46_spill] sm:$0xff] %v4661_v41  ;;  %v4663_v40 = vpop.permute.xlu0 %1362 }
 0x132   : > { %6979 = vst [vmem:[#allocation47_spill] sm:$0xff] %v4663_v40  ;;  %1571 = vbcast.lane.b32.xlu1 %v4470_v2, 296 }
 0x133   : > { %1441 = vbcast.lane.b32.xlu0 %v4436_v60, 304 }
 0x134   : > { %v4667_v7 = vpop.permute.xlu1 %633 }
 0x135   : > { %6980 = vst [vmem:[#allocation48_spill] sm:$0xff] %v4667_v7  ;;  %v4669_v38 = vpop.permute.xlu0 %566  ;;  %v4671_v21 = vpop.f32.mrb[0].mxu0 }
 0x136   : > { %6981 = vst [vmem:[#allocation49_spill] sm:$0xff] %v4669_v38  ;;  %v4673_v6 = vpop.f32.mrb[1].mxu0  ;;  %842 = vbcast.lane.b32.xlu1 %v4407_v51, 312  ;;  %vm494_vm1 = vcmp.gt.f32.partialorder %v4671_v21, 0.0 }
 0x137   : > { %712 = vbcast.lane.b32.xlu0 %v4370_v35, 320  ;;  %vm493_vm2 = vcmp.gt.f32.partialorder %v4673_v6, 0.0 }
 0x138   : > { %v4677_v4 = vpop.permute.xlu1 %893 }
 0x139   : > { %6982 = vst [vmem:[#allocation50_spill] sm:$0xff] %v4677_v4  ;;  %v4679_v20 = vpop.permute.xlu0 %763  ;;  %v4681_v40 = vpop.f32.mrb[2].mxu0 }
 0x13a   : > { %6983 = vst [vmem:[#allocation51_spill] sm:$0xff] %v4679_v20  ;;  %v4683_v58 = vpop.f32.mrb[3].mxu0  ;;  %1248 = vbcast.lane.b32.xlu1 %v4381_v39, 320  ;;  %vm496_vm0 = vcmp.gt.f32.partialorder %v4681_v40, 0.0 }
 0x13b   : > { %972 = vbcast.lane.b32.xlu0 %v4444_v62, 304  ;;  %vm495_vm3 = vcmp.gt.f32.partialorder %v4683_v58, 0.0 }
 0x13c   : > { %v4687_v38 = vpop.permute.xlu1 %1102 }
 0x13d   : > { %6984 = vst [vmem:[#allocation52_spill] sm:$0xff] %v4687_v38  ;;  %v4689_v7 = vpop.permute.xlu0 %1023  ;;  %v4691_v5 = vpop.f32.mrb[4].mxu0 }
 0x13e   : > { %v4693_v3 = vpop.f32.mrb[5].mxu0  ;;  %1508 = vbcast.lane.b32.xlu1 %v4451_v63, 304 }
 0x13f   : > { %1378 = vbcast.lane.b32.xlu0 %v4417_v55, 312  ;;  %v513_v29 = vmul.f32 0.2, %v4693_v3 }
 0x140   : > { %v4697_v20 = vpop.permute.xlu1 %1299 }
 0x141   : > { %v4699_v4 = vpop.permute.xlu0 %1169  ;;  %v4701_v37 = vpop.f32.mrb[6].mxu0 }
 0x142   : > { %6985 = vst [vmem:[#allocation53_spill] sm:$0xff] %v4701_v37  ;;  %649 = vbcast.lane.b32.xlu1 %v4323_v17, 328  ;;  %v4704_v36 = vpop.f32.mrb[7].mxu0 }
 0x143   : > { %6986 = vst [vmem:[#allocation54_spill] sm:$0xff] %v4704_v36  ;;  %582 = vbcast.lane.b32.xlu0 %v4326_v18, 328 }
 0x144   : > { %v4706_v38 = vpop.permute.xlu1 %1559 }
 0x145   : > { %v4709_v41 = vpop.permute.xlu0 %1429  ;;  %v4712_v0 = vpop.f32.mrb[8].mxu0 }
 0x146   : > { %909 = vbcast.lane.b32.xlu1 %v4425_v57, 312  ;;  %6987 = vst [vmem:[#allocation55_spill] sm:$0xff] %v4712_v0  ;;  %v4716_v10 = vpop.f32.mrb[9].mxu0 }
 0x147   : > { %6988 = vst [vmem:[#allocation56_spill] sm:$0xff] %v4716_v10  ;;  %779 = vbcast.lane.b32.xlu0 %v4389_v42, 320 }
 0x148   : > { %v4714_v61 = vpop.permute.xlu1 %830 }
 0x149   : > { %v4719_v37 = vpop.permute.xlu0 %700  ;;  %v4744_v54 = vpop.f32.mrb[10].mxu0 }
 0x14a   : > { %6989 = vst [vmem:[#allocation57_spill] sm:$0xff] %v4719_v37  ;;  %1118 = vbcast.lane.b32.xlu1 %v4347_v26, 328  ;;  %6998 = vst [vmem:[#allocation66_spill] sm:$0xff] %v4744_v54 }
 0x14b   : > { %1039 = vbcast.lane.b32.xlu0 %v4461_v1, 304 }
 0x14c   : > { %v4722_v36 = vpop.permute.xlu1 %1236 }
 0x14d   : > { %6990 = vst [vmem:[#allocation58_spill] sm:$0xff] %v4722_v36  ;;  %v4724_v45 = vpop.permute.xlu0 %960 }
 0x14e   : > { %6991 = vst [vmem:[#allocation59_spill] sm:$0xff] %v4724_v45  ;;  %1315 = vbcast.lane.b32.xlu1 %v4399_v47, 320 }
 0x14f   : > { %1185 = vbcast.lane.b32.xlu0 %v4358_v30, 328 }
 0x150   : > { %v4728_v56 = vpop.permute.xlu1 %1496 }
 0x151   : > { %6992 = vst [vmem:[#allocation60_spill] sm:$0xff] %v4728_v56  ;;  %v4730_v0 = vpop.permute.xlu0 %1366  ;;  %v4746_v56 = vpop.f32.mrb[11].mxu0 }
 0x152   : > { %6993 = vst [vmem:[#allocation61_spill] sm:$0xff] %v4730_v0  ;;  %1575 = vbcast.lane.b32.xlu1 %v4470_v2, 304  ;;  %6999 = vst [vmem:[#allocation67_spill] sm:$0xff] %v4746_v56 }
 0x153   : > { %1445 = vbcast.lane.b32.xlu0 %v4436_v60, 312 }
 0x154   : > { %v4734_v10 = vpop.permute.xlu1 %637 }
 0x155   : > { %6994 = vst [vmem:[#allocation62_spill] sm:$0xff] %v4734_v10  ;;  %v4736_v37 = vpop.permute.xlu0 %570 }
 0x156   : > { %6995 = vst [vmem:[#allocation63_spill] sm:$0xff] %v4736_v37  ;;  %846 = vbcast.lane.b32.xlu1 %v4407_v51, 320 }
 0x157   : > { %716 = vbcast.lane.b32.xlu0 %v4370_v35, 328 }
 0x158   : > { %v4740_v45 = vpop.permute.xlu1 %897 }
 0x159   : > { %6996 = vst [vmem:[#allocation64_spill] sm:$0xff] %v4740_v45  ;;  %v4742_v36 = vpop.permute.xlu0 %767 }
 0x15a   : > { %6997 = vst [vmem:[#allocation65_spill] sm:$0xff] %v4742_v36  ;;  %1252 = vbcast.lane.b32.xlu1 %v4381_v39, 328 }
 0x15b   : > { %976 = vbcast.lane.b32.xlu0 %v4444_v62, 312 }
 0x15c   : > { %v4750_v0 = vpop.permute.xlu1 %1106 }
 0x15d   : > { %7000 = vst [vmem:[#allocation68_spill] sm:$0xff] %v4750_v0  ;;  %v4752_v10 = vpop.permute.xlu0 %1027 }
 0x15e   : > { %7001 = vst [vmem:[#allocation69_spill] sm:$0xff] %v4752_v10  ;;  %1512 = vbcast.lane.b32.xlu1 %v4451_v63, 312 }
 0x15f   : > { %1382 = vbcast.lane.b32.xlu0 %v4417_v55, 320 }
 0x160   : > { %v4756_v37 = vpop.permute.xlu1 %1303 }
 0x161   : > { %7002 = vst [vmem:[#allocation70_spill] sm:$0xff] %v4756_v37  ;;  %v4758_v45 = vpop.permute.xlu0 %1173 }
 0x162   : > { %7003 = vst [vmem:[#allocation71_spill] sm:$0xff] %v4758_v45  ;;  %653 = vbcast.lane.b32.xlu1 %v4323_v17, 336 }
 0x163   : > { %586 = vbcast.lane.b32.xlu0 %v4326_v18, 336 }
 0x164   : > { %v4762_v56 = vpop.permute.xlu1 %1563 }
 0x165   : > { %7004 = vst [vmem:[#allocation72_spill] sm:$0xff] %v4762_v56  ;;  %v4764_v54 = vpop.permute.xlu0 %1433 }
 0x166   : > { %7005 = vst [vmem:[#allocation73_spill] sm:$0xff] %v4764_v54  ;;  %913 = vbcast.lane.b32.xlu1 %v4425_v57, 320 }
 0x167   : > { %783 = vbcast.lane.b32.xlu0 %v4389_v42, 328 }
 0x168   : > { %v4767_v0 = vpop.permute.xlu1 %834 }
 0x169   : > { %7006 = vst [vmem:[#allocation74_spill] sm:$0xff] %v4767_v0  ;;  %v4770_v10 = vpop.permute.xlu0 %704 }
 0x16a   : > { %7007 = vst [vmem:[#allocation75_spill] sm:$0xff] %v4770_v10  ;;  %1122 = vbcast.lane.b32.xlu1 %v4347_v26, 336 }
 0x16b   : > { %1043 = vbcast.lane.b32.xlu0 %v4461_v1, 312 }
 0x16c   : > { %v4772_v36 = vpop.permute.xlu1 %1240 }
 0x16d   : > { %7008 = vst [vmem:[#allocation76_spill] sm:$0xff] %v4772_v36  ;;  %v4776_v45 = vpop.permute.xlu0 %964 }
 0x16e   : > { %7009 = vst [vmem:[#allocation77_spill] sm:$0xff] %v4776_v45  ;;  %1319 = vbcast.lane.b32.xlu1 %v4399_v47, 328 }
 0x16f   : > { %1189 = vbcast.lane.b32.xlu0 %v4358_v30, 336 }
 0x170   : > { %v4778_v37 = vpop.permute.xlu1 %1500 }
 0x171   : > { %7010 = vst [vmem:[#allocation78_spill] sm:$0xff] %v4778_v37  ;;  %v4782_v54 = vpop.permute.xlu0 %1370 }
 0x172   : > { %7011 = vst [vmem:[#allocation79_spill] sm:$0xff] %v4782_v54  ;;  %1579 = vbcast.lane.b32.xlu1 %v4470_v2, 312 }
 0x173   : > { %1449 = vbcast.lane.b32.xlu0 %v4436_v60, 320 }
 0x174   : > { %v4784_v0 = vpop.permute.xlu1 %641 }
 0x175   : > { %7012 = vst [vmem:[#allocation80_spill] sm:$0xff] %v4784_v0  ;;  %v4786_v56 = vpop.permute.xlu0 %574 }
 0x176   : > { %7013 = vst [vmem:[#allocation81_spill] sm:$0xff] %v4786_v56  ;;  %850 = vbcast.lane.b32.xlu1 %v4407_v51, 328 }
 0x177   : > { %720 = vbcast.lane.b32.xlu0 %v4370_v35, 336 }
 0x178   : > { %v4790_v36 = vpop.permute.xlu1 %901 }
 0x179   : > { %7014 = vst [vmem:[#allocation82_spill] sm:$0xff] %v4790_v36  ;;  %v4792_v10 = vpop.permute.xlu0 %771  ;;  %v510_v36 = vmul.f32 0.2, %v4671_v21 }
 0x17a   : > { %7015 = vst [vmem:[#allocation83_spill] sm:$0xff] %v4792_v10  ;;  %1256 = vbcast.lane.b32.xlu1 %v4381_v39, 336  ;;  %v509_v10 = vmul.f32 0.2, %v4673_v6 }
 0x17b   : > { %980 = vbcast.lane.b32.xlu0 %v4444_v62, 320 }
 0x17c   : > { %v4796_v37 = vpop.permute.xlu1 %1110  ;;  %v4823_v54 = vsel %vm493_vm2, %v4673_v6, %v509_v10  ;;  %v512_v6 = vmul.f32 0.2, %v4681_v40  ;;  %vm497_vm2 = vcmp.gt.f32.partialorder %v4693_v3, 0.0 }
 0x17d   : > { %7016 = vst [vmem:[#allocation84_spill] sm:$0xff] %v4796_v37  ;;  %v4798_v45 = vpop.permute.xlu0 %1031  ;;  %v511_v37 = vmul.f32 0.2, %v4683_v58  ;;  %7023 = vst [vmem:[#allocation91_spill] sm:$0xff] %v4823_v54  ;;  %v2525_v46 = vsel %vm1757_vm6, %v4823_v54, -1e+30  ;;  %v4889_v9 = vsel %vm497_vm2, %v4693_v3, %v513_v29 }
 0x17e   : > { %7017 = vst [vmem:[#allocation85_spill] sm:$0xff] %v4798_v45  ;;  %1516 = vbcast.lane.b32.xlu1 %v4451_v63, 320  ;;  %v2493_v12 = vsel %vm1725_vm12, %v4823_v54, -1e+30  ;;  %vm1821_vm6 = vcmp.gt.f32.partialorder %v4583_v50, 0.0  ;;  %7030 = vst [vmem:[#allocation98_spill] sm:$0xff] %v4889_v9 }
 0x17f   : > { %v4829_v63 = vsel %vm495_vm3, %v4683_v58, %v511_v37  ;;  %1386 = vbcast.lane.b32.xlu0 %v4417_v55, 328  ;;  %vm1727_vm3 = vcmp.gt.f32.partialorder %v4689_v7, 0.0  ;;  %vm1762_vm12 = vcmp.gt.f32.partialorder %v4699_v4, 0.0  ;;  %vm1645_vm2 = vcmp.gt.f32.partialorder %v4505_v15, 0.0 }
 0x180   : > { %v4802_v56 = vpop.permute.xlu1 %1307  ;;  %7024 = vst [vmem:[#allocation92_spill] sm:$0xff] %v4829_v63  ;;  %v2559_v37 = vsel %vm1791_vm10, %v4829_v63, -1e+30  ;;  %v2527_v43 = vsel %vm1759_vm7, %v4829_v63, -1e+30  ;;  %vm1793_vm7 = vcmp.gt.f32.partialorder %v4697_v20, 0.0 }
 0x181   : > { %7018 = vst [vmem:[#allocation86_spill] sm:$0xff] %v4802_v56  ;;  %v4804_v0 = vpop.permute.xlu0 %1177  ;;  %v2974_v3 = vsel %vm2637_vm5, %v2527_v43, -inf  ;;  %vm1679_vm10 = vcmp.gt.f32.partialorder %v4587_v52, 0.0  ;;  %v2561_v7 = vsel %vm1793_vm7, %v4889_v9, -1e+30  ;;  %vm1775_vm7 = vcmp.gt.f32.partialorder %v4545_v33, 0.0 }
 0x182   : > { %7019 = vst [vmem:[#allocation87_spill] sm:$0xff] %v4804_v0  ;;  %v4820_v0 = vsel %vm494_vm1, %v4671_v21, %v510_v36  ;;  %657 = vbcast.lane.b32.xlu1 %v4323_v17, 344  ;;  %v2557_v21 = vsel %vm1789_vm9, %v4823_v54, -1e+30  ;;  %vm1854_vm1 = vcmp.gt.f32.partialorder %v4643_v44, 0.0  ;;  %vm1677_vm9 = vcmp.gt.f32.partialorder %v4539_v31, 0.0 }
 0x183   : > { %7022 = vst [vmem:[#allocation90_spill] sm:$0xff] %v4820_v0  ;;  %v2558_v28 = vsel %vm1790_vm8, %v4820_v0, -1e+30  ;;  %v2526_v58 = vsel %vm1758_vm4, %v4820_v0, -1e+30  ;;  %590 = vbcast.lane.b32.xlu0 %v4326_v18, 344 }
 0x184   : > { %v4814_v45 = vpop.permute.xlu1 %1567  ;;  %vm1822_vm4 = vcmp.gt.f32.partialorder %v4581_v49, 0.0  ;;  %vm498_vm8 = vcmp.gt.f32.partialorder %v4691_v5, 0.0  ;;  %v3052_v44 = vsel %vm2637_vm5, %v2561_v7, -inf  ;;  %v2589_v7 = vsel %vm1821_vm6, %v4823_v54, -1e+30  ;;  %v7042_v52 = vld [vmem:[#allocation35_spill] sm:$0xff] }
 0x185   : > { %7020 = vst [vmem:[#allocation88_spill] sm:$0xff] %v4814_v45  ;;  %v4816_v56 = vpop.permute.xlu0 %1437  ;;  %v4868_v45 = vsel %vm496_vm0, %v4681_v40, %v512_v6  ;;  %v2972_v40 = vsel %vm2637_vm5, %v2526_v58, -inf  ;;  %v2897_v6 = vsel %vm2637_vm5, %v2493_v12, -inf  ;;  %vm1853_vm0 = vcmp.gt.f32.partialorder %v4645_v24, 0.0  ;;  %v7050_v33 = vld [vmem:[#allocation38_spill] sm:$0xff] }
 0x186   : > { %7021 = vst [vmem:[#allocation89_spill] sm:$0xff] %v4816_v56  ;;  %v3046_v56 = vsel %vm2637_vm5, %v2558_v28, -inf  ;;  %917 = vbcast.lane.b32.xlu1 %v4425_v57, 328  ;;  %7028 = vst [vmem:[#allocation96_spill] sm:$0xff] %v4868_v45  ;;  %v514_v28 = vmul.f32 0.2, %v4691_v5 }
 0x187   : > { %v3048_v57 = vsel %vm2637_vm5, %v2559_v37, -inf  ;;  %787 = vbcast.lane.b32.xlu0 %v4389_v42, 336  ;;  %v2528_v8 = vsel %vm1760_vm13, %v4868_v45, -1e+30  ;;  %vm1773_vm13 = vcmp.gt.f32.partialorder %v4511_v19, 0.0  ;;  %vm7037_vm6 = vcmp.gt.f32.partialorder %v4547_v34, 0.0 }
 0x188   : > { %v4837_v10 = vpop.permute.xlu1 %838  ;;  %v4917_v12 = vsel %vm498_vm8, %v4691_v5, %v514_v28  ;;  %vm1774_vm8 = vcmp.gt.f32.partialorder %v4509_v16, 0.0  ;;  %v2622_v24 = vsel %vm1854_vm1, %v4820_v0, -1e+30  ;;  %vm1824_vm1 = vcmp.gt.f32.partialorder %v4709_v41, 0.0  ;;  %v7046_v19 = vld [vmem:[#allocation45_spill] sm:$0xff] }
 0x189   : > { %7025 = vst [vmem:[#allocation93_spill] sm:$0xff] %v4837_v10  ;;  %v4843_v36 = vpop.permute.xlu0 %708  ;;  %v3045_v10 = vsel %vm2637_vm5, %v2557_v21, -inf  ;;  %7033 = vst [vmem:[#allocation101_spill] sm:$0xff] %v4917_v12  ;;  %v2530_v5 = vsel %vm1762_vm12, %v4917_v12, -1e+30  ;;  %vm1648_vm12 = vcmp.gt.f32.partialorder %v4589_v53, 0.0 }
 0x18a   : > { %7026 = vst [vmem:[#allocation94_spill] sm:$0xff] %v4843_v36  ;;  %v2494_v36 = vsel %vm1726_vm11, %v4820_v0, -1e+30  ;;  %v3047_v25 = vmax.f32 %v3045_v10, %v3046_v56  ;;  %vm1823_vm11 = vcmp.gt.f32.partialorder %v4637_v27, 0.0  ;;  %1126 = vbcast.lane.b32.xlu1 %v4347_v26, 344 }
 0x18b   : > { %v2898_v37 = vsel %vm2637_vm5, %v2494_v36, -inf  ;;  %v2495_v56 = vsel %vm1727_vm3, %v4829_v63, -1e+30  ;;  %v2560_v10 = vsel %vm1792_vm15, %v4868_v45, -1e+30  ;;  %vm1855_vm15 = vcmp.gt.f32.partialorder %v4706_v38, 0.0 }
 0x18c   : > { %v4865_v13 = vpop.permute.xlu1 %1244  ;;  %v3049_v36 = vmax.f32 %v3047_v25, %v3048_v57  ;;  %vm1647_vm3 = vcmp.gt.f32.partialorder %v4541_v32, 0.0  ;;  %v2529_v57 = vsel %vm1761_vm14, %v4889_v9, -1e+30  ;;  %1047 = vbcast.lane.b32.xlu0 %v4461_v1, 320  ;;  %v3050_v48 = vsel %vm2637_vm5, %v2560_v10, -inf }
 0x18d   : > { %7027 = vst [vmem:[#allocation95_spill] sm:$0xff] %v4865_v13  ;;  %v4877_v21 = vpop.permute.xlu0 %968  ;;  %v2971_v13 = vsel %vm2637_vm5, %v2525_v46, -inf  ;;  %vm1680_vm14 = vcmp.gt.f32.partialorder %v4649_v22, 0.0  ;;  %v2899_v4 = vmax.f32 %v2897_v6, %v2898_v37  ;;  %v2900_v43 = vsel %vm2637_vm5, %v2495_v56, -inf }
 0x18e   : > { %7029 = vst [vmem:[#allocation97_spill] sm:$0xff] %v4877_v21  ;;  %v2973_v46 = vmax.f32 %v2971_v13, %v2972_v40  ;;  %v2621_v13 = vsel %vm1853_vm0, %v4823_v54, -1e+30  ;;  %1323 = vbcast.lane.b32.xlu1 %v4399_v47, 336  ;;  %v3051_v28 = vmax.f32 %v3049_v36, %v3050_v48  ;;  %v2623_v40 = vsel %vm1855_vm15, %v4829_v63, -1e+30 }
 0x18f   : > { %v2978_v10 = vsel %vm2637_vm5, %v2529_v57, -inf  ;;  %v3193_v37 = vsel %vm2637_vm5, %v2621_v13, -inf  ;;  %v3194_v56 = vsel %vm2637_vm5, %v2622_v24, -inf  ;;  %v4963_v38 = vmax.f32 %v2899_v4, %v2900_v43  ;;  %v7093_v21 = vld [vmem:[#allocation33_spill] sm:$0xff] }
 0x190   : > { %v4901_v29 = vpop.permute.xlu1 %1504  ;;  %v2975_v20 = vmax.f32 %v2973_v46, %v2974_v3  ;;  %v2976_v3 = vsel %vm2637_vm5, %v2528_v8, -inf  ;;  %v4957_v46 = vsel %vm2637_vm5, %v2530_v5, -inf  ;;  %1193 = vbcast.lane.b32.xlu0 %v4358_v30, 344  ;;  %v3196_v36 = vsel %vm2637_vm5, %v2623_v40, -inf }
 0x191   : > { %7031 = vst [vmem:[#allocation99_spill] sm:$0xff] %v4901_v29  ;;  %v4911_v58 = vpop.permute.xlu0 %1374  ;;  %v2590_v8 = vsel %vm1822_vm4, %v4820_v0, -1e+30  ;;  %v4976_v5 = vmax.f32 %v3051_v28, %v3052_v44  ;;  %v2445_v50 = vsel %vm1677_vm9, %v4823_v54, -1e+30  ;;  %vm1649_vm4 = vcmp.gt.f32.partialorder %v4651_v23, 0.0 }
 0x192   : > { %7032 = vst [vmem:[#allocation100_spill] sm:$0xff] %v4911_v58  ;;  %v2977_v6 = vmax.f32 %v2975_v20, %v2976_v3  ;;  %1583 = vbcast.lane.b32.xlu1 %v4470_v2, 320  ;;  %v2591_v20 = vsel %vm1823_vm11, %v4829_v63, -1e+30  ;;  %v2446_v49 = vsel %vm7037_vm6, %v4820_v0, -1e+30  ;;  %v3195_v13 = vmax.f32 %v3193_v37, %v3194_v56 }
 0x193   : > { %v2592_v24 = vsel %vm1824_vm1, %v4868_v45, -1e+30  ;;  %v2413_v27 = vsel %vm1645_vm2, %v4823_v54, -1e+30  ;;  %vm7039_vm9 = vcmp.gt.f32.partialorder %v4503_v14, 0.0  ;;  %vm1776_vm11 = vcmp.gt.f32.partialorder %v4601_v59, 0.0 }
 0x194   : > { %v4943_v11 = vpop.permute.xlu1 %645  ;;  %v2414_v31 = vsel %vm7039_vm9, %v4820_v0, -1e+30  ;;  %v5000_v34 = vmax.f32 %v2977_v6, %v2978_v10  ;;  %v3119_v4 = vsel %vm2637_vm5, %v2589_v7, -inf  ;;  %v3120_v43 = vsel %vm2637_vm5, %v2590_v8, -inf  ;;  %1453 = vbcast.lane.b32.xlu0 %v4436_v60, 328  ;;  %v7041_v44 = vld [vmem:[#allocation34_spill] sm:$0xff] }
 0x195   : > { %7034 = vst [vmem:[#allocation102_spill] sm:$0xff] %v4943_v11  ;;  %v4950_v25 = vpop.permute.xlu0 %578  ;;  %v2447_v41 = vsel %vm1679_vm10, %v4829_v63, -1e+30  ;;  %vm1681_vm0 = vcmp.gt.f32.partialorder %v4714_v61, 0.0  ;;  %v2786_v15 = vsel %vm2637_vm5, %v2445_v50, -inf  ;;  %v2787_v14 = vsel %vm2637_vm5, %v2446_v49, -inf }
 0x196   : > { %7035 = vst [vmem:[#allocation103_spill] sm:$0xff] %v4950_v25  ;;  %v2415_v28 = vsel %vm1647_vm3, %v4829_v63, -1e+30  ;;  %854 = vbcast.lane.b32.xlu1 %v4407_v51, 336  ;;  %vm1710_vm2 = vcmp.gt.f32.partialorder %v7041_v44, 0.0  ;;  %vm1709_vm10 = vcmp.gt.f32.partialorder %v7042_v52, 0.0  ;;  %v5030_v7 = vmax.f32 %v3195_v13, %v3196_v36 }
 0x197   : > { %v7043_v3 = vld [vmem:[#allocation44_spill] sm:$0xff]  ;;  %v2712_v10 = vsel %vm2637_vm5, %v2413_v27, -inf  ;;  %v2713_v6 = vsel %vm2637_vm5, %v2414_v31, -inf  ;;  %v2541_v37 = vsel %vm1773_vm13, %v4823_v54, -1e+30  ;;  %v3122_v8 = vsel %vm2637_vm5, %v2591_v20, -inf }
 0x198   : > { %v4973_v57 = vpop.permute.xlu1 %905  ;;  %vm1777_vm15 = vcmp.gt.f32.partialorder %v7043_v3, 0.0  ;;  %v2542_v32 = vsel %vm1774_vm8, %v4820_v0, -1e+30  ;;  %v2448_v50 = vsel %vm1680_vm14, %v4868_v45, -1e+30  ;;  %v2789_v49 = vsel %vm2637_vm5, %v2447_v41, -inf }
 0x199   : > { %7036 = vst [vmem:[#allocation104_spill] sm:$0xff] %v4973_v57  ;;  %v4987_v48 = vpop.permute.xlu0 %775  ;;  %v5037_v27 = vpop.f32.mrb[12].mxu0  ;;  %vm1711_vm3 = vcmp.gt.f32.partialorder %v7046_v19, 0.0  ;;  %v3121_v31 = vmax.f32 %v3119_v4, %v3120_v43  ;;  %v2715_v16 = vsel %vm2637_vm5, %v2415_v28, -inf  ;;  %v2543_v36 = vsel %vm1775_vm7, %v4829_v63, -1e+30 }
 0x19a   : > { %7038 = vst [vmem:[#allocation105_spill] sm:$0xff] %v4987_v48  ;;  %7045 = vst [vmem:[#allocation35_spill] sm:$0xff] %v5037_v27  ;;  %724 = vbcast.lane.b32.xlu0 %v4370_v35, 344  ;;  %v5045_v20 = vpop.f32.mrb[13].mxu0  ;;  %v2449_v22 = vsel %vm1681_vm0, %v4889_v9, -1e+30  ;;  %v2714_v13 = vmax.f32 %v2712_v10, %v2713_v6 }
 0x19b   : > { %7047 = vst [vmem:[#allocation44_spill] sm:$0xff] %v5045_v20  ;;  %v3008_v41 = vsel %vm2637_vm5, %v2541_v37, -inf  ;;  %v3009_v4 = vsel %vm2637_vm5, %v2542_v32, -inf  ;;  %1260 = vbcast.lane.b32.xlu1 %v4381_v39, 344  ;;  %vm1837_vm13 = vcmp.gt.f32.partialorder %v7050_v33, 0.0  ;;  %v5061_v61 = vsel %vm2637_vm5, %v2592_v24, -inf }
 0x19c   : > { %v5015_v40 = vpop.permute.xlu1 %1114  ;;  %v7053_v6 = vld [vmem:[#allocation57_spill] sm:$0xff]  ;;  %v5066_v32 = vmax.f32 %v3121_v31, %v3122_v8  ;;  %v2416_v27 = vsel %vm1648_vm12, %v4868_v45, -1e+30  ;;  %v2716_v20 = vmax.f32 %v2714_v13, %v2715_v16  ;;  %v7056_v28 = vld [vmem:[#allocation27_spill] sm:$0xff]  ;;  %v2791_v24 = vsel %vm2637_vm5, %v2448_v50, -inf  ;;  %v7057_v16 = vld [vmem:[#allocation58_spill] sm:$0xff] }
 0x19d   : > { %7040 = vst [vmem:[#allocation106_spill] sm:$0xff] %v5015_v40  ;;  %v5028_v56 = vpop.permute.xlu0 %1035  ;;  %v2788_v40 = vmax.f32 %v2786_v15, %v2787_v14  ;;  %v7049_v15 = vld [vmem:[#allocation37_spill] sm:$0xff]  ;;  %v7051_v14 = vld [vmem:[#allocation46_spill] sm:$0xff]  ;;  %vm1650_vm7 = vcmp.gt.f32.partialorder %v7053_v6, 0.0  ;;  %vm1805_vm6 = vcmp.gt.f32.partialorder %v7056_v28, 0.0  ;;  %vm1778_vm12 = vcmp.gt.f32.partialorder %v7057_v16, 0.0 }
 0x19e   : > { %7044 = vst [vmem:[#allocation34_spill] sm:$0xff] %v5028_v56  ;;  %vm1838_vm8 = vcmp.gt.f32.partialorder %v7049_v15, 0.0  ;;  %vm1839_vm14 = vcmp.gt.f32.partialorder %v7051_v14, 0.0  ;;  %7052 = vst [vmem:[#allocation37_spill] sm:$0xff] %v5061_v61  ;;  %v7055_v56 = vld [vmem:[#allocation26_spill] sm:$0xff]  ;;  %984 = vbcast.lane.b32.xlu0 %v4444_v62, 328 }
 0x19f   : > { %v2790_v10 = vmax.f32 %v2788_v40, %v2789_v49  ;;  %vm1806_vm1 = vcmp.gt.f32.partialorder %v7055_v56, 0.0  ;;  %v2793_v40 = vsel %vm2637_vm5, %v2449_v22, -inf  ;;  %v2417_v8 = vsel %vm1649_vm4, %v4889_v9, -1e+30  ;;  %v7060_v23 = vld [vmem:[#allocation15_spill] sm:$0xff]  ;;  %v7061_v13 = vld [vmem:[#allocation17_spill] sm:$0xff] }
 0x1a0   : > { %v5053_v43 = vpop.permute.xlu1 %1311  ;;  %v3010_v49 = vmax.f32 %v3008_v41, %v3009_v4  ;;  %v2418_v31 = vsel %vm1650_vm7, %v4917_v12, -1e+30  ;;  %v2544_v50 = vsel %vm1776_vm11, %v4868_v45, -1e+30  ;;  %vm1629_vm4 = vcmp.gt.f32.partialorder %v7060_v23, 0.0  ;;  %v7062_v41 = vld [vmem:[#allocation36_spill] sm:$0xff] }
 0x1a1   : > { %7048 = vst [vmem:[#allocation45_spill] sm:$0xff] %v5053_v43  ;;  %v5064_v37 = vpop.permute.xlu0 %1181  ;;  %v3011_v43 = vsel %vm2637_vm5, %v2543_v36, -inf  ;;  %v7058_v36 = vld [vmem:[#allocation14_spill] sm:$0xff]  ;;  %vm1630_vm9 = vcmp.gt.f32.partialorder %v7061_v13, 0.0  ;;  %vm1807_vm0 = vcmp.gt.f32.partialorder %v7062_v41, 0.0  ;;  %v2792_v4 = vmax.f32 %v2790_v10, %v2791_v24  ;;  %v7065_v24 = vld [vmem:[#allocation21_spill] sm:$0xff] }
 0x1a2   : > { %7054 = vst [vmem:[#allocation38_spill] sm:$0xff] %v5064_v37  ;;  %1520 = vbcast.lane.b32.xlu1 %v7058_v36, 328  ;;  %v2717_v6 = vsel %vm2637_vm5, %v2416_v27, -inf  ;;  %v3012_v53 = vmax.f32 %v3010_v49, %v3011_v43  ;;  %v7063_v37 = vld [vmem:[#allocation59_spill] sm:$0xff]  ;;  %v2545_v57 = vsel %vm1777_vm15, %v4889_v9, -1e+30 }
 0x1a3   : > { %vm1712_vm7 = vcmp.gt.f32.partialorder %v7063_v37, 0.0  ;;  %v2718_v59 = vmax.f32 %v2716_v20, %v2717_v6  ;;  %v2478_v10 = vsel %vm1710_vm2, %v4820_v0, -1e+30  ;;  %vm1631_vm11 = vcmp.gt.f32.partialorder %v7065_v24, 0.0  ;;  %1390 = vbcast.lane.b32.xlu0 %v4417_v55, 336  ;;  %v7067_v52 = vld [vmem:[#allocation47_spill] sm:$0xff] }
 0x1a4   : > { %v5088_v22 = vpop.permute.xlu1 %1571  ;;  %v2719_v27 = vsel %vm2637_vm5, %v2417_v8, -inf  ;;  %v5109_v43 = vsel %vm2637_vm5, %v2418_v31, -inf  ;;  %v2546_v3 = vsel %vm1778_vm12, %v4917_v12, -1e+30  ;;  %v3013_v20 = vsel %vm2637_vm5, %v2544_v50, -inf  ;;  %v7069_v49 = vld [vmem:[#allocation60_spill] sm:$0xff] }
 0x1a5   : > { %7059 = vst [vmem:[#allocation46_spill] sm:$0xff] %v5088_v22  ;;  %v5095_v48 = vpop.permute.xlu0 %1441  ;;  %v2477_v22 = vsel %vm1709_vm10, %v4823_v54, -1e+30  ;;  %7066 = vst [vmem:[#allocation26_spill] sm:$0xff] %v5109_v43  ;;  %vm1808_vm10 = vcmp.gt.f32.partialorder %v7067_v52, 0.0  ;;  %v5117_v37 = vmax.f32 %v2792_v4, %v2793_v40  ;;  %vm1840_vm2 = vcmp.gt.f32.partialorder %v7069_v49, 0.0 }
 0x1a6   : > { %7064 = vst [vmem:[#allocation57_spill] sm:$0xff] %v5095_v48  ;;  %v2479_v44 = vsel %vm1711_vm3, %v4829_v63, -1e+30  ;;  %v2480_v8 = vsel %vm1712_vm7, %v4868_v45, -1e+30  ;;  %661 = vbcast.lane.b32.xlu1 %v4323_v17, 352  ;;  %v3014_v16 = vmax.f32 %v3012_v53, %v3013_v20  ;;  %v5134_v25 = vmax.f32 %v2718_v59, %v2719_v27 }
 0x1a7   : > { %7068 = vst [vmem:[#allocation27_spill] sm:$0xff] %v5117_v37  ;;  %v3015_v50 = vsel %vm2637_vm5, %v2545_v57, -inf  ;;  %v2860_v6 = vsel %vm2637_vm5, %v2477_v22, -inf  ;;  %v2861_v40 = vsel %vm2637_vm5, %v2478_v10, -inf  ;;  %v7072_v48 = vld [vmem:[#allocation16_spill] sm:$0xff]  ;;  %v7073_v19 = vld [vmem:[#allocation18_spill] sm:$0xff] }
 0x1a8   : > { %v5125_v31 = vpop.permute.xlu1 %842  ;;  %vm1613_vm15 = vcmp.gt.f32.partialorder %v7072_v48, 0.0  ;;  %vm1614_vm3 = vcmp.gt.f32.partialorder %v7073_v19, 0.0  ;;  %7074 = vst [vmem:[#allocation17_spill] sm:$0xff] %v5134_v25  ;;  %v2605_v11 = vsel %vm1837_vm13, %v4823_v54, -1e+30  ;;  %v5146_v22 = vsel %vm2637_vm5, %v2546_v3, -inf }
 0x1a9   : > { %7070 = vst [vmem:[#allocation58_spill] sm:$0xff] %v5125_v31  ;;  %v5130_v4 = vpop.permute.xlu0 %712  ;;  %v2606_v57 = vsel %vm1838_vm8, %v4820_v0, -1e+30  ;;  %v2607_v53 = vsel %vm1839_vm14, %v4829_v63, -1e+30  ;;  %7075 = vst [vmem:[#allocation36_spill] sm:$0xff] %v5146_v22  ;;  %v2862_v3 = vmax.f32 %v2860_v6, %v2861_v40 }
 0x1aa   : > { %7071 = vst [vmem:[#allocation15_spill] sm:$0xff] %v5130_v4  ;;  %v2863_v10 = vsel %vm2637_vm5, %v2479_v44, -inf  ;;  %v5150_v59 = vsel %vm2637_vm5, %v2480_v8, -inf  ;;  %v2608_v33 = vsel %vm1840_vm2, %v4868_v45, -1e+30  ;;  %594 = vbcast.lane.b32.xlu0 %v4326_v18, 352  ;;  %v5169_v4 = vmax.f32 %v3014_v16, %v3015_v50 }
 0x1ab   : > { %7076 = vst [vmem:[#allocation59_spill] sm:$0xff] %v5150_v59  ;;  %v7077_v15 = vld [vmem:[#allocation22_spill] sm:$0xff]  ;;  %v7078_v27 = vld [vmem:[#allocation28_spill] sm:$0xff]  ;;  %v2573_v20 = vsel %vm1805_vm6, %v4823_v54, -1e+30  ;;  %v3156_v31 = vsel %vm2637_vm5, %v2605_v11, -inf  ;;  %v5177_v14 = vmax.f32 %v2862_v3, %v2863_v10 }
 0x1ac   : > { %vm1615_vm8 = vcmp.gt.f32.partialorder %v7077_v15, 0.0  ;;  %vm1632_vm13 = vcmp.gt.f32.partialorder %v7078_v27, 0.0  ;;  %v2574_v44 = vsel %vm1806_vm1, %v4820_v0, -1e+30  ;;  %v7079_v8 = vld [vmem:[#allocation12_spill] sm:$0xff]  ;;  %v5167_v49 = vpop.permute.xlu1 %1248  ;;  %7081 = vst [vmem:[#allocation47_spill] sm:$0xff] %v5169_v4 }
 0x1ad   : > { %921 = vbcast.lane.b32.xlu1 %v7079_v8, 336  ;;  %7080 = vst [vmem:[#allocation21_spill] sm:$0xff] %v5167_v49  ;;  %v3157_v58 = vsel %vm2637_vm5, %v2606_v57, -inf  ;;  %v3159_v6 = vsel %vm2637_vm5, %v2607_v53, -inf  ;;  %v5174_v40 = vpop.permute.xlu0 %972  ;;  %v7083_v28 = vld [vmem:[#allocation39_spill] sm:$0xff]  ;;  %7084 = vst [vmem:[#allocation16_spill] sm:$0xff] %v5177_v14 }
 0x1ae   : > { %7082 = vst [vmem:[#allocation60_spill] sm:$0xff] %v5174_v40  ;;  %vm1633_vm14 = vcmp.gt.f32.partialorder %v7083_v28, 0.0  ;;  %v2575_v56 = vsel %vm1807_vm0, %v4829_v63, -1e+30  ;;  %v2397_v16 = vsel %vm1629_vm4, %v4823_v54, -1e+30  ;;  %v3158_v40 = vmax.f32 %v3156_v31, %v3157_v58 }
 0x1af   : > { %v2398_v11 = vsel %vm1630_vm9, %v4820_v0, -1e+30  ;;  %v7085_v50 = vld [vmem:[#allocation48_spill] sm:$0xff]  ;;  %v5190_v57 = vsel %vm2637_vm5, %v2608_v33, -inf  ;;  %v7086_v53 = vld [vmem:[#allocation61_spill] sm:$0xff]  ;;  %v3082_v10 = vsel %vm2637_vm5, %v2573_v20, -inf }
 0x1b0   : > { %vm1634_vm1 = vcmp.gt.f32.partialorder %v7085_v50, 0.0  ;;  %vm1809_vm6 = vcmp.gt.f32.partialorder %v7086_v53, 0.0  ;;  %v3083_v41 = vsel %vm2637_vm5, %v2574_v44, -inf  ;;  %791 = vbcast.lane.b32.xlu0 %v4389_v42, 344  ;;  %v7087_v3 = vld [vmem:[#allocation29_spill] sm:$0xff]  ;;  %v5205_v20 = vpop.permute.xlu1 %1508  ;;  %v7089_v44 = vld [vmem:[#allocation30_spill] sm:$0xff] }
 0x1b1   : > { %vm1616_vm12 = vcmp.gt.f32.partialorder %v7087_v3, 0.0  ;;  %v2399_v33 = vsel %vm1631_vm11, %v4829_v63, -1e+30  ;;  %1130 = vbcast.lane.b32.xlu1 %v4347_v26, 352  ;;  %7088 = vst [vmem:[#allocation18_spill] sm:$0xff] %v5205_v20  ;;  %vm1693_vm4 = vcmp.gt.f32.partialorder %v7089_v44, 0.0  ;;  %v5216_v13 = vpop.permute.xlu0 %1378  ;;  %v3084_v20 = vmax.f32 %v3082_v10, %v3083_v41 }
 0x1b2   : > { %v7090_v49 = vld [vmem:[#allocation40_spill] sm:$0xff]  ;;  %v7091_v29 = vld [vmem:[#allocation49_spill] sm:$0xff]  ;;  %v2576_v23 = vsel %vm1808_vm10, %v4868_v45, -1e+30  ;;  %v3085_v58 = vsel %vm2637_vm5, %v2575_v56, -inf  ;;  %v2675_v31 = vsel %vm2637_vm5, %v2397_v16, -inf  ;;  %v5224_v56 = vmax.f32 %v3158_v40, %v3159_v6 }
 0x1b3   : > { %vm1617_vm9 = vcmp.gt.f32.partialorder %v7090_v49, 0.0  ;;  %vm1618_vm0 = vcmp.gt.f32.partialorder %v7091_v29, 0.0  ;;  %v2676_v24 = vsel %vm2637_vm5, %v2398_v11, -inf  ;;  %7092 = vst [vmem:[#allocation22_spill] sm:$0xff] %v5216_v13  ;;  %v7094_v59 = vld [vmem:[#allocation53_spill] sm:$0xff]  ;;  %v7095_v22 = vld [vmem:[#allocation54_spill] sm:$0xff]  ;;  %v3086_v6 = vmax.f32 %v3084_v20, %v3085_v58 }
 0x1b4   : > { %v516_v14 = vmul.f32 0.2, %v7094_v59  ;;  %vm499_vm11 = vcmp.gt.f32.partialorder %v7095_v22, 0.0  ;;  %v515_v4 = vmul.f32 0.2, %v7095_v22  ;;  %v7096_v43 = vld [vmem:[#allocation23_spill] sm:$0xff]  ;;  %v2677_v40 = vmax.f32 %v2675_v31, %v2676_v24  ;;  %v5240_v48 = vpop.permute.xlu1 %649 }
 0x1b5   : > { %v7097_v52 = vld [vmem:[#allocation24_spill] sm:$0xff]  ;;  %v2678_v16 = vsel %vm2637_vm5, %v2399_v33, -inf  ;;  %v2381_v11 = vsel %vm1613_vm15, %v4823_v54, -1e+30  ;;  %v2382_v10 = vsel %vm1614_vm3, %v4820_v0, -1e+30 }
 0x1b6   : > { %1051 = vbcast.lane.b32.xlu0 %v4461_v1, 328  ;;  %v7098_v41 = vld [vmem:[#allocation41_spill] sm:$0xff]  ;;  %v2577_v13 = vsel %vm1809_vm6, %v4889_v9, -1e+30  ;;  %vm500_vm2 = vcmp.gt.f32.partialorder %v7094_v59, 0.0  ;;  %1327 = vbcast.lane.b32.xlu1 %v4399_v47, 344  ;;  %v5256_v58 = vsel %vm499_vm11, %v7095_v22, %v515_v4  ;;  %v2679_v31 = vmax.f32 %v2677_v40, %v2678_v16  ;;  %v5273_v22 = vpop.permute.xlu0 %582 }
 0x1b7   : > { %7099 = vst [vmem:[#allocation28_spill] sm:$0xff] %v5240_v48  ;;  %v7100_v33 = vld [vmem:[#allocation19_spill] sm:$0xff]  ;;  %v7101_v19 = vld [vmem:[#allocation20_spill] sm:$0xff]  ;;  %v3087_v37 = vsel %vm2637_vm5, %v2576_v23, -inf  ;;  %v7103_v61 = vld [vmem:[#allocation62_spill] sm:$0xff]  ;;  %v2638_v24 = vsel %vm2637_vm5, %v2381_v11, -inf  ;;  %v5267_v15 = vsel %vm500_vm2, %v7094_v59, %v516_v14 }
 0x1b8   : > { %vm1742_vm15 = vcmp.gt.f32.partialorder %v7100_v33, 0.0  ;;  %vm1741_vm3 = vcmp.gt.f32.partialorder %v7101_v19, 0.0  ;;  %v7102_v25 = vld [vmem:[#allocation31_spill] sm:$0xff]  ;;  %vm1635_vm7 = vcmp.gt.f32.partialorder %v7103_v61, 0.0  ;;  %v2400_v53 = vsel %vm1632_vm13, %v4868_v45, -1e+30  ;;  %v5281_v59 = vpop.permute.xlu1 %909 }
 0x1b9   : > { %vm1663_vm10 = vcmp.gt.f32.partialorder %v7102_v25, 0.0  ;;  %v2383_v20 = vsel %vm1615_vm8, %v4829_v63, -1e+30  ;;  %7104 = vst [vmem:[#allocation39_spill] sm:$0xff] %v5256_v58  ;;  %v2639_v23 = vsel %vm2637_vm5, %v2382_v10, -inf  ;;  %v7105_v48 = vld [vmem:[#allocation25_spill] sm:$0xff]  ;;  %v3088_v16 = vmax.f32 %v3086_v6, %v3087_v37 }
 0x1ba   : > { %vm1743_vm6 = vcmp.gt.f32.partialorder %v7105_v48, 0.0  ;;  %v3089_v47 = vsel %vm2637_vm5, %v2577_v13, -inf  ;;  %v2401_v4 = vsel %vm1633_vm14, %v4889_v9, -1e+30  ;;  %1197 = vbcast.lane.b32.xlu0 %v4358_v30, 352  ;;  %v7106_v10 = vld [vmem:[#allocation63_spill] sm:$0xff]  ;;  %v2640_v6 = vmax.f32 %v2638_v24, %v2639_v23 }
 0x1bb   : > { %v2402_v11 = vsel %vm1634_vm1, %v4917_v12, -1e+30  ;;  %vm1619_vm8 = vcmp.gt.f32.partialorder %v7106_v10, 0.0  ;;  %v2641_v13 = vsel %vm2637_vm5, %v2383_v20, -inf  ;;  %1587 = vbcast.lane.b32.xlu1 %v4470_v2, 328  ;;  %7107 = vst [vmem:[#allocation48_spill] sm:$0xff] %v5281_v59  ;;  %v5309_v29 = vmax.f32 %v3088_v16, %v3089_v47 }
 0x1bc   : > { %v7108_v14 = vld [vmem:[#allocation50_spill] sm:$0xff]  ;;  %v2403_v28 = vsel %vm1635_vm7, %v5256_v58, -1e+30  ;;  %v2680_v37 = vsel %vm2637_vm5, %v2400_v53, -inf  ;;  %v2384_v50 = vsel %vm1616_vm12, %v4868_v45, -1e+30  ;;  %v2642_v24 = vmax.f32 %v2640_v6, %v2641_v13 }
 0x1bd   : > { %vm1696_vm13 = vcmp.gt.f32.partialorder %v7108_v14, 0.0  ;;  %v2681_v40 = vmax.f32 %v2679_v31, %v2680_v37  ;;  %v2385_v20 = vsel %vm1617_vm9, %v4889_v9, -1e+30  ;;  %v2386_v10 = vsel %vm1618_vm0, %v4917_v12, -1e+30  ;;  %v7109_v27 = vld [vmem:[#allocation42_spill] sm:$0xff]  ;;  %v5307_v31 = vpop.permute.xlu0 %779 }
 0x1be   : > { %v2461_v61 = vsel %vm1693_vm4, %v4823_v54, -1e+30  ;;  %vm1664_vm14 = vcmp.gt.f32.partialorder %v7109_v27, 0.0  ;;  %v2682_v53 = vsel %vm2637_vm5, %v2401_v4, -inf  ;;  %v2387_v3 = vsel %vm1619_vm8, %v5256_v58, -1e+30 }
 0x1bf   : > { %vm7110_vm1 = vcmp.gt.f32.partialorder %v7093_v21, 0.0  ;;  %1457 = vbcast.lane.b32.xlu0 %v4436_v60, 336  ;;  %7111 = vst [vmem:[#allocation61_spill] sm:$0xff] %v5307_v31  ;;  %v2684_v44 = vsel %vm2637_vm5, %v2402_v11, -inf  ;;  %vm7112_vm12 = vcmp.gt.f32.partialorder %v7097_v52, 0.0  ;;  %vm7113_vm4 = vcmp.gt.f32.partialorder %v7096_v43, 0.0  ;;  %v5319_v21 = vpop.permute.xlu1 %1118 }
 0x1c0   : > { %v2462_v49 = vsel %vm7110_vm1, %v4820_v0, -1e+30  ;;  %v2429_v23 = vsel %vm7112_vm12, %v4823_v54, -1e+30  ;;  %v2430_v4 = vsel %vm7113_vm4, %v4820_v0, -1e+30  ;;  %v2683_v43 = vmax.f32 %v2681_v40, %v2682_v53 }
 0x1c1   : > { %858 = vbcast.lane.b32.xlu1 %v4407_v51, 344  ;;  %7114 = vst [vmem:[#allocation29_spill] sm:$0xff] %v5319_v21  ;;  %v7115_v13 = vld [vmem:[#allocation32_spill] sm:$0xff]  ;;  %v7116_v37 = vld [vmem:[#allocation51_spill] sm:$0xff]  ;;  %v2643_v47 = vsel %vm2637_vm5, %v2384_v50, -inf  ;;  %vm7118_vm11 = vcmp.gt.f32.partialorder %v7098_v41, 0.0 }
 0x1c2   : > { %vm1744_vm9 = vcmp.gt.f32.partialorder %v7115_v13, 0.0  ;;  %vm1665_vm0 = vcmp.gt.f32.partialorder %v7116_v37, 0.0  ;;  %v7117_v16 = vld [vmem:[#allocation64_spill] sm:$0xff]  ;;  %v2463_v52 = vsel %vm7118_vm11, %v4829_v63, -1e+30  ;;  %v2823_v11 = vsel %vm2637_vm5, %v2461_v61, -inf }
 0x1c3   : > { %vm1697_vm7 = vcmp.gt.f32.partialorder %v7117_v16, 0.0  ;;  %v2431_v6 = vsel %vm1663_vm10, %v4829_v63, -1e+30  ;;  %v2509_v21 = vsel %vm1741_vm3, %v4823_v54, -1e+30  ;;  %v7119_v31 = vld [vmem:[#allocation43_spill] sm:$0xff]  ;;  %v2644_v59 = vmax.f32 %v2642_v24, %v2643_v47 }
 0x1c4   : > { %v2510_v50 = vsel %vm1742_vm15, %v4820_v0, -1e+30  ;;  %vm1745_vm2 = vcmp.gt.f32.partialorder %v7119_v31, 0.0  ;;  %v2824_v41 = vsel %vm2637_vm5, %v2462_v49, -inf  ;;  %v2749_v61 = vsel %vm2637_vm5, %v2429_v23, -inf  ;;  %728 = vbcast.lane.b32.xlu0 %v4370_v35, 352  ;;  %v5351_v49 = vpop.permute.xlu0 %1039  ;;  %v5353_v23 = vpop.permute.xlu1 %1315 }
 0x1c5   : > { %v2750_v40 = vsel %vm2637_vm5, %v2430_v4, -inf  ;;  %v7120_v25 = vld [vmem:[#allocation52_spill] sm:$0xff]  ;;  %v2686_v19 = vsel %vm2637_vm5, %v2403_v28, -inf  ;;  %v2645_v53 = vsel %vm2637_vm5, %v2385_v20, -inf  ;;  %v2647_v33 = vsel %vm2637_vm5, %v2386_v10, -inf  ;;  %1264 = vbcast.lane.b32.xlu1 %v4381_v39, 352 }
 0x1c6   : > { %vm1746_vm10 = vcmp.gt.f32.partialorder %v7120_v25, 0.0  ;;  %v2511_v24 = vsel %vm1743_vm6, %v4829_v63, -1e+30  ;;  %7121 = vst [vmem:[#allocation30_spill] sm:$0xff] %v5351_v49  ;;  %7122 = vst [vmem:[#allocation40_spill] sm:$0xff] %v5353_v23  ;;  %v2826_v4 = vsel %vm2637_vm5, %v2463_v52, -inf  ;;  %v2825_v63 = vmax.f32 %v2823_v11, %v2824_v41 }
 0x1c7   : > { %v2752_v47 = vsel %vm2637_vm5, %v2431_v6, -inf  ;;  %v2934_v28 = vsel %vm2637_vm5, %v2509_v21, -inf  ;;  %v2935_v20 = vsel %vm2637_vm5, %v2510_v50, -inf  ;;  %v2464_v10 = vsel %vm1696_vm13, %v4868_v45, -1e+30  ;;  %v7123_v49 = vld [vmem:[#allocation65_spill] sm:$0xff] }
 0x1c8   : > { %v2465_v48 = vsel %vm1697_vm7, %v4889_v9, -1e+30  ;;  %v2751_v54 = vmax.f32 %v2749_v61, %v2750_v40  ;;  %v2685_v0 = vmax.f32 %v2683_v43, %v2684_v44  ;;  %v2646_v23 = vmax.f32 %v2644_v59, %v2645_v53  ;;  %988 = vbcast.lane.b32.xlu0 %v4444_v62, 336  ;;  %v5377_v43 = vpop.permute.xlu0 %1185  ;;  %v5379_v41 = vpop.permute.xlu1 %1575  ;;  %v7124_v40 = vld [vmem:[#allocation68_spill] sm:$0xff] }
 0x1c9   : > { %vm1666_vm15 = vcmp.gt.f32.partialorder %v7123_v49, 0.0  ;;  %v2937_v52 = vsel %vm2637_vm5, %v2511_v24, -inf  ;;  %v2827_v21 = vmax.f32 %v2825_v63, %v2826_v4  ;;  %v2432_v14 = vsel %vm1664_vm14, %v4868_v45, -1e+30  ;;  %1524 = vbcast.lane.b32.xlu1 %v7058_v36, 336  ;;  %v7126_v49 = vld [vmem:[#allocation70_spill] sm:$0xff] }
 0x1ca   : > { %v2753_v6 = vmax.f32 %v2751_v54, %v2752_v47  ;;  %v2936_v50 = vmax.f32 %v2934_v28, %v2935_v20  ;;  %v5372_v16 = vmax.f32 %v2685_v0, %v2686_v19  ;;  %v2649_v44 = vsel %vm2637_vm5, %v2387_v3, -inf  ;;  %v7125_v19 = vld [vmem:[#allocation69_spill] sm:$0xff]  ;;  %v7127_v4 = vld [vmem:[#allocation71_spill] sm:$0xff]  ;;  %v7128_v20 = vld [vmem:[#allocation72_spill] sm:$0xff] }
 0x1cb   : > { %v2828_v59 = vsel %vm2637_vm5, %v2464_v10, -inf  ;;  %v2830_v11 = vsel %vm2637_vm5, %v2465_v48, -inf  ;;  %v2433_v63 = vsel %vm1665_vm0, %v4889_v9, -1e+30  ;;  %v2434_v54 = vsel %vm1666_vm15, %v4917_v12, -1e+30 }
 0x1cc   : > { %v2512_v0 = vsel %vm1744_vm9, %v4868_v45, -1e+30  ;;  %v2938_v27 = vmax.f32 %v2936_v50, %v2937_v52  ;;  %v2648_v3 = vmax.f32 %v2646_v23, %v2647_v33  ;;  %v2754_v61 = vsel %vm2637_vm5, %v2432_v14, -inf  ;;  %1394 = vbcast.lane.b32.xlu0 %v4417_v55, 344  ;;  %v5406_v10 = vpop.permute.xlu0 %1445  ;;  %v5408_v48 = vpop.permute.xlu1 %846  ;;  %v7131_v14 = vld [vmem:[#allocation73_spill] sm:$0xff] }
 0x1cd   : > { %vm1747_vm3 = vcmp.gt.f32.partialorder %v7124_v40, 0.0  ;;  %vm1728_vm6 = vcmp.gt.f32.partialorder %v7125_v19, 0.0  ;;  %v2829_v53 = vmax.f32 %v2827_v21, %v2828_v59  ;;  %v2755_v24 = vmax.f32 %v2753_v6, %v2754_v61  ;;  %665 = vbcast.lane.b32.xlu1 %v4323_v17, 360  ;;  %7129 = vst [vmem:[#allocation49_spill] sm:$0xff] %v5406_v10  ;;  %7130 = vst [vmem:[#allocation33_spill] sm:$0xff] %v5408_v48 }
 0x1ce   : > { %v2513_v37 = vsel %vm1745_vm2, %v4889_v9, -1e+30  ;;  %vm1794_vm8 = vcmp.gt.f32.partialorder %v7126_v49, 0.0  ;;  %v2756_v13 = vsel %vm2637_vm5, %v2433_v63, -inf  ;;  %v2514_v33 = vsel %vm1746_vm10, %v4917_v12, -1e+30 }
 0x1cf   : > { %v2939_v23 = vsel %vm2637_vm5, %v2512_v0, -inf  ;;  %vm1763_vm13 = vcmp.gt.f32.partialorder %v7127_v4, 0.0  ;;  %v2515_v47 = vsel %vm1747_vm3, %v5256_v58, -1e+30  ;;  %v2496_v31 = vsel %vm1728_vm6, %v4868_v45, -1e+30 }
 0x1d0   : > { %v2940_v28 = vmax.f32 %v2938_v27, %v2939_v23  ;;  %vm1856_vm14 = vcmp.gt.f32.partialorder %v7128_v20, 0.0  ;;  %v5410_v52 = vmax.f32 %v2648_v3, %v2649_v44  ;;  %v2941_v25 = vsel %vm2637_vm5, %v2513_v37, -inf  ;;  %598 = vbcast.lane.b32.xlu0 %v4326_v18, 360  ;;  %v7132_v3 = vld [vmem:[#allocation74_spill] sm:$0xff]  ;;  %v5436_v19 = vpop.permute.xlu0 %716  ;;  %v7135_v49 = vld [vmem:[#allocation75_spill] sm:$0xff] }
 0x1d1   : > { %v2562_v21 = vsel %vm1794_vm8, %v4917_v12, -1e+30  ;;  %vm1825_vm1 = vcmp.gt.f32.partialorder %v7131_v14, 0.0  ;;  %v5416_v6 = vmax.f32 %v2829_v53, %v2830_v11  ;;  %v5418_v50 = vmax.f32 %v2755_v24, %v2756_v13  ;;  %925 = vbcast.lane.b32.xlu1 %v7079_v8, 344  ;;  %7133 = vst [vmem:[#allocation53_spill] sm:$0xff] %v5436_v19  ;;  %v5438_v53 = vpop.permute.xlu1 %1252  ;;  %v7136_v13 = vld [vmem:[#allocation76_spill] sm:$0xff] }
 0x1d2   : > { %v5421_v59 = vsel %vm2637_vm5, %v2434_v54, -inf  ;;  %v2531_v63 = vsel %vm1763_vm13, %v5256_v58, -1e+30  ;;  %v2943_v44 = vsel %vm2637_vm5, %v2514_v33, -inf  ;;  %v5427_v0 = vsel %vm2637_vm5, %v2496_v31, -inf  ;;  %7134 = vst [vmem:[#allocation54_spill] sm:$0xff] %v5438_v53 }
 0x1d3   : > { %v2624_v27 = vsel %vm1856_vm14, %v4868_v45, -1e+30  ;;  %vm1682_vm12 = vcmp.gt.f32.partialorder %v7132_v3, 0.0  ;;  %v2942_v11 = vmax.f32 %v2940_v28, %v2941_v25  ;;  %v2945_v61 = vsel %vm2637_vm5, %v2515_v47, -inf  ;;  %v7137_v47 = vld [vmem:[#allocation77_spill] sm:$0xff]  ;;  %v7138_v20 = vld [vmem:[#allocation78_spill] sm:$0xff] }
 0x1d4   : > { %v5433_v40 = vsel %vm2637_vm5, %v2562_v21, -inf  ;;  %v2593_v54 = vsel %vm1825_vm1, %v4889_v9, -1e+30  ;;  %v2982_v37 = vsel %vm2637_vm5, %v2531_v63, -inf  ;;  %vm1651_vm4 = vcmp.gt.f32.partialorder %v7135_v49, 0.0  ;;  %795 = vbcast.lane.b32.xlu0 %v4389_v42, 352  ;;  %v5466_v49 = vpop.permute.xlu0 %976 }
 0x1d5   : > { %vm1779_vm9 = vcmp.gt.f32.partialorder %v7136_v13, 0.0  ;;  %v5449_v23 = vsel %vm2637_vm5, %v2624_v27, -inf  ;;  %v2450_v4 = vsel %vm1682_vm12, %v4917_v12, -1e+30  ;;  %vm1713_vm0 = vcmp.gt.f32.partialorder %v7137_v47, 0.0  ;;  %1134 = vbcast.lane.b32.xlu1 %v4347_v26, 360  ;;  %v5468_v13 = vpop.permute.xlu1 %1512 }
 0x1d6   : > { %v3126_v31 = vsel %vm2637_vm5, %v2593_v54, -inf  ;;  %vm1841_vm7 = vcmp.gt.f32.partialorder %v7138_v20, 0.0  ;;  %v7139_v25 = vld [vmem:[#allocation79_spill] sm:$0xff]  ;;  %v2944_v21 = vmax.f32 %v2942_v11, %v2943_v44  ;;  %v7140_v14 = vmax.f32 %v5000_v34, %v4957_v46  ;;  %7141 = vst [vmem:[#allocation23_spill] sm:$0xff] %v5466_v49  ;;  %7142 = vst [vmem:[#allocation24_spill] sm:$0xff] %v5468_v13  ;;  %v7143_v11 = vld [vmem:[#allocation80_spill] sm:$0xff] }
 0x1d7   : > { %vm1810_vm11 = vcmp.gt.f32.partialorder %v7139_v25, 0.0  ;;  %v2419_v27 = vsel %vm1651_vm4, %v5256_v58, -1e+30  ;;  %v2547_v3 = vsel %vm1779_vm9, %v5256_v58, -1e+30  ;;  %v5473_v47 = vsel %vm2637_vm5, %v2450_v4, -inf }
 0x1d8   : > { %v5462_v63 = vmax.f32 %v7140_v14, %v2982_v37  ;;  %v2481_v44 = vsel %vm1713_vm0, %v4889_v9, -1e+30  ;;  %vm1636_vm2 = vcmp.gt.f32.partialorder %v7143_v11, 0.0  ;;  %1055 = vbcast.lane.b32.xlu0 %v4461_v1, 336  ;;  %v7144_v46 = vld [vmem:[#allocation37_spill] sm:$0xff]  ;;  %v7147_v54 = vld [vmem:[#allocation10_spill] sm:$0xff]  ;;  %v5491_v24 = vmax.f32 %v2944_v21, %v2945_v61 }
 0x1d9   : > { %v7145_v34 = vmax.f32 %v5066_v32, %v7144_v46  ;;  %v2609_v20 = vsel %vm1841_vm7, %v4889_v9, -1e+30  ;;  %v2578_v25 = vsel %vm1810_vm11, %v4917_v12, -1e+30  ;;  %v7146_v14 = vld [vmem:[#allocation81_spill] sm:$0xff]  ;;  %1331 = vbcast.lane.b32.xlu1 %v7147_v54, 352  ;;  %v5499_v45 = vpop.permute.xlu1 %653 }
 0x1da   : > { %vm1620_vm10 = vcmp.gt.f32.partialorder %v7146_v14, 0.0  ;;  %v2723_v4 = vsel %vm2637_vm5, %v2419_v27, -inf  ;;  %v3019_v28 = vsel %vm2637_vm5, %v2547_v3, -inf  ;;  %v7148_v11 = vld [vmem:[#allocation82_spill] sm:$0xff]  ;;  %v7149_v33 = vld [vmem:[#allocation83_spill] sm:$0xff]  ;;  %v2867_v46 = vsel %vm2637_vm5, %v2481_v44, -inf  ;;  %v5497_v14 = vpop.permute.xlu0 %1382 }
 0x1db   : > { %v5481_v37 = vmax.f32 %v7145_v34, %v3126_v31  ;;  %vm1698_vm15 = vcmp.gt.f32.partialorder %v7148_v11, 0.0  ;;  %vm1667_vm3 = vcmp.gt.f32.partialorder %v7149_v33, 0.0  ;;  %v7150_v32 = vld [vmem:[#allocation27_spill] sm:$0xff]  ;;  %v2404_v34 = vsel %vm1636_vm2, %v5267_v15, -1e+30  ;;  %7151 = vst [vmem:[#allocation41_spill] sm:$0xff] %v5497_v14 }
 0x1dc   : > { %7152 = vst [vmem:[#allocation19_spill] sm:$0xff] %v5499_v45  ;;  %v3163_v27 = vsel %vm2637_vm5, %v2609_v20, -inf  ;;  %v5503_v3 = vsel %vm2637_vm5, %v2578_v25, -inf  ;;  %v2388_v33 = vsel %vm1620_vm10, %v5267_v15, -1e+30  ;;  %v7153_v61 = vld [vmem:[#allocation84_spill] sm:$0xff] }
 0x1dd   : > { %vm1748_vm6 = vcmp.gt.f32.partialorder %v7153_v61, 0.0  ;;  %1201 = vbcast.lane.b32.xlu0 %v4358_v30, 360  ;;  %v7154_v21 = vld [vmem:[#allocation17_spill] sm:$0xff]  ;;  %v7155_v11 = vld [vmem:[#allocation26_spill] sm:$0xff]  ;;  %v7157_v13 = vld [vmem:[#allocation47_spill] sm:$0xff]  ;;  %1591 = vbcast.lane.b32.xlu1 %v4470_v2, 336 }
 0x1de   : > { %v7156_v44 = vmax.f32 %v7154_v21, %v7155_v11  ;;  %v7158_v14 = vld [vmem:[#allocation36_spill] sm:$0xff]  ;;  %v2466_v20 = vsel %vm1698_vm15, %v4917_v12, -1e+30  ;;  %v2435_v25 = vsel %vm1667_vm3, %v5256_v58, -1e+30  ;;  %v7161_v61 = vld [vmem:[#allocation59_spill] sm:$0xff] }
 0x1df   : > { %v7159_v49 = vmax.f32 %v7157_v13, %v7158_v14  ;;  %v7160_v53 = vld [vmem:[#allocation16_spill] sm:$0xff]  ;;  %v5527_v21 = vsel %vm2637_vm5, %v2404_v34, -inf  ;;  %v7164_v11 = vld [vmem:[#allocation86_spill] sm:$0xff]  ;;  %v2516_v14 = vsel %vm1748_vm6, %v5267_v15, -1e+30  ;;  %v5546_v34 = vsel %vm2637_vm5, %v2466_v20, -inf }
 0x1e0   : > { %v5511_v31 = vmax.f32 %v7156_v44, %v2723_v4  ;;  %v7162_v19 = vmax.f32 %v7160_v53, %v7161_v61  ;;  %v7163_v4 = vld [vmem:[#allocation85_spill] sm:$0xff]  ;;  %vm1795_vm13 = vcmp.gt.f32.partialorder %v7164_v11, 0.0  ;;  %v7166_v53 = vld [vmem:[#allocation87_spill] sm:$0xff]  ;;  %v2760_v44 = vsel %vm2637_vm5, %v2435_v25, -inf }
 0x1e1   : > { %v5516_v45 = vmax.f32 %v7159_v49, %v3019_v28  ;;  %vm1729_vm8 = vcmp.gt.f32.partialorder %v7163_v4, 0.0  ;;  %v7165_v28 = vmax.f32 %v5224_v56, %v5190_v57  ;;  %vm1764_vm14 = vcmp.gt.f32.partialorder %v7166_v53, 0.0  ;;  %v7168_v57 = vld [vmem:[#allocation88_spill] sm:$0xff]  ;;  %1461 = vbcast.lane.b32.xlu0 %v4436_v60, 344  ;;  %v5551_v56 = vpop.permute.xlu1 %913  ;;  %862 = vbcast.lane.b32.xlu1 %v4407_v51, 352  ;;  %v7171_v11 = vld [vmem:[#allocation93_spill] sm:$0xff] }
 0x1e2   : > { %v5524_v48 = vmax.f32 %v7162_v19, %v2867_v46  ;;  %v5540_v19 = vpop.permute.xlu0 %586  ;;  %v5543_v46 = vsel %vm2637_vm5, %v2388_v33, -inf  ;;  %vm1857_vm1 = vcmp.gt.f32.partialorder %v7168_v57, 0.0  ;;  %7169 = vst [vmem:[#allocation31_spill] sm:$0xff] %v5551_v56  ;;  %v2497_v61 = vsel %vm1729_vm8, %v4889_v9, -1e+30  ;;  %v7170_v33 = vld [vmem:[#allocation89_spill] sm:$0xff] }
 0x1e3   : > { %v5534_v49 = vmax.f32 %v7165_v28, %v3163_v27  ;;  %7167 = vst [vmem:[#allocation20_spill] sm:$0xff] %v5540_v19  ;;  %v2563_v4 = vsel %vm1795_vm13, %v5256_v58, -1e+30  ;;  %vm1826_vm12 = vcmp.gt.f32.partialorder %v7170_v33, 0.0  ;;  %v5560_v20 = vsel %vm2637_vm5, %v2516_v14, -inf  ;;  %v7172_v28 = vld [vmem:[#allocation94_spill] sm:$0xff] }
 0x1e4   : > { %v2532_v25 = vsel %vm1764_vm14, %v5267_v15, -1e+30  ;;  %vm1683_vm4 = vcmp.gt.f32.partialorder %v7171_v11, 0.0  ;;  %vm1652_vm9 = vcmp.gt.f32.partialorder %v7172_v28, 0.0  ;;  %v7173_v33 = vmax.f32 %v5418_v50, %v5421_v59  ;;  %v7174_v28 = vld [vmem:[#allocation95_spill] sm:$0xff] }
 0x1e5   : > { %v2625_v14 = vsel %vm1857_vm1, %v4889_v9, -1e+30  ;;  %v2904_v13 = vsel %vm2637_vm5, %v2497_v61, -inf  ;;  %v3056_v56 = vsel %vm2637_vm5, %v2563_v4, -inf  ;;  %v2594_v11 = vsel %vm1826_vm12, %v4917_v12, -1e+30  ;;  %v5582_v57 = vpop.permute.xlu1 %1122 }
 0x1e6   : > { %v5572_v27 = vmax.f32 %v7173_v33, %v2760_v44  ;;  %vm1780_vm0 = vcmp.gt.f32.partialorder %v7174_v28, 0.0  ;;  %732 = vbcast.lane.b32.xlu0 %v4370_v35, 360  ;;  %v5580_v53 = vpop.permute.xlu0 %783  ;;  %7176 = vst [vmem:[#allocation25_spill] sm:$0xff] %v5582_v57  ;;  %v5587_v59 = vsel %vm2637_vm5, %v2532_v25, -inf  ;;  %v2451_v44 = vsel %vm1683_vm4, %v5256_v58, -1e+30 }
 0x1e7   : > { %7175 = vst [vmem:[#allocation62_spill] sm:$0xff] %v5580_v53  ;;  %v2420_v61 = vsel %vm1652_vm9, %v5267_v15, -1e+30  ;;  %1268 = vbcast.lane.b32.xlu1 %v4381_v39, 360  ;;  %v3200_v4 = vsel %vm2637_vm5, %v2625_v14, -inf  ;;  %v7177_v33 = vld [vmem:[#allocation97_spill] sm:$0xff]  ;;  %v7180_v50 = vmax.f32 %v4963_v38, %v5427_v0  ;;  %v7181_v14 = vmax.f32 %v4976_v5, %v5433_v40 }
 0x1e8   : > { %vm1714_vm7 = vcmp.gt.f32.partialorder %v7177_v33, 0.0  ;;  %v7178_v28 = vld [vmem:[#allocation99_spill] sm:$0xff]  ;;  %v7179_v9 = vld [vmem:[#allocation56_spill] sm:$0xff]  ;;  %v5602_v25 = vsel %vm2637_vm5, %v2594_v11, -inf  ;;  %v2548_v19 = vsel %vm1780_vm0, %v5267_v15, -1e+30  ;;  %v7185_v5 = vmax.f32 %v5030_v7, %v5449_v23 }
 0x1e9   : > { %vm1842_vm11 = vcmp.gt.f32.partialorder %v7178_v28, 0.0  ;;  %v517_v57 = vmul.f32 0.2, %v7179_v9  ;;  %v5599_v53 = vmax.f32 %v7180_v50, %v2904_v13  ;;  %vm501_vm2 = vcmp.gt.f32.partialorder %v7179_v9, 0.0  ;;  %v7182_v38 = vld [vmem:[#allocation100_spill] sm:$0xff]  ;;  %v5619_v13 = vpop.permute.xlu1 %1319  ;;  %v7186_v23 = vld [vmem:[#allocation102_spill] sm:$0xff] }
 0x1ea   : > { %v5609_v39 = vmax.f32 %v7181_v14, %v3056_v56  ;;  %v2797_v35 = vsel %vm2637_vm5, %v2451_v44, -inf  ;;  %v5613_v10 = vsel %vm2637_vm5, %v2420_v61, -inf  ;;  %vm1811_vm10 = vcmp.gt.f32.partialorder %v7182_v38, 0.0  ;;  %992 = vbcast.lane.b32.xlu0 %v4444_v62, 344  ;;  %v5617_v0 = vpop.permute.xlu0 %1043  ;;  %7184 = vst [vmem:[#allocation50_spill] sm:$0xff] %v5619_v13  ;;  %v7193_v38 = vld [vmem:[#allocation55_spill] sm:$0xff] }
 0x1eb   : > { %7183 = vst [vmem:[#allocation63_spill] sm:$0xff] %v5617_v0  ;;  %v5626_v40 = vmax.f32 %v7185_v5, %v3200_v4  ;;  %v2482_v56 = vsel %vm1714_vm7, %v4917_v12, -1e+30  ;;  %v2610_v50 = vsel %vm1842_vm11, %v4917_v12, -1e+30  ;;  %1528 = vbcast.lane.b32.xlu1 %v7058_v36, 344  ;;  %v5641_v7 = vsel %vm501_vm2, %v7179_v9, %v517_v57 }
 0x1ec   : > { %v5638_v61 = vsel %vm2637_vm5, %v2548_v19, -inf  ;;  %vm1637_vm15 = vcmp.gt.f32.partialorder %v7186_v23, 0.0  ;;  %v5644_v4 = vpop.f32.mrb[14].mxu0  ;;  %v7188_v33 = vmax.f32 %v7150_v32, %v5473_v47  ;;  %v2579_v19 = vsel %vm1811_vm10, %v5256_v58, -1e+30  ;;  %v7189_v5 = vld [vmem:[#allocation103_spill] sm:$0xff] }
 0x1ed   : > { %7187 = vst [vmem:[#allocation42_spill] sm:$0xff] %v5644_v4  ;;  %vm1621_vm3 = vcmp.gt.f32.partialorder %v7189_v5, 0.0  ;;  %v5657_v9 = vpop.f32.mrb[15].mxu0  ;;  %v5660_v57 = vsel %vm2637_vm5, %v2482_v56, -inf  ;;  %v5663_v23 = vsel %vm2637_vm5, %v2610_v50, -inf  ;;  %v7191_v47 = vld [vmem:[#allocation104_spill] sm:$0xff]  ;;  %v5676_v50 = vpop.permute.xlu1 %1579 }
 0x1ee   : > { %v5649_v28 = vmax.f32 %v7188_v33, %v2797_v35  ;;  %7190 = vst [vmem:[#allocation32_spill] sm:$0xff] %v5657_v9  ;;  %vm1699_vm6 = vcmp.gt.f32.partialorder %v7191_v47, 0.0  ;;  %v7192_v35 = vld [vmem:[#allocation105_spill] sm:$0xff]  ;;  %1398 = vbcast.lane.b32.xlu0 %v4417_v55, 352  ;;  %v518_v33 = vmul.f32 0.2, %v7193_v38  ;;  %v5673_v56 = vpop.permute.xlu0 %1189 }
 0x1ef   : > { %vm1668_vm8 = vcmp.gt.f32.partialorder %v7192_v35, 0.0  ;;  %v2405_v14 = vsel %vm1637_vm15, %v5641_v7, -1e+30  ;;  %v7194_v44 = vld [vmem:[#allocation106_spill] sm:$0xff]  ;;  %7195 = vst [vmem:[#allocation51_spill] sm:$0xff] %v5673_v56  ;;  %669 = vbcast.lane.b32.xlu1 %v4323_v17, 368 }
 0x1f0   : > { %vm1749_vm13 = vcmp.gt.f32.partialorder %v7194_v44, 0.0  ;;  %7196 = vst [vmem:[#allocation64_spill] sm:$0xff] %v5676_v50  ;;  %v3093_v47 = vsel %vm2637_vm5, %v2579_v19, -inf  ;;  %vm502_vm14 = vcmp.gt.f32.partialorder %v7193_v38, 0.0  ;;  %v2389_v35 = vsel %vm1621_vm3, %v5641_v7, -1e+30 }
 0x1f1   : > { %v7197_v32 = vld [vmem:[#allocation34_spill] sm:$0xff]  ;;  %v2467_v44 = vsel %vm1699_vm6, %v5256_v58, -1e+30  ;;  %v2436_v4 = vsel %vm1668_vm8, %v5267_v15, -1e+30  ;;  %v7198_v9 = vld [vmem:[#allocation45_spill] sm:$0xff]  ;;  %v5701_v13 = vsel %vm502_vm14, %v7193_v38, %v518_v33  ;;  %v7205_v38 = vmax.f32 %v5372_v16, %v5527_v21 }
 0x1f2   : > { %vm1730_vm1 = vcmp.gt.f32.partialorder %v7197_v32, 0.0  ;;  %vm1796_vm12 = vcmp.gt.f32.partialorder %v7198_v9, 0.0  ;;  %v2690_v50 = vsel %vm2637_vm5, %v2405_v14, -inf  ;;  %v2517_v56 = vsel %vm1749_vm13, %v5641_v7, -1e+30  ;;  %v7199_v5 = vld [vmem:[#allocation38_spill] sm:$0xff] }
 0x1f3   : > { %vm1765_vm4 = vcmp.gt.f32.partialorder %v7199_v5, 0.0  ;;  %602 = vbcast.lane.b32.xlu0 %v4326_v18, 368  ;;  %v7200_v32 = vmax.f32 %v5309_v29, %v5503_v3  ;;  %v2653_v9 = vsel %vm2637_vm5, %v2389_v35, -inf  ;;  %v2498_v19 = vsel %vm1730_vm1, %v4917_v12, -1e+30  ;;  %929 = vbcast.lane.b32.xlu1 %v7079_v8, 352  ;;  %v5712_v29 = vpop.permute.xlu0 %1449  ;;  %v5714_v3 = vpop.permute.xlu1 %850 }
 0x1f4   : > { %v2834_v14 = vsel %vm2637_vm5, %v2467_v44, -inf  ;;  %v5708_v5 = vsel %vm2637_vm5, %v2436_v4, -inf  ;;  %v2564_v18 = vsel %vm1796_vm12, %v5267_v15, -1e+30  ;;  %v7202_v0 = vld [vmem:[#allocation66_spill] sm:$0xff]  ;;  %7203 = vst [vmem:[#allocation52_spill] sm:$0xff] %v5712_v29  ;;  %v5719_v33 = vmax.f32 %v7205_v38, %v2690_v50 }
 0x1f5   : > { %v5698_v11 = vmax.f32 %v7200_v32, %v3093_v47  ;;  %vm504_vm9 = vcmp.gt.f32.partialorder %v7202_v0, 0.0  ;;  %7204 = vst [vmem:[#allocation65_spill] sm:$0xff] %v5714_v3  ;;  %v2949_v47 = vsel %vm2637_vm5, %v2517_v56, -inf  ;;  %v2533_v35 = vsel %vm1765_vm4, %v5641_v7, -1e+30  ;;  %v7206_v44 = vld [vmem:[#allocation46_spill] sm:$0xff] }
 0x1f6   : > { %vm1858_vm0 = vcmp.gt.f32.partialorder %v7206_v44, 0.0  ;;  %v7207_v4 = vmax.f32 %v5410_v52, %v5543_v46  ;;  %v5730_v29 = vsel %vm2637_vm5, %v2498_v19, -inf  ;;  %v7208_v3 = vld [vmem:[#allocation57_spill] sm:$0xff]  ;;  %v520_v16 = vmul.f32 0.2, %v7202_v0  ;;  %v7210_v46 = vld [vmem:[#allocation67_spill] sm:$0xff] }
 0x1f7   : > { %7201 = vst [vmem:[#allocation43_spill] sm:$0xff] %v5698_v11  ;;  %vm1827_vm7 = vcmp.gt.f32.partialorder %v7208_v3, 0.0  ;;  %799 = vbcast.lane.b32.xlu0 %v4389_v42, 360  ;;  %v7209_v21 = vmax.f32 %v5416_v6, %v5546_v34  ;;  %v5743_v52 = vsel %vm2637_vm5, %v2564_v18, -inf  ;;  %vm503_vm11 = vcmp.gt.f32.partialorder %v7210_v46, 0.0  ;;  %1138 = vbcast.lane.b32.xlu1 %v4347_v26, 368 }
 0x1f8   : > { %v5727_v32 = vmax.f32 %v7207_v4, %v2653_v9  ;;  %v7211_v19 = vmax.f32 %v5491_v24, %v5560_v20  ;;  %v2986_v3 = vsel %vm2637_vm5, %v2533_v35, -inf  ;;  %v2626_v6 = vsel %vm1858_vm0, %v4917_v12, -1e+30  ;;  %v7212_v34 = vld [vmem:[#allocation58_spill] sm:$0xff]  ;;  %v7213_v44 = vld [vmem:[#allocation15_spill] sm:$0xff]  ;;  %v5762_v24 = vpop.permute.xlu1 %1256  ;;  %v7215_v35 = vld [vmem:[#allocation60_spill] sm:$0xff] }
 0x1f9   : > { %v5738_v56 = vmax.f32 %v7209_v21, %v2834_v14  ;;  %vm1684_vm2 = vcmp.gt.f32.partialorder %v7212_v34, 0.0  ;;  %v5755_v14 = vpop.permute.xlu0 %720  ;;  %v2595_v38 = vsel %vm1827_vm7, %v5256_v58, -1e+30  ;;  %vm1653_vm10 = vcmp.gt.f32.partialorder %v7213_v44, 0.0  ;;  %v7219_v50 = vld [vmem:[#allocation35_spill] sm:$0xff]  ;;  %v7242_v11 = vld [vmem:[#allocation53_spill] sm:$0xff] }
 0x1fa   : > { %v5750_v9 = vmax.f32 %v7211_v19, %v2949_v47  ;;  %v519_v4 = vmul.f32 0.2, %v7210_v46  ;;  %v7214_v47 = vld [vmem:[#allocation21_spill] sm:$0xff]  ;;  %vm1715_vm3 = vcmp.gt.f32.partialorder %v7215_v35, 0.0  ;;  %v5771_v21 = vsel %vm504_vm9, %v7202_v0, %v520_v16 }
 0x1fb   : > { %vm1781_vm15 = vcmp.gt.f32.partialorder %v7214_v47, 0.0  ;;  %7216 = vst [vmem:[#allocation68_spill] sm:$0xff] %v5771_v21  ;;  %1059 = vbcast.lane.b32.xlu0 %v4461_v1, 344  ;;  %v7217_v19 = vmax.f32 %v5462_v63, %v5587_v59  ;;  %v5780_v44 = vsel %vm2637_vm5, %v2626_v6, -inf  ;;  %v2452_v20 = vsel %vm1684_vm2, %v5267_v15, -1e+30 }
 0x1fc   : > { %1335 = vbcast.lane.b32.xlu1 %v7147_v54, 360  ;;  %v7218_v47 = vld [vmem:[#allocation44_spill] sm:$0xff]  ;;  %v3130_v18 = vsel %vm2637_vm5, %v2595_v38, -inf  ;;  %v2421_v0 = vsel %vm1653_vm10, %v5641_v7, -1e+30  ;;  %v5799_v6 = vsel %vm503_vm11, %v7210_v46, %v519_v4  ;;  %v5801_v38 = vpop.permute.xlu1 %1516  ;;  %vm1622_vm1 = vcmp.gt.f32.partialorder %v5273_v22, 0.0 }
 0x1fd   : > { %v5777_v34 = vmax.f32 %v7217_v19, %v2986_v3  ;;  %v521_v35 = vmul.f32 0.2, %v7218_v47  ;;  %v5787_v16 = vpop.permute.xlu0 %980  ;;  %v5790_v12 = vmul.f32 0.2, %v7219_v50  ;;  %vm505_vm6 = vcmp.gt.f32.partialorder %v7218_v47, 0.0  ;;  %v7221_v3 = vld [vmem:[#allocation18_spill] sm:$0xff] }
 0x1fe   : > { %v2549_v63 = vsel %vm1781_vm15, %v5641_v7, -1e+30  ;;  %v2483_v59 = vsel %vm1715_vm3, %v5256_v58, -1e+30  ;;  %vm1843_vm8 = vcmp.gt.f32.partialorder %v7221_v3, 0.0  ;;  %v7222_v50 = vld [vmem:[#allocation22_spill] sm:$0xff]  ;;  %v7224_v3 = vmax.f32 %v5481_v37, %v5602_v25 }
 0x1ff   : > { %7220 = vst [vmem:[#allocation69_spill] sm:$0xff] %v5790_v12  ;;  %v5806_v12 = vsel %vm2637_vm5, %v2452_v20, -inf  ;;  %vm1812_vm13 = vcmp.gt.f32.partialorder %v7222_v50, 0.0  ;;  %v7223_v21 = vld [vmem:[#allocation28_spill] sm:$0xff]  ;;  %1205 = vbcast.lane.b32.xlu0 %v4358_v30, 368  ;;  %v2727_v46 = vsel %vm2637_vm5, %v2421_v0, -inf  ;;  %v5820_v4 = vsel %vm505_vm6, %v7218_v47, %v521_v35 }
 0x200   : > { %vm1638_vm14 = vcmp.gt.f32.partialorder %v7223_v21, 0.0  ;;  %v5814_v54 = vmax.f32 %v7224_v3, %v3130_v18  ;;  %1595 = vbcast.lane.b32.xlu1 %v4470_v2, 344  ;;  %7225 = vst [vmem:[#allocation70_spill] sm:$0xff] %v5820_v4  ;;  %v3023_v50 = vsel %vm2637_vm5, %v2549_v63, -inf  ;;  %v2871_v20 = vsel %vm2637_vm5, %v2483_v59, -inf  ;;  %v7226_v19 = vld [vmem:[#allocation48_spill] sm:$0xff]  ;;  %v5833_v47 = vpop.permute.xlu1 %657 }
 0x201   : > { %v2611_v21 = vsel %vm1843_vm8, %v5256_v58, -1e+30  ;;  %vm1700_vm12 = vcmp.gt.f32.partialorder %v7226_v19, 0.0  ;;  %v5826_v37 = vpop.permute.xlu0 %1386  ;;  %v2580_v22 = vsel %vm1812_vm13, %v5267_v15, -1e+30  ;;  %v7228_v0 = vld [vmem:[#allocation61_spill] sm:$0xff]  ;;  %v7229_v35 = vmax.f32 %v5511_v31, %v5613_v10 }
 0x202   : > { %7227 = vst [vmem:[#allocation71_spill] sm:$0xff] %v5826_v37  ;;  %v2406_v18 = vsel %vm1638_vm14, %v5701_v13, -1e+30  ;;  %vm1669_vm4 = vcmp.gt.f32.partialorder %v7228_v0, 0.0  ;;  %v2390_v59 = vsel %vm1622_vm1, %v5701_v13, -1e+30  ;;  %v7232_v25 = vmax.f32 %v5516_v45, %v5638_v61 }
 0x203   : > { %v5838_v63 = vmax.f32 %v7229_v35, %v2727_v46  ;;  %v7230_v19 = vld [vmem:[#allocation29_spill] sm:$0xff]  ;;  %v7231_v3 = vld [vmem:[#allocation30_spill] sm:$0xff]  ;;  %1465 = vbcast.lane.b32.xlu0 %v4436_v60, 352  ;;  %v7233_v0 = vmax.f32 %v5524_v48, %v5660_v57  ;;  %v3167_v10 = vsel %vm2637_vm5, %v2611_v21, -inf  ;;  %v2468_v31 = vsel %vm1700_vm12, %v5267_v15, -1e+30 }
 0x204   : > { %vm1750_vm9 = vcmp.gt.f32.partialorder %v7230_v19, 0.0  ;;  %vm1731_vm0 = vcmp.gt.f32.partialorder %v7231_v3, 0.0  ;;  %v5847_v37 = vmax.f32 %v7232_v25, %v3023_v50  ;;  %866 = vbcast.lane.b32.xlu1 %v4407_v51, 360  ;;  %v5858_v46 = vsel %vm2637_vm5, %v2580_v22, -inf  ;;  %v7235_v61 = vld [vmem:[#allocation40_spill] sm:$0xff]  ;;  %v5873_v21 = vpop.permute.xlu1 %917 }
 0x205   : > { %v5852_v4 = vmax.f32 %v7233_v0, %v2871_v20  ;;  %7234 = vst [vmem:[#allocation72_spill] sm:$0xff] %v5858_v46  ;;  %v5861_v35 = vsel %vm2637_vm5, %v2406_v18, -inf  ;;  %v2437_v45 = vsel %vm1669_vm4, %v5641_v7, -1e+30  ;;  %vm1797_vm7 = vcmp.gt.f32.partialorder %v7235_v61, 0.0  ;;  %v5865_v50 = vpop.permute.xlu0 %590  ;;  %v7238_v19 = vld [vmem:[#allocation8_spill] sm:$0xff] }
 0x206   : > { %v5868_v48 = vsel %vm2637_vm5, %v2390_v59, -inf  ;;  %v2518_v57 = vsel %vm1750_vm9, %v5701_v13, -1e+30  ;;  %v2499_v20 = vsel %vm1731_vm0, %v5256_v58, -1e+30  ;;  %vm1766_vm11 = vcmp.gt.f32.partialorder %v5377_v43, 0.0 }
 0x207   : > { %v7236_v25 = vmax.f32 %v5534_v49, %v5663_v23  ;;  %v5881_v18 = vsel %vm2637_vm5, %v2468_v31, -inf  ;;  %vm1859_vm2 = vcmp.gt.f32.partialorder %v5379_v41, 0.0  ;;  %v7237_v59 = vld [vmem:[#allocation49_spill] sm:$0xff]  ;;  %736 = vbcast.lane.b32.xlu0 %v7238_v19, 368  ;;  %v2764_v0 = vsel %vm2637_vm5, %v2437_v45, -inf }
 0x208   : > { %vm1828_vm10 = vcmp.gt.f32.partialorder %v7237_v59, 0.0  ;;  %v2565_v49 = vsel %vm1797_vm7, %v5641_v7, -1e+30  ;;  %v7239_v23 = vld [vmem:[#allocation9_spill] sm:$0xff]  ;;  %v5896_v41 = vsel %vm2637_vm5, %v2518_v57, -inf  ;;  %v2908_v31 = vsel %vm2637_vm5, %v2499_v20, -inf  ;;  %v5907_v46 = vpop.permute.xlu1 %1126 }
 0x209   : > { %v5878_v22 = vmax.f32 %v7236_v25, %v3167_v10  ;;  %1272 = vbcast.lane.b32.xlu1 %v7239_v23, 368  ;;  %v2534_v61 = vsel %vm1766_vm11, %v5701_v13, -1e+30  ;;  %v5900_v25 = vpop.permute.xlu0 %787  ;;  %v2627_v45 = vsel %vm1859_vm2, %v5256_v58, -1e+30  ;;  %v7240_v43 = vld [vmem:[#allocation33_spill] sm:$0xff]  ;;  %v7241_v57 = vmax.f32 %v5572_v27, %v5708_v5 }
 0x20a   : > { %v2596_v3 = vsel %vm1828_vm10, %v5267_v15, -1e+30  ;;  %vm1685_vm15 = vcmp.gt.f32.partialorder %v7240_v43, 0.0  ;;  %v3060_v20 = vsel %vm2637_vm5, %v2565_v49, -inf  ;;  %vm1654_vm3 = vcmp.gt.f32.partialorder %v7242_v11, 0.0  ;;  %v7243_v23 = vld [vmem:[#allocation54_spill] sm:$0xff] }
 0x20b   : > { %v5912_v10 = vmax.f32 %v7241_v57, %v2764_v0  ;;  %vm1782_vm6 = vcmp.gt.f32.partialorder %v7243_v23, 0.0  ;;  %996 = vbcast.lane.b32.xlu0 %v4444_v62, 352  ;;  %v7244_v43 = vmax.f32 %v5599_v53, %v5730_v29  ;;  %v5926_v27 = vsel %vm2637_vm5, %v2534_v61, -inf  ;;  %v7245_v5 = vld [vmem:[#allocation23_spill] sm:$0xff]  ;;  %v7246_v23 = vld [vmem:[#allocation24_spill] sm:$0xff] }
 0x20c   : > { %vm1716_vm8 = vcmp.gt.f32.partialorder %v7245_v5, 0.0  ;;  %v3204_v11 = vsel %vm2637_vm5, %v2627_v45, -inf  ;;  %v5932_v0 = vsel %vm2637_vm5, %v2596_v3, -inf  ;;  %v2453_v49 = vsel %vm1685_vm15, %v5641_v7, -1e+30  ;;  %v5946_v45 = vpop.permute.xlu1 %1323  ;;  %v7250_v59 = vld [vmem:[#allocation31_spill] sm:$0xff] }
 0x20d   : > { %v5923_v58 = vmax.f32 %v7244_v43, %v2908_v31  ;;  %1532 = vbcast.lane.b32.xlu1 %v7058_v36, 352  ;;  %vm1844_vm13 = vcmp.gt.f32.partialorder %v7246_v23, 0.0  ;;  %v5936_v57 = vpop.permute.xlu0 %1047  ;;  %v7247_v53 = vmax.f32 %v5609_v39, %v5743_v52  ;;  %v2422_v31 = vsel %vm1654_vm3, %v5701_v13, -1e+30  ;;  %v7248_v43 = vld [vmem:[#allocation19_spill] sm:$0xff]  ;;  %v7249_v23 = vld [vmem:[#allocation20_spill] sm:$0xff] }
 0x20e   : > { %v2550_v61 = vsel %vm1782_vm6, %v5701_v13, -1e+30  ;;  %vm1639_vm14 = vcmp.gt.f32.partialorder %v7248_v43, 0.0  ;;  %v2484_v5 = vsel %vm1716_vm8, %v5267_v15, -1e+30  ;;  %vm1623_vm1 = vcmp.gt.f32.partialorder %v7249_v23, 0.0 }
 0x20f   : > { %v5941_v29 = vmax.f32 %v7247_v53, %v3060_v20  ;;  %vm1701_vm12 = vcmp.gt.f32.partialorder %v7250_v59, 0.0  ;;  %1402 = vbcast.lane.b32.xlu0 %v4417_v55, 360  ;;  %v7251_v39 = vmax.f32 %v5626_v40, %v5780_v44  ;;  %v2801_v53 = vsel %vm2637_vm5, %v2453_v49, -inf  ;;  %v7252_v3 = vld [vmem:[#allocation41_spill] sm:$0xff]  ;;  %v7258_v36 = vld [vmem:[#allocation6_spill] sm:$0xff] }
 0x210   : > { %v2612_v43 = vsel %vm1844_vm13, %v5267_v15, -1e+30  ;;  %v5965_v23 = vsel %vm2637_vm5, %v2422_v31, -inf  ;;  %v5968_v59 = vsel %vm2637_vm5, %v2550_v61, -inf  ;;  %vm1813_vm4 = vcmp.gt.f32.partialorder %v7252_v3, 0.0  ;;  %v5980_v31 = vpop.permute.xlu1 %1583  ;;  %v7256_v55 = vld [vmem:[#allocation25_spill] sm:$0xff] }
 0x211   : > { %v5957_v52 = vmax.f32 %v7251_v39, %v3204_v11  ;;  %673 = vbcast.lane.b32.xlu1 %v4323_v17, 376  ;;  %v2407_v40 = vsel %vm1639_vm14, %v5799_v6, -1e+30  ;;  %v5972_v44 = vpop.permute.xlu0 %1193  ;;  %v5975_v11 = vsel %vm2637_vm5, %v2484_v5, -inf  ;;  %v2391_v49 = vsel %vm1623_vm1, %v5799_v6, -1e+30 }
 0x212   : > { %v2469_v39 = vsel %vm1701_vm12, %v5641_v7, -1e+30  ;;  %v7253_v17 = vld [vmem:[#allocation62_spill] sm:$0xff]  ;;  %7254 = vst [vmem:[#allocation73_spill] sm:$0xff] %v5980_v31  ;;  %v7255_v61 = vmax.f32 %v5649_v28, %v5806_v12  ;;  %v5988_v3 = vsel %vm2637_vm5, %v2612_v43, -inf  ;;  %vm1751_vm0 = vcmp.gt.f32.partialorder %v7256_v55, 0.0 }
 0x213   : > { %vm1670_vm9 = vcmp.gt.f32.partialorder %v7253_v17, 0.0  ;;  %v7257_v5 = vld [vmem:[#allocation63_spill] sm:$0xff]  ;;  %606 = vbcast.lane.b32.xlu0 %v7258_v36, 376  ;;  %v2581_v31 = vsel %vm1813_vm4, %v5641_v7, -1e+30  ;;  %v2694_v12 = vsel %vm2637_vm5, %v2407_v40, -inf }
 0x214   : > { %v5985_v20 = vmax.f32 %v7255_v61, %v2801_v53  ;;  %vm1732_vm7 = vcmp.gt.f32.partialorder %v7257_v5, 0.0  ;;  %v2657_v55 = vsel %vm2637_vm5, %v2391_v49, -inf  ;;  %v2838_v53 = vsel %vm2637_vm5, %v2469_v39, -inf  ;;  %v7260_v17 = vld [vmem:[#allocation50_spill] sm:$0xff]  ;;  %v6012_v62 = vpop.permute.xlu1 %854 }
 0x215   : > { %933 = vbcast.lane.b32.xlu1 %v7079_v8, 360  ;;  %v2438_v36 = vsel %vm1670_vm9, %v5701_v13, -1e+30  ;;  %v6005_v43 = vpop.permute.xlu0 %1453  ;;  %v2519_v5 = vsel %vm1751_vm0, %v5799_v6, -1e+30  ;;  %vm1798_vm11 = vcmp.gt.f32.partialorder %v7260_v17, 0.0  ;;  %v7262_v49 = vmax.f32 %v5719_v33, %v5861_v35 }
 0x216   : > { %7259 = vst [vmem:[#allocation74_spill] sm:$0xff] %v6005_v43  ;;  %v2500_v40 = vsel %vm1732_vm7, %v5267_v15, -1e+30  ;;  %v6015_v28 = vsel %vm2637_vm5, %v2581_v31, -inf  ;;  %v7263_v8 = vld [vmem:[#allocation51_spill] sm:$0xff]  ;;  %v7264_v43 = vld [vmem:[#allocation64_spill] sm:$0xff]  ;;  %v7265_v61 = vmax.f32 %v5727_v32, %v5868_v48  ;;  %v7266_v31 = vmax.f32 %v5738_v56, %v5881_v18 }
 0x217   : > { %7261 = vst [vmem:[#allocation75_spill] sm:$0xff] %v6015_v28  ;;  %v6020_v39 = vmax.f32 %v7262_v49, %v2694_v12  ;;  %vm1767_vm2 = vcmp.gt.f32.partialorder %v7263_v8, 0.0  ;;  %vm1860_vm10 = vcmp.gt.f32.partialorder %v7264_v43, 0.0  ;;  %803 = vbcast.lane.b32.xlu0 %v4389_v42, 368  ;;  %v6036_v33 = vsel %vm2637_vm5, %v2438_v36, -inf  ;;  %v7267_v35 = vld [vmem:[#allocation52_spill] sm:$0xff] }
 0x218   : > { %v6028_v17 = vmax.f32 %v7265_v61, %v2657_v55  ;;  %v6033_v28 = vmax.f32 %v7266_v31, %v2838_v53  ;;  %vm1829_vm15 = vcmp.gt.f32.partialorder %v7267_v35, 0.0  ;;  %v2953_v8 = vsel %vm2637_vm5, %v2519_v5, -inf  ;;  %v7268_v48 = vld [vmem:[#allocation65_spill] sm:$0xff] }
 0x219   : > { %1142 = vbcast.lane.b32.xlu1 %v4347_v26, 376  ;;  %v6042_v12 = vsel %vm2637_vm5, %v2500_v40, -inf  ;;  %v2566_v32 = vsel %vm1798_vm11, %v5701_v13, -1e+30  ;;  %vm1686_vm3 = vcmp.gt.f32.partialorder %v7268_v48, 0.0  ;;  %v6046_v55 = vpop.permute.xlu0 %724  ;;  %vm1655_vm6 = vcmp.gt.f32.partialorder %v5755_v14, 0.0  ;;  %v6052_v26 = vpop.permute.xlu1 %1260 }
 0x21a   : > { %v2535_v56 = vsel %vm1767_vm2, %v5799_v6, -1e+30  ;;  %v2628_v18 = vsel %vm1860_vm10, %v5267_v15, -1e+30  ;;  %vm1783_vm8 = vcmp.gt.f32.partialorder %v5762_v24, 0.0  ;;  %v2767_v53 = vmax.f32 %v5912_v10, %v6036_v33  ;;  %v7270_v40 = vld [vmem:[#allocation10_spill] sm:$0xff] }
 0x21b   : > { %v2597_v36 = vsel %vm1829_vm15, %v5641_v7, -1e+30  ;;  %vm1717_vm13 = vcmp.gt.f32.partialorder %v5787_v16, 0.0  ;;  %vm1640_vm14 = vcmp.gt.f32.partialorder %v5833_v47, 0.0  ;;  %1063 = vbcast.lane.b32.xlu0 %v4461_v1, 352  ;;  %v7269_v43 = vmax.f32 %v5750_v9, %v5896_v41 }
 0x21c   : > { %v6068_v24 = vsel %vm2637_vm5, %v2566_v32, -inf  ;;  %v2454_v5 = vsel %vm1686_vm3, %v5701_v13, -1e+30  ;;  %v2990_v16 = vsel %vm2637_vm5, %v2535_v56, -inf  ;;  %v6074_v47 = vsel %vm2637_vm5, %v2628_v18, -inf }
 0x21d   : > { %v6063_v61 = vmax.f32 %v7269_v43, %v2953_v8  ;;  %1339 = vbcast.lane.b32.xlu1 %v7270_v40, 368  ;;  %v2423_v49 = vsel %vm1655_vm6, %v5799_v6, -1e+30  ;;  %v2551_v9 = vsel %vm1783_vm8, %v5799_v6, -1e+30  ;;  %v6078_v41 = vpop.permute.xlu0 %984  ;;  %v3134_v31 = vsel %vm2637_vm5, %v2597_v36, -inf  ;;  %v6084_v48 = vpop.permute.xlu1 %1520 }
 0x21e   : > { %v2485_v35 = vsel %vm1717_vm13, %v5641_v7, -1e+30  ;;  %v7271_v8 = vld [vmem:[#allocation68_spill] sm:$0xff]  ;;  %vm1624_vm1 = vcmp.gt.f32.partialorder %v5865_v50, 0.0  ;;  %v6089_v18 = vsel %vm2637_vm5, %v2454_v5, -inf  ;;  %vm1845_vm12 = vcmp.gt.f32.partialorder %v5801_v38, 0.0 }
 0x21f   : > { %v2408_v32 = vsel %vm1640_vm14, %v7271_v8, -1e+30  ;;  %vm1702_vm4 = vcmp.gt.f32.partialorder %v5873_v21, 0.0  ;;  %1209 = vbcast.lane.b32.xlu0 %v4358_v30, 376  ;;  %v7272_v36 = vmax.f32 %v5777_v34, %v5926_v27  ;;  %v3207_v50 = vmax.f32 %v5957_v52, %v6074_v47 }
 0x220   : > { %v2731_v14 = vsel %vm2637_vm5, %v2423_v49, -inf  ;;  %v3027_v56 = vsel %vm2637_vm5, %v2551_v9, -inf  ;;  %v7273_v38 = vmax.f32 %v5814_v54, %v5932_v0  ;;  %v2875_v30 = vsel %vm2637_vm5, %v2485_v35, -inf }
 0x221   : > { %v6097_v43 = vmax.f32 %v7272_v36, %v2990_v16  ;;  %1599 = vbcast.lane.b32.xlu1 %v4470_v2, 352  ;;  %v2696_v34 = vsel %vm2637_vm5, %v2408_v32, -inf  ;;  %v2392_v27 = vsel %vm1624_vm1, %v7271_v8, -1e+30  ;;  %v6112_v5 = vpop.permute.xlu0 %1390  ;;  %v2804_v16 = vmax.f32 %v5985_v20, %v6089_v18  ;;  %v662_v54 = vpop.permute.xlu1 %661 }
 0x222   : > { %v6107_v21 = vmax.f32 %v7273_v38, %v3134_v31  ;;  %v2613_v49 = vsel %vm1845_vm12, %v5641_v7, -1e+30  ;;  %v2470_v9 = vsel %vm1702_vm4, %v5701_v13, -1e+30  ;;  %vm1671_vm9 = vcmp.gt.f32.partialorder %v5900_v25, 0.0 }
 0x223   : > { %v7274_v0 = vmax.f32 %v5838_v63, %v5965_v23  ;;  %v7275_v35 = vmax.f32 %v5847_v37, %v5968_v59  ;;  %vm1752_vm0 = vcmp.gt.f32.partialorder %v5907_v46, 0.0  ;;  %1469 = vbcast.lane.b32.xlu0 %v4436_v60, 360  ;;  %vm1641_vm7 = vcmp.gt.f32.partialorder %v662_v54, 0.0  ;;  %v7277_v23 = vld [vmem:[#allocation70_spill] sm:$0xff] }
 0x224   : > { %v7276_v36 = vmax.f32 %v5852_v4, %v5975_v11  ;;  %v2697_v38 = vmax.f32 %v6020_v39, %v2696_v34  ;;  %v2659_v63 = vsel %vm2637_vm5, %v2392_v27, -inf  ;;  %v6141_v37 = vsel %vm2637_vm5, %v2613_v49, -inf }
 0x225   : > { %v6122_v31 = vmax.f32 %v7274_v0, %v2731_v14  ;;  %v6127_v32 = vmax.f32 %v7275_v35, %v3027_v56  ;;  %v2409_v14 = vsel %vm1641_vm7, %v7277_v23, -1e+30  ;;  %870 = vbcast.lane.b32.xlu1 %v4407_v51, 368  ;;  %v2840_v46 = vsel %vm2637_vm5, %v2470_v9, -inf  ;;  %v595_v4 = vpop.permute.xlu0 %594  ;;  %v7278_v0 = vld [vmem:[#allocation9_spill] sm:$0xff] }
 0x226   : > { %v6134_v25 = vmax.f32 %v7276_v36, %v2875_v30  ;;  %v2439_v59 = vsel %vm1671_vm9, %v5799_v6, -1e+30  ;;  %v2698_v56 = vsel %vm2637_vm5, %v2409_v14, -inf  ;;  %v2520_v11 = vsel %vm1752_vm0, %v7271_v8, -1e+30  ;;  %v922_v30 = vpop.permute.xlu1 %921 }
 0x227   : > { %vm1733_vm11 = vcmp.gt.f32.partialorder %v5936_v57, 0.0  ;;  %v6148_v39 = vmax.f32 %v2697_v38, %v2698_v56  ;;  %vm1625_vm2 = vcmp.gt.f32.partialorder %v595_v4, 0.0  ;;  %v2660_v34 = vmax.f32 %v6028_v17, %v2659_v63  ;;  %740 = vbcast.lane.b32.xlu0 %v7238_v19, 376  ;;  %v7280_v56 = vld [vmem:[#allocation13_spill] sm:$0xff] }
 0x228   : > { %vm1799_vm10 = vcmp.gt.f32.partialorder %v5946_v45, 0.0  ;;  %v2393_v27 = vsel %vm1625_vm2, %v7277_v23, -1e+30  ;;  %vm1703_vm15 = vcmp.gt.f32.partialorder %v922_v30, 0.0  ;;  %v2841_v49 = vmax.f32 %v6033_v28, %v2840_v46  ;;  %v7279_v46 = vld [vmem:[#allocation73_spill] sm:$0xff] }
 0x229   : > { %v2768_v9 = vsel %vm2637_vm5, %v2439_v59, -inf  ;;  %v2661_v54 = vsel %vm2637_vm5, %v2393_v27, -inf  ;;  %v2471_v57 = vsel %vm1703_vm15, %v5799_v6, -1e+30  ;;  %1276 = vbcast.lane.b32.xlu1 %v7278_v0, 376  ;;  %v2955_v35 = vsel %vm2637_vm5, %v2520_v11, -inf  ;;  %v792_v19 = vpop.permute.xlu0 %791 }
 0x22a   : > { %v2501_v17 = vsel %vm1733_vm11, %v5641_v7, -1e+30  ;;  %v6161_v45 = vmax.f32 %v2660_v34, %v2661_v54  ;;  %v2842_v36 = vsel %vm2637_vm5, %v2471_v57, -inf  ;;  %v2567_v38 = vsel %vm1799_vm10, %v5799_v6, -1e+30  ;;  %v1131_v63 = vpop.permute.xlu1 %1130  ;;  %v7281_v34 = vld [vmem:[#allocation14_spill] sm:$0xff] }
 0x22b   : > { %vm1768_vm3 = vcmp.gt.f32.partialorder %v5972_v44, 0.0  ;;  %v6166_v28 = vmax.f32 %v2841_v49, %v2842_v36  ;;  %vm1672_vm6 = vcmp.gt.f32.partialorder %v792_v19, 0.0  ;;  %v6171_v14 = vmax.f32 %v2767_v53, %v2768_v9  ;;  %1000 = vbcast.lane.b32.xlu0 %v7280_v56, 360  ;;  %v7282_v9 = vld [vmem:[#allocation74_spill] sm:$0xff]  ;;  %v7284_v36 = vld [vmem:[#allocation11_spill] sm:$0xff] }
 0x22c   : > { %vm1861_vm8 = vcmp.gt.f32.partialorder %v7279_v46, 0.0  ;;  %v2440_v59 = vsel %vm1672_vm6, %v7271_v8, -1e+30  ;;  %vm1753_vm13 = vcmp.gt.f32.partialorder %v1131_v63, 0.0  ;;  %v2956_v4 = vmax.f32 %v6063_v61, %v2955_v35  ;;  %v7285_v19 = vld [vmem:[#allocation71_spill] sm:$0xff] }
 0x22d   : > { %v2912_v44 = vsel %vm2637_vm5, %v2501_v17, -inf  ;;  %v6179_v11 = vsel %vm2637_vm5, %v2440_v59, -inf  ;;  %v2521_v30 = vsel %vm1753_vm13, %v7277_v23, -1e+30  ;;  %1536 = vbcast.lane.b32.xlu1 %v7281_v34, 360  ;;  %v3064_v10 = vsel %vm2637_vm5, %v2567_v38, -inf  ;;  %v1052_v49 = vpop.permute.xlu0 %1051 }
 0x22e   : > { %v2536_v33 = vsel %vm1768_vm3, %v7271_v8, -1e+30  ;;  %v2771_v53 = vmax.f32 %v6171_v14, %v6179_v11  ;;  %v2957_v27 = vsel %vm2637_vm5, %v2521_v30, -inf  ;;  %v2629_v61 = vsel %vm1861_vm8, %v5641_v7, -1e+30  ;;  %v1328_v57 = vpop.permute.xlu1 %1327 }
 0x22f   : > { %vm1830_vm14 = vcmp.gt.f32.partialorder %v7282_v9, 0.0  ;;  %v6190_v54 = vmax.f32 %v2956_v4, %v2957_v27  ;;  %vm1734_vm1 = vcmp.gt.f32.partialorder %v1052_v49, 0.0  ;;  %v7283_v0 = vmax.f32 %v5923_v58, %v6042_v12  ;;  %1406 = vbcast.lane.b32.xlu0 %v7284_v36, 368 }
 0x230   : > { %vm1687_vm12 = vcmp.gt.f32.partialorder %v6012_v62, 0.0  ;;  %v2502_v17 = vsel %vm1734_vm1, %v5701_v13, -1e+30  ;;  %vm1800_vm4 = vcmp.gt.f32.partialorder %v1328_v57, 0.0  ;;  %vm1814_vm9 = vcmp.gt.f32.partialorder %v7285_v19, 0.0  ;;  %v7287_v62 = vld [vmem:[#allocation12_spill] sm:$0xff] }
 0x231   : > { %v6195_v35 = vmax.f32 %v7283_v0, %v2912_v44  ;;  %v7286_v38 = vmax.f32 %v5941_v29, %v6068_v24  ;;  %v2992_v46 = vsel %vm2637_vm5, %v2536_v33, -inf  ;;  %v6208_v58 = vsel %vm2637_vm5, %v2502_v17, -inf  ;;  %937 = vbcast.lane.b32.xlu1 %v7287_v62, 368  ;;  %v1198_v44 = vpop.permute.xlu0 %1197 }
 0x232   : > { %v2568_v12 = vsel %vm1800_vm4, %v7271_v8, -1e+30  ;;  %v3208_v59 = vsel %vm2637_vm5, %v2629_v61, -inf  ;;  %v2598_v4 = vsel %vm1830_vm14, %v5701_v13, -1e+30  ;;  %vm1656_vm0 = vcmp.gt.f32.partialorder %v6046_v55, 0.0  ;;  %v1588_v33 = vpop.permute.xlu1 %1587 }
 0x233   : > { %v6204_v63 = vmax.f32 %v7286_v38, %v3064_v10  ;;  %v2915_v29 = vmax.f32 %v6195_v35, %v6208_v58  ;;  %v6219_v24 = vsel %vm2637_vm5, %v2568_v12, -inf  ;;  %v2455_v30 = vsel %vm1687_vm12, %v5799_v6, -1e+30  ;;  %807 = vbcast.lane.b32.xlu0 %v4389_v42, 376 }
 0x234   : > { %vm1769_vm7 = vcmp.gt.f32.partialorder %v1198_v44, 0.0  ;;  %v2993_v27 = vmax.f32 %v6097_v43, %v2992_v46  ;;  %vm1784_vm11 = vcmp.gt.f32.partialorder %v6052_v26, 0.0  ;;  %vm1862_vm2 = vcmp.gt.f32.partialorder %v1588_v33, 0.0 }
 0x235   : > { %v3067_v10 = vmax.f32 %v6204_v63, %v6219_v24  ;;  %v2537_v49 = vsel %vm1769_vm7, %v7277_v23, -1e+30  ;;  %v6232_v61 = vmax.f32 %v3207_v50, %v3208_v59  ;;  %v3136_v55 = vsel %vm2637_vm5, %v2598_v4, -inf  ;;  %1343 = vbcast.lane.b32.xlu1 %v7270_v40, 376  ;;  %v1458_v52 = vpop.permute.xlu0 %1457  ;;  %v7288_v50 = vld [vmem:[#allocation35_spill] sm:$0xff] }
 0x236   : > { %v2994_v9 = vsel %vm2637_vm5, %v2537_v49, -inf  ;;  %v2630_v57 = vsel %vm1862_vm2, %v5701_v13, -1e+30  ;;  %v2805_v26 = vsel %vm2637_vm5, %v2455_v30, -inf  ;;  %v2424_v43 = vsel %vm1656_vm0, %v7271_v8, -1e+30  ;;  %v859_v40 = vpop.permute.xlu1 %858 }
 0x237   : > { %v6240_v0 = vmax.f32 %v2993_v27, %v2994_v9  ;;  %v6243_v42 = vsel %vm2637_vm5, %v2630_v57, -inf  ;;  %v2552_v47 = vsel %vm1784_vm11, %v7271_v8, -1e+30  ;;  %vm1718_vm10 = vcmp.gt.f32.partialorder %v6078_v41, 0.0  ;;  %1067 = vbcast.lane.b32.xlu0 %v4461_v1, 360 }
 0x238   : > { %vm506_vm15 = vcmp.gt.f32.partialorder %v7288_v50, 0.0  ;;  %v3211_v17 = vmax.f32 %v6232_v61, %v6243_v42  ;;  %vm1831_vm3 = vcmp.gt.f32.partialorder %v1458_v52, 0.0  ;;  %v3137_v38 = vmax.f32 %v6107_v21, %v3136_v55 }
 0x239   : > { %vm1846_vm6 = vcmp.gt.f32.partialorder %v6084_v48, 0.0  ;;  %v2599_v46 = vsel %vm1831_vm3, %v5799_v6, -1e+30  ;;  %vm1688_vm8 = vcmp.gt.f32.partialorder %v859_v40, 0.0  ;;  %v6257_v12 = vmax.f32 %v2804_v16, %v2805_v26  ;;  %1603 = vbcast.lane.b32.xlu1 %v4470_v2, 360  ;;  %v729_v18 = vpop.permute.xlu0 %728 }
 0x23a   : > { %v2733_v59 = vsel %vm2637_vm5, %v2424_v43, -inf  ;;  %v3138_v4 = vsel %vm2637_vm5, %v2599_v46, -inf  ;;  %v2456_v44 = vsel %vm1688_vm8, %v7271_v8, -1e+30  ;;  %v3029_v48 = vsel %vm2637_vm5, %v2552_v47, -inf  ;;  %v1265_v27 = vpop.permute.xlu1 %1264 }
 0x23b   : > { %v2486_v21 = vsel %vm1718_vm10, %v5701_v13, -1e+30  ;;  %v6267_v30 = vmax.f32 %v3137_v38, %v3138_v4  ;;  %v6270_v20 = vsel %vm2637_vm5, %v2456_v44, -inf  ;;  %v2614_v16 = vsel %vm1846_vm6, %v5701_v13, -1e+30  ;;  %1473 = vbcast.lane.b32.xlu0 %v4436_v60, 368 }
 0x23c   : > { %vm1815_vm13 = vcmp.gt.f32.partialorder %v6112_v5, 0.0  ;;  %v2808_v33 = vmax.f32 %v6257_v12, %v6270_v20  ;;  %vm1657_vm14 = vcmp.gt.f32.partialorder %v729_v18, 0.0  ;;  %v2582_v41 = vsel %vm1814_vm9, %v5701_v13, -1e+30  ;;  %v7290_v4 = vld [vmem:[#allocation75_spill] sm:$0xff]  ;;  %v7295_v20 = vld [vmem:[#allocation32_spill] sm:$0xff] }
 0x23d   : > { %v2734_v49 = vmax.f32 %v6122_v31, %v2733_v59  ;;  %v2425_v55 = vsel %vm1657_vm14, %v7277_v23, -1e+30  ;;  %vm1785_vm1 = vcmp.gt.f32.partialorder %v1265_v27, 0.0  ;;  %v3030_v9 = vmax.f32 %v6127_v32, %v3029_v48  ;;  %1004 = vbcast.lane.b32.xlu1 %v7280_v56, 368  ;;  %v989_v47 = vpop.permute.xlu0 %988  ;;  %v7291_v44 = vld [vmem:[#allocation43_spill] sm:$0xff]  ;;  %v7292_v48 = vld [vmem:[#allocation72_spill] sm:$0xff] }
 0x23e   : > { %v2877_v5 = vsel %vm2637_vm5, %v2486_v21, -inf  ;;  %v2735_v57 = vsel %vm2637_vm5, %v2425_v55, -inf  ;;  %v2553_v26 = vsel %vm1785_vm1, %v7277_v23, -1e+30  ;;  %v3173_v19 = vsel %vm2637_vm5, %v2614_v16, -inf  ;;  %v1525_v59 = vpop.permute.xlu1 %1524  ;;  %v7294_v55 = vld [vmem:[#allocation69_spill] sm:$0xff] }
 0x23f   : > { %v2583_v43 = vsel %vm1815_vm13, %v5799_v6, -1e+30  ;;  %v6289_v31 = vmax.f32 %v2734_v49, %v2735_v57  ;;  %v3031_v52 = vsel %vm2637_vm5, %v2553_v26, -inf  ;;  %v7289_v32 = vmax.f32 %v5878_v22, %v5988_v3  ;;  %874 = vbcast.lane.b32.xlu0 %v4407_v51, 376 }
 0x240   : > { %v3099_v38 = vsel %vm2637_vm5, %v2582_v41, -inf  ;;  %v6297_v46 = vmax.f32 %v3030_v9, %v3031_v52  ;;  %vm1719_vm12 = vcmp.gt.f32.partialorder %v989_v47, 0.0  ;;  %v7293_v21 = vmax.f32 %v7291_v44, %v7292_v48 }
 0x241   : > { %v3172_v40 = vmax.f32 %v7289_v32, %v6141_v37  ;;  %v2878_v16 = vmax.f32 %v6134_v25, %v2877_v5  ;;  %v2487_v27 = vsel %vm1719_vm12, %v5799_v6, -1e+30  ;;  %vm1847_vm4 = vcmp.gt.f32.partialorder %v1525_v59, 0.0  ;;  %1540 = vbcast.lane.b32.xlu1 %v7281_v34, 368  ;;  %v1395_v5 = vpop.permute.xlu0 %1394 }
 0x242   : > { %v3098_v18 = vmax.f32 %v7293_v21, %v7290_v4  ;;  %v3101_v3 = vsel %vm2637_vm5, %v2583_v43, -inf  ;;  %v2879_v37 = vsel %vm2637_vm5, %v2487_v27, -inf  ;;  %v2615_v41 = vsel %vm1847_vm4, %v5799_v6, -1e+30  ;;  %v666_v26 = vpop.permute.xlu1 %665 }
 0x243   : > { %v3174_v22 = vmax.f32 %v3172_v40, %v3173_v19  ;;  %v6314_v25 = vsel %vm506_vm15, %v7288_v50, %v7294_v55  ;;  %v6316_v9 = vmax.f32 %v2878_v16, %v2879_v37  ;;  %v3175_v51 = vsel %vm2637_vm5, %v2615_v41, -inf  ;;  %1410 = vbcast.lane.b32.xlu0 %v7284_v36, 376 }
 0x244   : > { %v3100_v49 = vmax.f32 %v3098_v18, %v3099_v38  ;;  %vm1816_vm9 = vcmp.gt.f32.partialorder %v1395_v5, 0.0  ;;  %vm1642_vm0 = vcmp.gt.f32.partialorder %v666_v26, 0.0 }
 0x245   : > { %v6319_v57 = vmax.f32 %v3174_v22, %v3175_v51  ;;  %v2584_v43 = vsel %vm1816_vm9, %v7271_v8, -1e+30  ;;  %v2410_v50 = vsel %vm1642_vm0, %v6314_v25, -1e+30  ;;  %1071 = vbcast.lane.b32.xlu1 %v4461_v1, 368  ;;  %v599_v40 = vpop.permute.xlu0 %598  ;;  %vm507_vm9 = vcmp.gt.f32.partialorder %v7295_v20, 0.0 }
 0x246   : > { %v6321_v19 = vmax.f32 %v3100_v49, %v3101_v3  ;;  %v6326_v52 = vsel %vm2637_vm5, %v2584_v43, -inf  ;;  %v6333_v32 = vsel %vm2637_vm5, %v2410_v50, -inf  ;;  %vm1626_vm7 = vcmp.gt.f32.partialorder %v599_v40, 0.0  ;;  %v926_v36 = vpop.permute.xlu1 %925 }
 0x247   : > { %v2701_v38 = vmax.f32 %v6148_v39, %v6333_v32  ;;  %v2394_v59 = vsel %vm1626_vm7, %v6314_v25, -1e+30  ;;  %941 = vbcast.lane.b32.xlu0 %v7287_v62, 376  ;;  %vm1704_vm11 = vcmp.gt.f32.partialorder %v926_v36, 0.0  ;;  %vm3273_vm0 = vcmask 130048  }
 0x248   : > { %v3104_v47 = vmax.f32 %v6321_v19, %v6326_v52  ;;  %v6340_v4 = vsel %vm2637_vm5, %v2394_v59, -inf  ;;  %v2472_v44 = vsel %vm1704_vm11, %v7271_v8, -1e+30 }
 0x249   : > { %1607 = vbcast.lane.b32.xlu1 %v4470_v2, 368  ;;  %v2664_v48 = vmax.f32 %v6161_v45, %v6340_v4  ;;  %v6347_v21 = vsel %vm2637_vm5, %v2472_v44, -inf  ;;  %v796_v18 = vpop.permute.xlu0 %795 }
 0x24a   : > { %v2845_v16 = vmax.f32 %v6166_v28, %v6347_v21  ;;  %vm1673_vm2 = vcmp.gt.f32.partialorder %v796_v18, 0.0  ;;  %v1135_v62 = vpop.permute.xlu1 %1134 }
 0x24b   : > { %v2441_v27 = vsel %vm1673_vm2, %v7277_v23, -1e+30  ;;  %1477 = vbcast.lane.b32.xlu0 %v4436_v60, 376  ;;  %vm1754_vm10 = vcmp.gt.f32.partialorder %v1135_v62, 0.0 }
 0x24c   : > { %v2772_v22 = vsel %vm2637_vm5, %v2441_v27, -inf  ;;  %v2522_v3 = vsel %vm1754_vm10, %v6314_v25, -1e+30 }
 0x24d   : > { %1544 = vbcast.lane.b32.xlu1 %v7281_v34, 376  ;;  %v6359_v37 = vmax.f32 %v2771_v53, %v2772_v22  ;;  %v6362_v41 = vsel %vm2637_vm5, %v2522_v3, -inf  ;;  %v1056_v49 = vpop.permute.xlu0 %1055 }
 0x24e   : > { %v2960_v55 = vmax.f32 %v6190_v54, %v6362_v41  ;;  %vm1735_vm15 = vcmp.gt.f32.partialorder %v1056_v49, 0.0  ;;  %v1332_v60 = vpop.permute.xlu1 %1331 }
 0x24f   : > { %v2503_v51 = vsel %vm1735_vm15, %v5799_v6, -1e+30  ;;  %1008 = vbcast.lane.b32.xlu0 %v7280_v56, 376  ;;  %vm1801_vm3 = vcmp.gt.f32.partialorder %v1332_v60, 0.0  ;;  %v6424_v60 = vld [vmem:[%s4282_s24] sm:$0xff]  }
 0x250   : > { %v2916_v34 = vsel %vm2637_vm5, %v2503_v51, -inf  ;;  %v2569_v14 = vsel %vm1801_vm3, %v7277_v23, -1e+30 }
 0x251   : > { %1611 = vbcast.lane.b32.xlu1 %v4470_v2, 376  ;;  %v6374_v11 = vmax.f32 %v2915_v29, %v2916_v34  ;;  %v3068_v53 = vsel %vm2637_vm5, %v2569_v14, -inf  ;;  %v1202_v5 = vpop.permute.xlu0 %1201  ;;  %v3711_v34 = vunpack.c.l.bf16 %v6424_v60 }
 0x252   : > { %v6380_v26 = vmax.f32 %v3067_v10, %v3068_v53  ;;  %vm1770_vm6 = vcmp.gt.f32.partialorder %v1202_v5, 0.0  ;;  %v1592_v56 = vpop.permute.xlu1 %1591 }
 0x253   : > { %v2538_v43 = vsel %vm1770_vm6, %v6314_v25, -1e+30  ;;  %1075 = vbcast.lane.b32.xlu0 %v4461_v1, 376  ;;  %vm1863_vm8 = vcmp.gt.f32.partialorder %v1592_v56, 0.0  ;;  %3876 = vmatprep.mubr.msk.f32.mxu1 %vm3273_vm0, %v3711_v34 }
 0x254   : > { %v6385_v2 = vsel %vm2637_vm5, %v2538_v43, -inf  ;;  %v2631_v35 = vsel %vm1863_vm8, %v5799_v6, -1e+30 }
 0x255   : > { %v2997_v58 = vmax.f32 %v6240_v0, %v6385_v2  ;;  %v3212_v29 = vsel %vm2637_vm5, %v2631_v35, -inf  ;;  %v1462_v63 = vpop.permute.xlu0 %1461 }
 0x256   : > { %v6394_v24 = vmax.f32 %v3211_v17, %v3212_v29  ;;  %vm1832_vm13 = vcmp.gt.f32.partialorder %v1462_v63, 0.0  ;;  %v863_v10 = vpop.permute.xlu1 %862 }
 0x257   : > { %v2600_v1 = vsel %vm1832_vm13, %v7271_v8, -1e+30  ;;  %vm1689_vm14 = vcmp.gt.f32.partialorder %v863_v10, 0.0 }
 0x258   : > { %v6398_v50 = vsel %vm2637_vm5, %v2600_v1, -inf  ;;  %v2457_v40 = vsel %vm1689_vm14, %v7277_v23, -1e+30 }
 0x259   : > { %v3141_v36 = vmax.f32 %v6267_v30, %v6398_v50  ;;  %v2809_v59 = vsel %vm2637_vm5, %v2457_v40, -inf  ;;  %v733_v44 = vpop.permute.xlu0 %732 }
 0x25a   : > { %v6407_v61 = vmax.f32 %v2808_v33, %v2809_v59  ;;  %vm1658_vm1 = vcmp.gt.f32.partialorder %v733_v44, 0.0  ;;  %v1269_v42 = vpop.permute.xlu1 %1268  ;;  %v523_v33 = vmul.f32 0.2, %v7295_v20 }
 0x25b   : > { %v2426_v17 = vsel %vm1658_vm1, %v6314_v25, -1e+30  ;;  %vm1786_vm12 = vcmp.gt.f32.partialorder %v1269_v42, 0.0 }
 0x25c   : > { %v6411_v18 = vsel %vm2637_vm5, %v2426_v17, -inf  ;;  %v2554_v62 = vsel %vm1786_vm12, %v6314_v25, -1e+30  ;;  %v6438_v35 = vsel %vm507_vm9, %v7295_v20, %v523_v33 }
 0x25d   : > { %v2738_v27 = vmax.f32 %v6289_v31, %v6411_v18  ;;  %v6417_v22 = vsel %vm2637_vm5, %v2554_v62, -inf  ;;  %v993_v12 = vpop.permute.xlu0 %992 }
 0x25e   : > { %v3034_v3 = vmax.f32 %v6297_v46, %v6417_v22  ;;  %vm1720_vm4 = vcmp.gt.f32.partialorder %v993_v12, 0.0  ;;  %v1529_v49 = vpop.permute.xlu1 %1528 }
 0x25f   : > { %v2488_v51 = vsel %vm1720_vm4, %v7271_v8, -1e+30  ;;  %vm1848_vm7 = vcmp.gt.f32.partialorder %v1529_v49, 0.0 }
 0x260   : > { %v6429_v14 = vsel %vm2637_vm5, %v2488_v51, -inf  ;;  %v2616_v53 = vsel %vm1848_vm7, %v7271_v8, -1e+30 }
 0x261   : > { %v2882_v5 = vmax.f32 %v6316_v9, %v6429_v14  ;;  %v6435_v56 = vsel %vm2637_vm5, %v2616_v53, -inf  ;;  %v1399_v43 = vpop.permute.xlu0 %1398 }
 0x262   : > { %v3178_v29 = vmax.f32 %v6319_v57, %v6435_v56  ;;  %vm1817_vm11 = vcmp.gt.f32.partialorder %v1399_v43, 0.0  ;;  %v670_v63 = vpop.permute.xlu1 %669 }
 0x263   : > { %v2585_v10 = vsel %vm1817_vm11, %v7277_v23, -1e+30  ;;  %vm1643_vm2 = vcmp.gt.f32.partialorder %v670_v63, 0.0 }
 0x264   : > { %v3105_v1 = vsel %vm2637_vm5, %v2585_v10, -inf  ;;  %v2411_v40 = vsel %vm1643_vm2, %v6438_v35, -1e+30 }
 0x265   : > { %v6449_v59 = vmax.f32 %v3104_v47, %v3105_v1  ;;  %v2702_v44 = vsel %vm2637_vm5, %v2411_v40, -inf  ;;  %v603_v42 = vpop.permute.xlu0 %602 }
 0x266   : > { %v6455_v17 = vmax.f32 %v2701_v38, %v2702_v44  ;;  %vm1627_vm10 = vcmp.gt.f32.partialorder %v603_v42, 0.0  ;;  %v930_v62 = vpop.permute.xlu1 %929 }
 0x267   : > { %v2395_v12 = vsel %vm1627_vm10, %v6438_v35, -1e+30  ;;  %vm1705_vm15 = vcmp.gt.f32.partialorder %v930_v62, 0.0 }
 0x268   : > { %v2665_v20 = vsel %vm2637_vm5, %v2395_v12, -inf  ;;  %v2473_v33 = vsel %vm1705_vm15, %v7277_v23, -1e+30 }
 0x269   : > { %v6463_v19 = vmax.f32 %v2664_v48, %v2665_v20  ;;  %v2846_v52 = vsel %vm2637_vm5, %v2473_v33, -inf  ;;  %v800_v47 = vpop.permute.xlu0 %799 }
 0x26a   : > { %v6469_v39 = vmax.f32 %v2845_v16, %v2846_v52  ;;  %vm1674_vm3 = vcmp.gt.f32.partialorder %v800_v47, 0.0  ;;  %v1139_v32 = vpop.permute.xlu1 %1138 }
 0x26b   : > { %v2442_v38 = vsel %vm1674_vm3, %v6314_v25, -1e+30  ;;  %vm1755_vm6 = vcmp.gt.f32.partialorder %v1139_v32, 0.0 }
 0x26c   : > { %v6473_v49 = vsel %vm2637_vm5, %v2442_v38, -inf  ;;  %v2523_v45 = vsel %vm1755_vm6, %v6438_v35, -1e+30 }
 0x26d   : > { %v2775_v4 = vmax.f32 %v6359_v37, %v6473_v49  ;;  %v2961_v48 = vsel %vm2637_vm5, %v2523_v45, -inf  ;;  %v1060_v51 = vpop.permute.xlu0 %1059 }
 0x26e   : > { %v6482_v28 = vmax.f32 %v2960_v55, %v2961_v48  ;;  %vm1736_vm8 = vcmp.gt.f32.partialorder %v1060_v51, 0.0  ;;  %v1336_v21 = vpop.permute.xlu1 %1335 }
 0x26f   : > { %v2504_v16 = vsel %vm1736_vm8, %v7271_v8, -1e+30  ;;  %vm1802_vm13 = vcmp.gt.f32.partialorder %v1336_v21, 0.0  ;;  %v7296_v21 = vld [vmem:[#allocation42_spill] sm:$0xff]  ;;  %vm3248_vm8 = vcmask 1041409  }
 0x270   : > { %v6486_v34 = vsel %vm2637_vm5, %v2504_v16, -inf  ;;  %v2570_v53 = vsel %vm1802_vm13, %v6314_v25, -1e+30  ;;  %v524_v30 = vmul.f32 0.2, %v7296_v21  ;;  %vm508_vm11 = vcmp.gt.f32.partialorder %v7296_v21, 0.0 }
 0x271   : > { %v2919_v43 = vmax.f32 %v6374_v11, %v6486_v34  ;;  %v6492_v63 = vsel %vm2637_vm5, %v2570_v53, -inf  ;;  %v1206_v10 = vpop.permute.xlu0 %1205 }
 0x272   : > { %v3071_v54 = vmax.f32 %v6380_v26, %v6492_v63  ;;  %vm1771_vm14 = vcmp.gt.f32.partialorder %v1206_v10, 0.0  ;;  %v1596_v41 = vpop.permute.xlu1 %1595  ;;  %v6541_v31 = vsel %vm508_vm11, %v7296_v21, %v524_v30  ;;  %vm3250_vm11 = vcmask 1042434  }
 0x273   : > { %v2539_v55 = vsel %vm1771_vm14, %v6438_v35, -1e+30  ;;  %vm1864_vm1 = vcmp.gt.f32.partialorder %v1596_v41, 0.0 }
 0x274   : > { %v2998_v1 = vsel %vm2637_vm5, %v2539_v55, -inf  ;;  %v2632_v40 = vsel %vm1864_vm1, %v7271_v8, -1e+30 }
 0x275   : > { %v6502_v44 = vmax.f32 %v2997_v58, %v2998_v1  ;;  %v6505_v42 = vsel %vm2637_vm5, %v2632_v40, -inf  ;;  %v1466_v62 = vpop.permute.xlu0 %1465 }
 0x276   : > { %v3215_v12 = vmax.f32 %v6394_v24, %v6505_v42  ;;  %vm1833_vm12 = vcmp.gt.f32.partialorder %v1466_v62, 0.0  ;;  %v867_v20 = vpop.permute.xlu1 %866 }
 0x277   : > { %v2601_v33 = vsel %vm1833_vm12, %v7277_v23, -1e+30  ;;  %vm1690_vm4 = vcmp.gt.f32.partialorder %v867_v20, 0.0 }
 0x278   : > { %v3142_v52 = vsel %vm2637_vm5, %v2601_v33, -inf  ;;  %v2458_v47 = vsel %vm1690_vm4, %v6314_v25, -1e+30 }
 0x279   : > { %v6515_v0 = vmax.f32 %v3141_v36, %v3142_v52  ;;  %v6518_v2 = vsel %vm2637_vm5, %v2458_v47, -inf  ;;  %v737_v58 = vpop.permute.xlu0 %736 }
 0x27a   : > { %v2812_v32 = vmax.f32 %v6407_v61, %v6518_v2  ;;  %vm1659_vm9 = vcmp.gt.f32.partialorder %v737_v58, 0.0 }
 0x27b   : > { %v1273_v38 = vpop.permute.xlu1 %1272  ;;  %v2427_v45 = vsel %vm1659_vm9, %v6438_v35, -1e+30 }
 0x27c   : > { %vm1787_vm7 = vcmp.gt.f32.partialorder %v1273_v38, 0.0  ;;  %v2739_v48 = vsel %vm2637_vm5, %v2427_v45, -inf }
 0x27d   : > { %v2555_v51 = vsel %vm1787_vm7, %v6438_v35, -1e+30  ;;  %v6529_v50 = vmax.f32 %v2738_v27, %v2739_v48  ;;  %v997_v16 = vpop.permute.xlu0 %996 }
 0x27e   : > { %v3035_v36 = vsel %vm2637_vm5, %v2555_v51, -inf  ;;  %vm1721_vm2 = vcmp.gt.f32.partialorder %v997_v16, 0.0 }
 0x27f   : > { %v6536_v53 = vmax.f32 %v3034_v3, %v3035_v36  ;;  %v1533_v10 = vpop.permute.xlu1 %1532  ;;  %v2489_v41 = vsel %vm1721_vm2, %v7277_v23, -1e+30 }
 0x280   : > { %v2883_v55 = vsel %vm2637_vm5, %v2489_v41, -inf  ;;  %vm1849_vm13 = vcmp.gt.f32.partialorder %v1533_v10, 0.0 }
 0x281   : > { %v6546_v18 = vmax.f32 %v2882_v5, %v2883_v55  ;;  %v1403_v27 = vpop.permute.xlu0 %1402 }
 0x282   : > { %vm1818_vm14 = vcmp.gt.f32.partialorder %v1403_v27, 0.0 }
 0x283   : > { %v674_v1 = vpop.permute.xlu1 %673 }
 0x284   : > { %vm1644_vm10 = vcmp.gt.f32.partialorder %v674_v1, 0.0 }
 0x285   : > { %v2412_v46 = vsel %vm1644_vm10, %v6541_v31, -1e+30  ;;  %v607_v3 = vpop.permute.xlu0 %606 }
 0x286   : > { %v2704_v22 = vsel %vm2637_vm5, %v2412_v46, -inf  ;;  %vm1628_vm15 = vcmp.gt.f32.partialorder %v607_v3, 0.0 }
 0x287   : > { %v2705_v40 = vmax.f32 %v6455_v17, %v2704_v22  ;;  %v934_v62 = vpop.permute.xlu1 %933  ;;  %v2396_v20 = vsel %vm1628_vm15, %v6541_v31, -1e+30 }
 0x288   : > { %v2667_v52 = vsel %vm2637_vm5, %v2396_v20, -inf  ;;  %vm1706_vm12 = vcmp.gt.f32.partialorder %v934_v62, 0.0 }
 0x289   : > { %v2706_v33 = vrot.slane %v2705_v40, 4  ;;  %v2668_v9 = vmax.f32 %v6463_v19, %v2667_v52  ;;  %v804_v14 = vpop.permute.xlu0 %803 }
 0x28a   : > { %vm1675_vm9 = vcmp.gt.f32.partialorder %v804_v14, 0.0 }
 0x28b   : > { %v2707_v5 = vmax.f32 %v2705_v40, %v2706_v33  ;;  %v1143_v47 = vpop.permute.xlu1 %1142  ;;  %v2669_v58 = vrot.slane %v2668_v9, 4  ;;  %v2443_v14 = vsel %vm1675_vm9, %v6438_v35, -1e+30 }
 0x28c   : > { %vm1756_vm3 = vcmp.gt.f32.partialorder %v1143_v47, 0.0 }
 0x28d   : > { %v2708_v38 = vrot.slane %v2707_v5, 2  ;;  %v2524_v45 = vsel %vm1756_vm3, %v6541_v31, -1e+30  ;;  %v2670_v48 = vmax.f32 %v2668_v9, %v2669_v58  ;;  %v6556_v51 = vpop.permute.xlu0 %1063 }
 0x28e   : > { %v2963_v17 = vsel %vm2637_vm5, %v2524_v45, -inf  ;;  %vm1737_vm2 = vcmp.gt.f32.partialorder %v6556_v51, 0.0 }
 0x28f   : > { %v2709_v21 = vmax.f32 %v2707_v5, %v2708_v38  ;;  %v2964_v30 = vmax.f32 %v6482_v28, %v2963_v17  ;;  %v1340_v36 = vpop.permute.xlu1 %1339  ;;  %v2671_v16 = vrot.slane %v2670_v48, 2  ;;  %v2505_v56 = vsel %vm1737_vm2, %v7277_v23, -1e+30 }
 0x290   : > { %vm1803_vm7 = vcmp.gt.f32.partialorder %v1340_v36, 0.0 }
 0x291   : > { %v2710_v41 = vrot.slane %v2709_v21, 1  ;;  %v2965_v19 = vrot.slane %v2964_v30, 4  ;;  %v2672_v55 = vmax.f32 %v2670_v48, %v2671_v16  ;;  %v1210_v1 = vpop.permute.xlu0 %1209  ;;  %v2571_v36 = vsel %vm1803_vm7, %v6438_v35, -1e+30 }
 0x292   : > { %vm1772_vm6 = vcmp.gt.f32.partialorder %v1210_v1, 0.0 }
 0x293   : > { %v2966_v46 = vmax.f32 %v2964_v30, %v2965_v19  ;;  %v6559_v22 = vpop.permute.xlu1 %1599  ;;  %v2711_v3 = vmax.f32 %v2709_v21, %v2710_v41  ;;  %v2673_v40 = vrot.slane %v2672_v55, 1  ;;  %v2540_v20 = vsel %vm1772_vm6, %v6541_v31, -1e+30 }
 0x294   : > { %v3000_v33 = vsel %vm2637_vm5, %v2540_v20, -inf  ;;  %v2617_v21 = vsel %vm1849_vm13, %v7277_v23, -1e+30  ;;  %v2586_v30 = vsel %vm1818_vm14, %v6314_v25, -1e+30  ;;  %vm1865_vm10 = vcmp.gt.f32.partialorder %v6559_v22, 0.0 }
 0x295   : > { %v2674_v52 = vmax.f32 %v2672_v55, %v2673_v40  ;;  %v2967_v9 = vrot.slane %v2966_v46, 2  ;;  %v3001_v28 = vmax.f32 %v6502_v44, %v3000_v33  ;;  %v6564_v5 = vpop.permute.xlu0 %1469  ;;  %v2474_v40 = vsel %vm1706_vm12, %v6314_v25, -1e+30 }
 0x296   : > { %vm1834_vm15 = vcmp.gt.f32.partialorder %v6564_v5, 0.0  ;;  %vm3252_vm12 = vcmask 1043459  }
 0x297   : > { %v6566_v47 = vpop.permute.xlu1 %870  ;;  %v6569_v58 = vsel %vm3248_vm8, %v2711_v3, %v2674_v52  ;;  %v3002_v38 = vrot.slane %v3001_v28, 4  ;;  %v2968_v45 = vmax.f32 %v2966_v46, %v2967_v9  ;;  %v3179_v9 = vsel %vm2637_vm5, %v2617_v21, -inf }
 0x298   : > { %vm1691_vm3 = vcmp.gt.f32.partialorder %v6566_v47, 0.0 }
 0x299   : > { %v3003_v48 = vmax.f32 %v3001_v28, %v3002_v38  ;;  %v741_v17 = vpop.permute.xlu0 %740  ;;  %v2969_v19 = vrot.slane %v2968_v45, 1  ;;  %v6586_v28 = vsel %vm2637_vm5, %v2586_v30, -inf  ;;  %v6589_v38 = vsel %vm2637_vm5, %v2474_v40, -inf }
 0x29a   : > { %vm1660_vm1 = vcmp.gt.f32.partialorder %v741_v17, 0.0  ;;  %v6599_v30 = vmax.f32 %v3178_v29, %v3179_v9  ;;  %v2849_v51 = vmax.f32 %v6469_v39, %v6589_v38  ;;  %v2459_v63 = vsel %vm1691_vm3, %v6438_v35, -1e+30 }
 0x29b   : > { %v1277_v16 = vpop.permute.xlu1 %1276  ;;  %v3004_v44 = vrot.slane %v3003_v48, 2  ;;  %v2428_v41 = vsel %vm1660_vm1, %v6541_v31, -1e+30 }
 0x29c   : > { %vm1788_vm4 = vcmp.gt.f32.partialorder %v1277_v16, 0.0  ;;  %v2741_v10 = vsel %vm2637_vm5, %v2428_v41, -inf  ;;  %v3072_v41 = vsel %vm2637_vm5, %v2571_v36, -inf }
 0x29d   : > { %v2556_v27 = vsel %vm1788_vm4, %v6541_v31, -1e+30  ;;  %v3005_v55 = vmax.f32 %v3003_v48, %v3004_v44  ;;  %v2742_v1 = vmax.f32 %v6529_v50, %v2741_v10  ;;  %v1001_v3 = vpop.permute.xlu0 %1000  ;;  %v2970_v48 = vmax.f32 %v2968_v45, %v2969_v19 }
 0x29e   : > { %v3037_v46 = vsel %vm2637_vm5, %v2556_v27, -inf  ;;  %v2776_v44 = vsel %vm2637_vm5, %v2443_v14, -inf  ;;  %v3108_v19 = vmax.f32 %v6449_v59, %v6586_v28  ;;  %v3073_v29 = vmax.f32 %v3071_v54, %v3072_v41 }
 0x29f   : > { %v3038_v62 = vmax.f32 %v6536_v53, %v3037_v46  ;;  %v6580_v20 = vpop.permute.xlu1 %1536  ;;  %v3006_v33 = vrot.slane %v3005_v55, 1  ;;  %v2743_v52 = vrot.slane %v2742_v1, 4  ;;  %v2777_v57 = vmax.f32 %v2775_v4, %v2776_v44 }
 0x2a0   : > { %v2633_v46 = vsel %vm1865_vm10, %v7277_v23, -1e+30  ;;  %vm1722_vm13 = vcmp.gt.f32.partialorder %v1001_v3, 0.0  ;;  %vm1850_vm14 = vcmp.gt.f32.partialorder %v6580_v20, 0.0 }
 0x2a1   : > { %v3039_v50 = vrot.slane %v3038_v62, 4  ;;  %v3007_v53 = vmax.f32 %v3005_v55, %v3006_v33  ;;  %v2744_v17 = vmax.f32 %v2742_v1, %v2743_v52  ;;  %v1407_v16 = vpop.permute.xlu0 %1406  ;;  %v3216_v44 = vsel %vm2637_vm5, %v2633_v46, -inf }
 0x2a2   : > { %vm1819_vm1 = vcmp.gt.f32.partialorder %v1407_v16, 0.0  ;;  %v2813_v16 = vsel %vm2637_vm5, %v2459_v63, -inf }
 0x2a3   : > { %v3040_v10 = vmax.f32 %v3038_v62, %v3039_v50  ;;  %v6594_v21 = vpop.permute.xlu1 %937  ;;  %v3262_v27 = vsel %vm3248_vm8, %v3007_v53, %v2970_v48  ;;  %v2745_v45 = vrot.slane %v2744_v17, 2  ;;  %v2602_v62 = vsel %vm1834_vm15, %v6314_v25, -1e+30 }
 0x2a4   : > { %v2920_v48 = vsel %vm2637_vm5, %v2505_v56, -inf  ;;  %v2490_v53 = vsel %vm1722_vm13, %v6314_v25, -1e+30  ;;  %v6630_v41 = vsel %vm2637_vm5, %v2602_v62, -inf  ;;  %vm1707_vm4 = vcmp.gt.f32.partialorder %v6594_v21, 0.0 }
 0x2a5   : > { %v3041_v55 = vrot.slane %v3040_v10, 2  ;;  %v2746_v22 = vmax.f32 %v2744_v17, %v2745_v45  ;;  %v808_v1 = vpop.permute.xlu0 %807  ;;  %v2618_v45 = vsel %vm1850_vm14, %v6314_v25, -1e+30  ;;  %v6637_v56 = vsel %vm2637_vm5, %v2490_v53, -inf }
 0x2a6   : > { %vm1676_vm6 = vcmp.gt.f32.partialorder %v808_v1, 0.0  ;;  %v6648_v1 = vmax.f32 %v3215_v12, %v3216_v44  ;;  %v3145_v46 = vmax.f32 %v6515_v0, %v6630_v41  ;;  %v2814_v21 = vmax.f32 %v2812_v32, %v2813_v16 }
 0x2a7   : > { %v3042_v40 = vmax.f32 %v3040_v10, %v3041_v55  ;;  %v1344_v5 = vpop.permute.xlu1 %1343  ;;  %v2747_v14 = vrot.slane %v2746_v22, 1  ;;  %v2444_v37 = vsel %vm1676_vm6, %v6541_v31, -1e+30  ;;  %v2587_v55 = vsel %vm1819_vm1, %v6438_v35, -1e+30 }
 0x2a8   : > { %vm1804_vm8 = vcmp.gt.f32.partialorder %v1344_v5, 0.0  ;;  %v2778_v26 = vsel %vm2637_vm5, %v2444_v37, -inf  ;;  %v6656_v5 = vsel %vm2637_vm5, %v2618_v45, -inf  ;;  %v3109_v11 = vsel %vm2637_vm5, %v2587_v55, -inf }
 0x2a9   : > { %v3043_v49 = vrot.slane %v3042_v40, 1  ;;  %v2572_v4 = vsel %vm1804_vm8, %v6541_v31, -1e+30  ;;  %v2748_v54 = vmax.f32 %v2746_v22, %v2747_v14  ;;  %v2779_v36 = vmax.f32 %v2777_v57, %v2778_v26  ;;  %v1068_v33 = vpop.permute.xlu0 %1067 }
 0x2aa   : > { %v3074_v47 = vsel %vm2637_vm5, %v2572_v4, -inf  ;;  %vm1738_vm9 = vcmp.gt.f32.partialorder %v1068_v33, 0.0  ;;  %v2475_v24 = vsel %vm1707_vm4, %v6438_v35, -1e+30  ;;  %v3182_v2 = vmax.f32 %v6599_v30, %v6656_v5 }
 0x2ab   : > { %v3044_v52 = vmax.f32 %v3042_v40, %v3043_v49  ;;  %v3075_v9 = vmax.f32 %v3073_v29, %v3074_v47  ;;  %v1604_v50 = vpop.permute.xlu1 %1603  ;;  %v3251_v3 = vsel %vm3250_vm11, %v2748_v54, %v6569_v58  ;;  %v2780_v17 = vrot.slane %v2779_v36, 4 }
 0x2ac   : > { %v2506_v12 = vsel %vm1738_vm9, %v6314_v25, -1e+30  ;;  %vm1866_vm7 = vcmp.gt.f32.partialorder %v1604_v50, 0.0  ;;  %v3110_v32 = vmax.f32 %v3108_v19, %v3109_v11  ;;  %v2850_v26 = vsel %vm2637_vm5, %v2475_v24, -inf }
 0x2ad   : > { %v3263_v10 = vsel %vm3250_vm11, %v3044_v52, %v3262_v27  ;;  %v3076_v20 = vrot.slane %v3075_v9, 4  ;;  %v2781_v57 = vmax.f32 %v2779_v36, %v2780_v17  ;;  %v1474_v58 = vpop.permute.xlu0 %1473  ;;  %v6643_v27 = vmax.f32 %v2919_v43, %v2920_v48 }
 0x2ae   : > { %v2886_v43 = vmax.f32 %v6546_v18, %v6637_v56  ;;  %vm1835_vm11 = vcmp.gt.f32.partialorder %v1474_v58, 0.0  ;;  %v6671_v63 = vsel %vm2637_vm5, %v2506_v12, -inf  ;;  %v2634_v47 = vsel %vm1866_vm7, %v6314_v25, -1e+30 }
 0x2af   : > { %v3077_v29 = vmax.f32 %v3075_v9, %v3076_v20  ;;  %v1005_v22 = vpop.permute.xlu1 %1004  ;;  %v2782_v40 = vrot.slane %v2781_v57, 2  ;;  %v2603_v30 = vsel %vm1835_vm11, %v6438_v35, -1e+30  ;;  %v2851_v48 = vmax.f32 %v2849_v51, %v2850_v26 }
 0x2b0   : > { %vm1723_vm10 = vcmp.gt.f32.partialorder %v1005_v22, 0.0  ;;  %v2923_v17 = vmax.f32 %v6643_v27, %v6671_v63  ;;  %v3218_v20 = vsel %vm2637_vm5, %v2634_v47, -inf  ;;  %vm3254_vm8 = vcmask 1044484  }
 0x2b1   : > { %v3078_v34 = vrot.slane %v3077_v29, 2  ;;  %v2783_v42 = vmax.f32 %v2781_v57, %v2782_v40  ;;  %v875_v62 = vpop.permute.xlu0 %874  ;;  %v3146_v57 = vsel %vm2637_vm5, %v2603_v30, -inf  ;;  %v3219_v22 = vmax.f32 %v6648_v1, %v3218_v20 }
 0x2b2   : > { %vm1692_vm2 = vcmp.gt.f32.partialorder %v875_v62, 0.0  ;;  %v3147_v12 = vmax.f32 %v3145_v46, %v3146_v57  ;;  %vm3256_vm4 = vcmask 1045509  }
 0x2b3   : > { %v3079_v14 = vmax.f32 %v3077_v29, %v3078_v34  ;;  %v1541_v61 = vpop.permute.xlu1 %1540  ;;  %v2784_v37 = vrot.slane %v2783_v42, 1  ;;  %v2460_v49 = vsel %vm1692_vm2, %v6541_v31, -1e+30  ;;  %vm3258_vm2 = vcmask 1046534  }
 0x2b4   : > { %v2815_v54 = vsel %vm2637_vm5, %v2460_v49, -inf  ;;  %vm1851_vm15 = vcmp.gt.f32.partialorder %v1541_v61, 0.0 }
 0x2b5   : > { %v3080_v4 = vrot.slane %v3079_v14, 1  ;;  %v2785_v36 = vmax.f32 %v2783_v42, %v2784_v37  ;;  %v2816_v33 = vmax.f32 %v2814_v21, %v2815_v54  ;;  %v1411_v52 = vpop.permute.xlu0 %1410  ;;  %v2619_v39 = vsel %vm1851_vm15, %v6438_v35, -1e+30 }
 0x2b6   : > { %vm1820_vm3 = vcmp.gt.f32.partialorder %v1411_v52, 0.0  ;;  %v3183_v11 = vsel %vm2637_vm5, %v2619_v39, -inf }
 0x2b7   : > { %v3081_v59 = vmax.f32 %v3079_v14, %v3080_v4  ;;  %v1072_v28 = vpop.permute.xlu1 %1071  ;;  %v6677_v19 = vsel %vm3252_vm12, %v2785_v36, %v3251_v3  ;;  %v2817_v9 = vrot.slane %v2816_v33, 4  ;;  %v2588_v50 = vsel %vm1820_vm3, %v6541_v31, -1e+30 }
 0x2b8   : > { %vm1739_vm6 = vcmp.gt.f32.partialorder %v1072_v28, 0.0  ;;  %v3111_v44 = vsel %vm2637_vm5, %v2588_v50, -inf  ;;  %v2491_v3 = vsel %vm1723_vm10, %v6438_v35, -1e+30  ;;  %v3184_v4 = vmax.f32 %v3182_v2, %v3183_v11 }
 0x2b9   : > { %v6684_v53 = vsel %vm3252_vm12, %v3081_v59, %v3263_v10  ;;  %v2818_v16 = vmax.f32 %v2816_v33, %v2817_v9  ;;  %v3112_v45 = vmax.f32 %v3110_v32, %v3111_v44  ;;  %v942_v55 = vpop.permute.xlu0 %941  ;;  %v2507_v38 = vsel %vm1739_vm6, %v6438_v35, -1e+30 }
 0x2ba   : > { %vm1708_vm13 = vcmp.gt.f32.partialorder %v942_v55, 0.0  ;;  %v2887_v27 = vsel %vm2637_vm5, %v2491_v3, -inf  ;;  %v2924_v62 = vsel %vm2637_vm5, %v2507_v38, -inf  ;;  %vm3260_vm10 = vcmask 1047559  }
 0x2bb   : > { %v1608_v51 = vpop.permute.xlu1 %1607  ;;  %v2819_v10 = vrot.slane %v2818_v16, 2  ;;  %v3113_v58 = vrot.slane %v3112_v45, 4  ;;  %v2476_v29 = vsel %vm1708_vm13, %v6541_v31, -1e+30  ;;  %v2888_v26 = vmax.f32 %v2886_v43, %v2887_v27 }
 0x2bc   : > { %vm1867_vm14 = vcmp.gt.f32.partialorder %v1608_v51, 0.0  ;;  %v2852_v40 = vsel %vm2637_vm5, %v2476_v29, -inf  ;;  %v2925_v47 = vmax.f32 %v2923_v17, %v2924_v62 }
 0x2bd   : > { %v2635_v21 = vsel %vm1867_vm14, %v6438_v35, -1e+30  ;;  %v2820_v5 = vmax.f32 %v2818_v16, %v2819_v10  ;;  %v3114_v34 = vmax.f32 %v3112_v45, %v3113_v58  ;;  %v2853_v24 = vmax.f32 %v2851_v48, %v2852_v40  ;;  %v1478_v42 = vpop.permute.xlu0 %1477 }
 0x2be   : > { %v3220_v1 = vsel %vm2637_vm5, %v2635_v21, -inf  ;;  %vm1836_vm1 = vcmp.gt.f32.partialorder %v1478_v42, 0.0 }
 0x2bf   : > { %v1545_v14 = vpop.permute.xlu1 %1544  ;;  %v2821_v61 = vrot.slane %v2820_v5, 1  ;;  %v3115_v32 = vrot.slane %v3114_v34, 2  ;;  %v2854_v37 = vrot.slane %v2853_v24, 4  ;;  %v2604_v49 = vsel %vm1836_vm1, %v6541_v31, -1e+30 }
 0x2c0   : > { %v3148_v63 = vsel %vm2637_vm5, %v2604_v49, -inf  ;;  %vm1852_vm12 = vcmp.gt.f32.partialorder %v1545_v14, 0.0  ;;  %v3221_v30 = vmax.f32 %v3219_v22, %v3220_v1 }
 0x2c1   : > { %v2822_v0 = vmax.f32 %v2820_v5, %v2821_v61  ;;  %v3116_v41 = vmax.f32 %v3114_v34, %v3115_v32  ;;  %v2855_v46 = vmax.f32 %v2853_v24, %v2854_v37  ;;  %v3149_v54 = vmax.f32 %v3147_v12, %v3148_v63  ;;  %v1009_v36 = vpop.permute.xlu0 %1008 }
 0x2c2   : > { %v2620_v33 = vsel %vm1852_vm12, %v6541_v31, -1e+30  ;;  %vm1724_vm9 = vcmp.gt.f32.partialorder %v1009_v36, 0.0 }
 0x2c3   : > { %v1612_v52 = vpop.permute.xlu1 %1611  ;;  %v3117_v59 = vrot.slane %v3116_v41, 1  ;;  %v2856_v28 = vrot.slane %v2855_v46, 2  ;;  %v3150_v18 = vrot.slane %v3149_v54, 4  ;;  %v3185_v56 = vsel %vm2637_vm5, %v2620_v33, -inf  ;;  %v6728_v33 = vld [vmem:[%s6835_s4 + $0x8] sm:$0xff] }
 0x2c4   : > { %v3186_v43 = vmax.f32 %v3184_v4, %v3185_v56  ;;  %v2492_v2 = vsel %vm1724_vm9, %v6541_v31, -1e+30  ;;  %vm1868_vm7 = vcmp.gt.f32.partialorder %v1612_v52, 0.0  ;;  %v3255_v9 = vsel %vm3254_vm8, %v2822_v0, %v6677_v19 }
 0x2c5   : > { %v3118_v50 = vmax.f32 %v3116_v41, %v3117_v59  ;;  %v2857_v48 = vmax.f32 %v2855_v46, %v2856_v28  ;;  %v3151_v17 = vmax.f32 %v3149_v54, %v3150_v18  ;;  %v2889_v44 = vsel %vm2637_vm5, %v2492_v2, -inf  ;;  %v1076_v20 = vpop.permute.xlu0 %1075  ;;  %v6733_v28 = vld [vmem:[%s6835_s4] sm:$0xff] }
 0x2c6   : > { %v3187_v3 = vrot.slane %v3186_v43, 4  ;;  %v2890_v16 = vmax.f32 %v2888_v26, %v2889_v44  ;;  %v2636_v45 = vsel %vm1868_vm7, %v6541_v31, -1e+30  ;;  %vm1740_vm11 = vcmp.gt.f32.partialorder %v1076_v20, 0.0 }
 0x2c7   : > { %v2858_v55 = vrot.slane %v2857_v48, 1  ;;  %v3152_v57 = vrot.slane %v3151_v17, 2  ;;  %v3222_v39 = vsel %vm2637_vm5, %v2636_v45, -inf  ;;  %v2508_v38 = vsel %vm1740_vm11, %v6541_v31, -1e+30 }
 0x2c8   : > { %v3188_v51 = vmax.f32 %v3186_v43, %v3187_v3  ;;  %v2891_v10 = vrot.slane %v2890_v16, 4  ;;  %v3223_v19 = vmax.f32 %v3221_v30, %v3222_v39  ;;  %v2926_v58 = vsel %vm2637_vm5, %v2508_v38, -inf  ;;  %v3742_v3 = vld [vmem:[%s4282_s24 + $0x10] sm:$0xff]  }
 0x2c9   : > { %v2859_v29 = vmax.f32 %v2857_v48, %v2858_v55  ;;  %v3153_v22 = vmax.f32 %v3151_v17, %v3152_v57  ;;  %v2927_v27 = vmax.f32 %v2925_v47, %v2926_v58  ;;  %v3265_v40 = vsel %vm3254_vm8, %v3118_v50, %v6684_v53  ;;  %v3741_v17 = vld [vmem:[%s4282_s24 + $0x8] sm:$0xff]   ;;  %v3743_v55 = vld [vmem:[%s4282_s24 + $0x18] sm:$0xff]  }
 0x2ca   : > { %v3189_v21 = vrot.slane %v3188_v51, 2  ;;  %v2892_v5 = vmax.f32 %v2890_v16, %v2891_v10  ;;  %v3224_v11 = vrot.slane %v3223_v19, 4  ;;  %v3712_v44 = vunpack.c.h.bf16 %v6424_v60  ;;  %v3744_v60 = vld [vmem:[%s4282_s24 + $0x20] sm:$0xff]   ;;  %v3745_v10 = vld [vmem:[%s4282_s24 + $0x28] sm:$0xff]  }
 0x2cb   : > { %v3154_v34 = vrot.slane %v3153_v22, 1  ;;  %v2928_v24 = vrot.slane %v2927_v27, 4  ;;  %v3257_v42 = vsel %vm3256_vm4, %v2859_v29, %v3255_v9  ;;  %v3715_v20 = vunpack.c.l.bf16 %v3741_v17  ;;  %v3746_v29 = vld [vmem:[%s4282_s24 + $0x30] sm:$0xff]  }
 0x2cc   : > { %v3190_v12 = vmax.f32 %v3188_v51, %v3189_v21  ;;  %v2893_v62 = vrot.slane %v2892_v5, 2  ;;  %v3225_v1 = vmax.f32 %v3223_v19, %v3224_v11  ;;  %v3716_v16 = vunpack.c.h.bf16 %v3741_v17 }
 0x2cd   : > { %v3155_v14 = vmax.f32 %v3153_v22, %v3154_v34  ;;  %v2929_v61 = vmax.f32 %v2927_v27, %v2928_v24  ;;  %v3719_v45 = vunpack.c.l.bf16 %v3742_v3  ;;  %v3720_v57 = vunpack.c.h.bf16 %v3742_v3  ;;  %v7297_v34 = vld [vmem:[#allocation5_spill] sm:$0xff] }
 0x2ce   : > { %v3191_v32 = vrot.slane %v3190_v12, 1  ;;  %v2894_v37 = vmax.f32 %v2892_v5, %v2893_v62  ;;  %v3226_v49 = vrot.slane %v3225_v1, 2  ;;  %v3723_v39 = vunpack.c.l.bf16 %v3743_v55 }
 0x2cf   : > { %v2930_v26 = vrot.slane %v2929_v61, 2  ;;  %v3266_v4 = vsel %vm3256_vm4, %v3155_v14, %v3265_v40  ;;  %v3724_v38 = vunpack.c.h.bf16 %v3743_v55  ;;  %v3727_v51 = vunpack.c.l.bf16 %v3744_v60  ;;  %v3747_v40 = vld [vmem:[%s4282_s24 + $0x38] sm:$0xff]  }
 0x2d0   : > { %v3192_v53 = vmax.f32 %v3190_v12, %v3191_v32  ;;  %v2895_v63 = vrot.slane %v2894_v37, 1  ;;  %v3227_v0 = vmax.f32 %v3225_v1, %v3226_v49  ;;  %v3728_v19 = vunpack.c.h.bf16 %v3744_v60  ;;  %v7299_v1 = vld [vmem:[#allocation91_spill] sm:$0xff]  ;;  %v7300_v49 = vld [vmem:[#allocation96_spill] sm:$0xff] }
 0x2d1   : > { %v2931_v41 = vmax.f32 %v2929_v61, %v2930_v26  ;;  %v3731_v58 = vunpack.c.l.bf16 %v3745_v10  ;;  %v3732_v22 = vunpack.c.h.bf16 %v3745_v10  ;;  %v3735_v27 = vunpack.c.l.bf16 %v3746_v29 }
 0x2d2   : > { %v2896_v46 = vmax.f32 %v2894_v37, %v2895_v63  ;;  %v3228_v54 = vrot.slane %v3227_v0, 1  ;;  %v3267_v36 = vsel %vm3258_vm2, %v3192_v53, %v3266_v4  ;;  %v3736_v21 = vunpack.c.h.bf16 %v3746_v29  ;;  %v7301_v53 = vld [vmem:[#allocation92_spill] sm:$0xff] }
 0x2d3   : > { %v2932_v47 = vrot.slane %v2931_v41, 1  ;;  %v3739_v5 = vunpack.c.l.bf16 %v3747_v40  ;;  %v3740_v11 = vunpack.c.h.bf16 %v3747_v40 }
 0x2d4   : > { %v3229_v30 = vmax.f32 %v3227_v0, %v3228_v54  ;;  %v3259_v52 = vsel %vm3258_vm2, %v2896_v46, %v3257_v42  ;;  %v7298_v42 = vld [vmem:[#allocation90_spill] sm:$0xff]  ;;  %v7302_v54 = vld [vmem:[#allocation101_spill] sm:$0xff] }
 0x2d5   : > { %v2933_v59 = vmax.f32 %v2931_v41, %v2932_v47 }
 0x2d6   : > { %v3268_v18 = vsel %vm3260_vm10, %v3229_v30, %v3267_v36  ;;  %v7303_v30 = vld [vmem:[#allocation98_spill] sm:$0xff] }
 0x2d7   : > { %v3261_v56 = vsel %vm3260_vm10, %v2933_v59, %v3259_v52  ;;  %v6736_v43 = vmax.f32 %v6728_v33, %v3268_v18 }
 0x2d8   : > { %v6739_v2 = vmax.f32 %v6733_v28, %v3261_v56 }
 0x2d9   : > { %v3593_v9 = vsub.f32 %v6728_v33, %v6736_v43  ;;  %3605 = vst.msk [vmem:[%s6835_s4 + $0x8] sm:$0xff] %vm2637_vm5, %v6736_v43 }
 0x2da   : > { %v3967_v50 = vpack.c.bf16 %v6736_v43, %v6739_v2  ;;  %v3592_v48 = vsub.f32 %v6733_v28, %v6739_v2  ;;  %3604 = vst.msk [vmem:[%s6835_s4] sm:$0xff] %vm2637_vm5, %v6739_v2 }
 0x2dc   : > { %3968 = vmatprep.subr.bf16.mxu1 %v3967_v50 }
 0x2dd   : > { %3970 = vmatpush3.bf16.msra.mxu1 %v3967_v50 }
 0x2e0   : > { %3877 = vmatmul.mubr.msk.f32.vlgmr.msra.gmra.mrb[0].mxu1 %vm3273_vm0, %v3712_v44  ;;  %v7304_v44 = vld [vmem:[#allocation39_spill] sm:$0xff] }
 0x2e1   : > { %3879 = vmatprep.mubr.msk.f32.mxu1 %vm3273_vm0, %v3715_v20 }
 0x2e4   : > { %3880 = vmatmul.mubr.msk.f32.gmra.mrb[2].mxu1 %vm3273_vm0, %v3716_v16 }
 0x2e5   : > { %3882 = vmatprep.mubr.msk.f32.mxu1 %vm3273_vm0, %v3719_v45 }
 0x2e8   : > { %3883 = vmatmul.mubr.msk.f32.gmra.mrb[4].mxu1 %vm3273_vm0, %v3720_v57 }
 0x2e9   : > { %3885 = vmatprep.mubr.msk.f32.mxu1 %vm3273_vm0, %v3723_v39 }
 0x2ec   : > { %3886 = vmatmul.mubr.msk.f32.gmra.mrb[6].mxu1 %vm3273_vm0, %v3724_v38 }
 0x2ed   : > { %3888 = vmatprep.mubr.msk.f32.mxu1 %vm3273_vm0, %v3727_v51 }
 0x2f0   : > { %3889 = vmatmul.mubr.msk.f32.gmra.mrb[8].mxu1 %vm3273_vm0, %v3728_v19 }
 0x2f1   : > { %3891 = vmatprep.mubr.msk.f32.mxu1 %vm3273_vm0, %v3731_v58 }
 0x2f4   : > { %3892 = vmatmul.mubr.msk.f32.gmra.mrb[10].mxu1 %vm3273_vm0, %v3732_v22 }
 0x2f5   : > { %3894 = vmatprep.mubr.msk.f32.mxu1 %vm3273_vm0, %v3735_v27 }
 0x2f8   : > { %3895 = vmatmul.mubr.msk.f32.gmra.mrb[12].mxu1 %vm3273_vm0, %v3736_v21 }
 0x2f9   : > { %3897 = vmatprep.mubr.msk.f32.mxu1 %vm3273_vm0, %v3739_v5 }
 0x2fc   : > { %3898 = vmatmul.mubr.msk.f32.gmra.mrb[14].mxu1 %vm3273_vm0, %v3740_v11 }
 0x2fd   : > { %3932 = vmatprep.mubr.f32.mxu1 %v7297_v34 }
 0x3b3   : > { %v3878_v24 = vpop.f32.mrb[0].mxu1 }
 0x3b4   : > { %v3468_v12 = vsub.f32 %v7298_v42, %v3878_v24  ;;  %v3388_v62 = vpop.f32.mrb[1].mxu1 }
 0x3b5   : > { %v3467_v14 = vsub.f32 %v7299_v1, %v3388_v62 }
 0x3b6   : > { %v3485_v61 = vmul.f32 1.442695, %v3468_v12 }
 0x3b7   : > { %v3483_v32 = vmul.f32 1.442695, %v3467_v14  ;;  %v3881_v37 = vpop.f32.mrb[2].mxu1 }
 0x3b8   : > { %4047 = vpow2.f32 %v3485_v61  ;;  %v3470_v26 = vsub.f32 %v7300_v49, %v3881_v37  ;;  %v3398_v4 = vpop.f32.mrb[3].mxu1 }
 0x3b9   : > { %4049 = vpow2.f32 %v3483_v32  ;;  %v3469_v63 = vsub.f32 %v7301_v53, %v3398_v4 }
 0x3ba   : > { %v3489_v0 = vmul.f32 1.442695, %v3470_v26 }
 0x3bb   : > { %v3487_v41 = vmul.f32 1.442695, %v3469_v63  ;;  %v3884_v46 = vpop.f32.mrb[4].mxu1 }
 0x3bc   : > { %4051 = vpow2.f32 %v3489_v0  ;;  %v3472_v36 = vsub.f32 %v7302_v54, %v3884_v46  ;;  %v3408_v47 = vpop.f32.mrb[5].mxu1 }
 0x3bd   : > { %4053 = vpow2.f32 %v3487_v41  ;;  %v3471_v52 = vsub.f32 %v7303_v30, %v3408_v47 }
 0x3be   : > { %v3493_v59 = vmul.f32 1.442695, %v3472_v36 }
 0x3bf   : > { %v3491_v18 = vmul.f32 1.442695, %v3471_v52  ;;  %v3887_v56 = vpop.f32.mrb[6].mxu1  ;;  %v7305_v52 = vld [vmem:[#allocation7_spill] sm:$0xff] }
 0x3c0   : > { %4055 = vpow2.f32 %v3493_v59  ;;  %v3474_v50 = vsub.f32 %v5267_v15, %v3887_v56  ;;  %v3418_v17 = vpop.f32.mrb[7].mxu1  ;;  %v3596_v59 = vmul.f32 1.442695, %v3593_v9 }
 0x3c1   : > { %4057 = vpow2.f32 %v3491_v18  ;;  %v3473_v20 = vsub.f32 %v7304_v44, %v3418_v17  ;;  %v3594_v18 = vmul.f32 1.442695, %v3592_v48  ;;  %v3590_v44 = vld [vmem:[%s6836_s5] sm:$0xff] }
 0x3c2   : > { %v4048_v3 = vpop.eup %4047  ;;  %v3497_v16 = vmul.f32 1.442695, %v3474_v50  ;;  %v3591_v50 = vld [vmem:[%s6836_s5 + $0x8] sm:$0xff] }
 0x3c3   : > { %v4050_v45 = vpop.eup %4049  ;;  %v3495_v55 = vmul.f32 1.442695, %v3473_v20  ;;  %v3890_v57 = vpop.f32.mrb[8].mxu1 }
 0x3c4   : > { %4059 = vpow2.f32 %v3497_v16  ;;  %v3476_v39 = vsub.f32 %v5701_v13, %v3890_v57  ;;  %v3428_v60 = vpop.f32.mrb[9].mxu1  ;;  %v3971_v38 = vpack.c.bf16 %v4048_v3, %v4050_v45 }
 0x3c5   : > { %4061 = vpow2.f32 %v3495_v55  ;;  %v3475_v51 = vsub.f32 %v5641_v7, %v3428_v60 }
 0x3c6   : > { %v4052_v10 = vpop.eup %4051  ;;  %v3501_v19 = vmul.f32 1.442695, %v3476_v39  ;;  %3972 = vmatprep.subr.bf16.mxu1 %v3971_v38 }
 0x3c7   : > { %v4054_v15 = vpop.eup %4053  ;;  %v3499_v58 = vmul.f32 1.442695, %v3475_v51  ;;  %v3893_v29 = vpop.f32.mrb[10].mxu1  ;;  %3974 = vmatpush3.bf16.msra.mxu1 %v3971_v38 }
 0x3c8   : > { %4063 = vpow2.f32 %v3501_v19  ;;  %v3478_v22 = vsub.f32 %v7271_v8, %v3893_v29  ;;  %v3438_v27 = vpop.f32.mrb[11].mxu1  ;;  %v3975_v40 = vpack.c.bf16 %v4052_v10, %v4054_v15 }
 0x3c9   : > { %4065 = vpow2.f32 %v3499_v58  ;;  %v3477_v13 = vsub.f32 %v5799_v6, %v3438_v27 }
 0x3ca   : > { %v4056_v21 = vpop.eup %4055  ;;  %v3505_v5 = vmul.f32 1.442695, %v3478_v22  ;;  %3976 = vmatprep.subr.bf16.mxu1 %v3975_v40 }
 0x3cb   : > { %v4058_v11 = vpop.eup %4057  ;;  %v3503_v7 = vmul.f32 1.442695, %v3477_v13  ;;  %v3896_v34 = vpop.f32.mrb[12].mxu1  ;;  %3978 = vmatpush3.bf16.msra.mxu1 %v3975_v40 }
 0x3cc   : > { %4067 = vpow2.f32 %v3505_v5  ;;  %v3480_v24 = vsub.f32 %v6314_v25, %v3896_v34  ;;  %v3448_v42 = vpop.f32.mrb[13].mxu1  ;;  %v3979_v12 = vpack.c.bf16 %v4056_v21, %v4058_v11 }
 0x3cd   : > { %4069 = vpow2.f32 %v3503_v7  ;;  %v3479_v8 = vsub.f32 %v7277_v23, %v3448_v42 }
 0x3ce   : > { %v4060_v62 = vpop.eup %4059  ;;  %v3509_v1 = vmul.f32 1.442695, %v3480_v24  ;;  %3980 = vmatprep.subr.bf16.mxu1 %v3979_v12 }
 0x3cf   : > { %v4062_v14 = vpop.eup %4061  ;;  %v3507_v6 = vmul.f32 1.442695, %v3479_v8  ;;  %v3899_v61 = vpop.f32.mrb[14].mxu1  ;;  %3982 = vmatpush3.bf16.msra.mxu1 %v3979_v12 }
 0x3d0   : > { %4071 = vpow2.f32 %v3509_v1  ;;  %v3482_v32 = vsub.f32 %v6541_v31, %v3899_v61  ;;  %v3458_v37 = vpop.f32.mrb[15].mxu1  ;;  %v3983_v49 = vpack.c.bf16 %v4060_v62, %v4062_v14 }
 0x3d1   : > { %4073 = vpow2.f32 %v3507_v6  ;;  %v3481_v25 = vsub.f32 %v6438_v35, %v3458_v37 }
 0x3d2   : > { %v4064_v26 = vpop.eup %4063  ;;  %v3513_v4 = vmul.f32 1.442695, %v3482_v32  ;;  %3984 = vmatprep.subr.bf16.mxu1 %v3983_v49 }
 0x3d3   : > { %v4066_v53 = vpop.eup %4065  ;;  %v3511_v23 = vmul.f32 1.442695, %v3481_v25  ;;  %3986 = vmatpush3.bf16.msra.mxu1 %v3983_v49 }
 0x3d4   : > { %4075 = vpow2.f32 %v3513_v4  ;;  %v3987_v63 = vpack.c.bf16 %v4064_v26, %v4066_v53 }
 0x3d5   : > { %4077 = vpow2.f32 %v3511_v23 }
 0x3d6   : > { %v4068_v0 = vpop.eup %4067  ;;  %3988 = vmatprep.subr.bf16.mxu1 %v3987_v63  ;;  %4079 = vpow2.f32 %v3596_v59 }
 0x3d7   : > { %v4070_v41 = vpop.eup %4069  ;;  %3990 = vmatpush3.bf16.msra.mxu1 %v3987_v63  ;;  %4081 = vpow2.f32 %v3594_v18 }
 0x3d8   : > { %v3991_v46 = vpack.c.bf16 %v4068_v0, %v4070_v41 }
 0x3da   : > { %v4072_v31 = vpop.eup %4071  ;;  %3992 = vmatprep.subr.bf16.mxu1 %v3991_v46 }
 0x3db   : > { %v4074_v54 = vpop.eup %4073  ;;  %3994 = vmatpush3.bf16.msra.mxu1 %v3991_v46 }
 0x3dc   : > { %v3995_v36 = vpack.c.bf16 %v4072_v31, %v4074_v54 }
 0x3de   : > { %v4076_v35 = vpop.eup %4075  ;;  %3996 = vmatprep.subr.bf16.mxu1 %v3995_v36 }
 0x3df   : > { %v4078_v47 = vpop.eup %4077  ;;  %3998 = vmatpush3.bf16.msra.mxu1 %v3995_v36 }
 0x3e0   : > { %v3999_v30 = vpack.c.bf16 %v4076_v35, %v4078_v47  ;;  %v4080_v56 = vpop.eup %4079 }
 0x3e1   : > { %v4082_v17 = vpop.eup %4081  ;;  %v3599_v20 = vmul.f32 %v4080_v56, %v3591_v50 }
 0x3e2   : > { %4000 = vmatprep.subr.bf16.mxu1 %v3999_v30  ;;  %v3598_v33 = vmul.f32 %v4082_v17, %v3590_v44 }
 0x3e3   : > { %4002 = vmatpush3.bf16.msra.mxu1 %v3999_v30 }
 0x3e6   : > { %3933 = vmatmul.mubr.f32.vlgmr.msra.gmra.mrb[16].mxu1 %v7305_v52 }
 0x4b9   : > { %v3934_v3 = vpop.f32.mrb[16].mxu1 }
 0x4ba   : > { %v3601_v43 = vadd.f32 %v3934_v3, %v3599_v20  ;;  %v3581_v9 = vpop.f32.mrb[17].mxu1 }
 0x4bb   : > { %v3600_v16 = vadd.f32 %v3598_v33, %v3581_v9 }
 0x4bc   : > { %3603 = vst.msk [vmem:[%s6836_s5 + $0x8] sm:$0xff] %vm2637_vm5, %v3601_v43 }
 0x4bd   : > { %3602 = vst.msk [vmem:[%s6836_s5] sm:$0xff] %vm2637_vm5, %v3600_v16 }
 0x4be PF: > { %p16_p7 = scmp.ge.s32.totalorder %s4207_s23, 4   ;;  %s7306_s18 = smov %s4139_s19 }
 0x4bf   : > { %s7307_s19 = smov %s4143_s20  ;;  %s7308_s20 = smov %s4217_s26 }
 0x4c0   : > { %s7309_s21 = smov %s4207_s23  ;;  %18 = sbr.rel (!%p16_p7) target bundleno = 3 (0x3), region = 90 }
 0x4c7   :  { %3623 = vsyncpa [#allocation3], 1 }
 0x4c8   :  { %3625 = vsyncpa [#allocation3 + $0x1], 1 }

</bundles_post_ra>
